<compile_context>
chip_gen: v6e
topology: v6e:2x2x1
jax: 0.10.0
libtpu: 0.0.40
codegen_flags: <defaults>
</compile_context>

<pallas_src>
import jax
import jax.numpy as jnp
from jax import lax
from jax.experimental import pallas as pl
from jax.experimental.pallas import tpu as pltpu

# Envs per grid step.  E_BLK * B = 256 matmul rows (full v6e/v7x MXU M, 2x v5e's
# 128) while keeping >= 2 grid steps at rollout-sized env counts for megacore.
E_BLK = 32


def policy_net_kernel(x_ref, w1_ref, b1_ref, w2_ref, b2_ref, out_ref):
    # x_ref : (E_BLK, B, S)   per-step slab of envs
    # w1_ref: (S, H)  b1_ref: (1, H)  w2_ref: (H, A)  b2_ref: (1, A)   (resident)
    # out_ref: (E_BLK, B, A)  softmax over the batch axis (PyTorch dim=0 per env)
    e_blk, batch, state_dim = x_ref.shape
    act_dim = out_ref.shape[-1]

    # Merge env and batch axes: free leading-dim reshape (last dim / sublane
    # structure untouched) that gives the MXU M = E_BLK * B rows.
    x = x_ref[...].reshape(e_blk * batch, state_dim)

    h = jnp.dot(x, w1_ref[...],
                preferred_element_type=jnp.float32,
                precision=lax.Precision.HIGHEST) + b1_ref[...]
    h = jnp.maximum(h, 0.0)
    logits = jnp.dot(h, w2_ref[...],
                     preferred_element_type=jnp.float32,
                     precision=lax.Precision.HIGHEST) + b2_ref[...]

    # Per-env softmax over the batch axis.  Leading-dim split back to
    # (E_BLK, B, A) is free; the reduction is a sublane (axis=-2) reduce.
    logits = logits.reshape(e_blk, batch, act_dim)
    m = jnp.max(logits, axis=1, keepdims=True)
    e = jnp.exp(logits - m)
    s = jnp.sum(e, axis=1, keepdims=True)
    out_ref[...] = e * pl.reciprocal(s, approx=False)  # exact: keep 1e-5 tolerance


@jax.jit
def policy_net_forward(x, w1, b1, w2, b2):
    """x: (B, S) or (E, B, S); w1: (S, H); b1: (H,); w2: (H, A); b2: (A,).
    Returns softmax(fc2(relu(fc1(x))), dim=0) per env: (B, A) or (E, B, A)."""
    squeeze = x.ndim == 2
    if squeeze:
        x = x[None]
    num_envs, batch, state_dim = x.shape
    hidden_dim = w1.shape[1]
    act_dim = w2.shape[1]

    x = x.astype(jnp.float32)
    w1 = jnp.asarray(w1, jnp.float32)
    b1 = jnp.asarray(b1, jnp.float32).reshape(1, hidden_dim)
    w2 = jnp.asarray(w2, jnp.float32)
    b2 = jnp.asarray(b2, jnp.float32).reshape(1, act_dim)

    # Pad env axis to a multiple of E_BLK; padded envs are sliced off below.
    grid_steps = pl.cdiv(num_envs, E_BLK)
    e_pad = grid_steps * E_BLK
    if e_pad != num_envs:
        x = jnp.pad(x, ((0, e_pad - num_envs), (0, 0), (0, 0)))

    out = pl.pallas_call(
        policy_net_kernel,
        out_shape=jax.ShapeDtypeStruct((e_pad, batch, act_dim), jnp.float32),
        grid=(grid_steps,),
        in_specs=[
            pl.BlockSpec((E_BLK, batch, state_dim), lambda g: (g, 0, 0)),  # activations
            pl.BlockSpec((state_dim, hidden_dim), lambda g: (0, 0)),       # resident w1
            pl.BlockSpec((1, hidden_dim), lambda g: (0, 0)),               # resident b1
            pl.BlockSpec((hidden_dim, act_dim), lambda g: (0, 0)),         # resident w2
            pl.BlockSpec((1, act_dim), lambda g: (0, 0)),                  # resident b2
        ],
        out_specs=pl.BlockSpec((E_BLK, batch, act_dim), lambda g: (g, 0, 0)),
        compiler_params=pltpu.CompilerParams(
            dimension_semantics=("parallel",),   # env blocks -> both TCs on v7x
            vmem_limit_bytes=32 * 1024 * 1024,   # ample; kernel uses well under 1 MiB
        ),
    )(x, w1, b1, w2, b2)

    out = out[:num_envs]
    return out[0] if squeeze else out


def reference_forward(x, w1, b1, w2, b2):
    h = jnp.maximum(jnp.dot(x, w1, precision=lax.Precision.HIGHEST) + b1, 0.0)
    logits = jnp.dot(h, w2, precision=lax.Precision.HIGHEST) + b2
    return jax.nn.softmax(logits, axis=0)


if __name__ == "__main__":
    # Shapes consistent with PolicyNet: state_dim=4, hidden_dim=32, action_dim=4.
    num_envs, batch, state_dim, hidden_dim, action_dim = 64, 8, 4, 32, 4

    key = jax.random.PRNGKey(0)
    k_x, k_w1, k_b1, k_w2, k_b2 = jax.random.split(key, 5)

    x = jax.random.normal(k_x, (num_envs, batch, state_dim), dtype=jnp.float32)

    bound1 = 1.0 / (state_dim ** 0.5)
    w1 = jax.random.uniform(k_w1, (state_dim, hidden_dim), jnp.float32, -bound1, bound1)
    b1 = jax.random.uniform(k_b1, (hidden_dim,), jnp.float32, -bound1, bound1)
    bound2 = 1.0 / (hidden_dim ** 0.5)
    w2 = jax.random.uniform(k_w2, (hidden_dim, action_dim), jnp.float32, -bound2, bound2)
    b2 = jax.random.uniform(k_b2, (action_dim,), jnp.float32, -bound2, bound2)

    # Batched path: 64 independent PolicyNet forwards, 2 grid steps of 32 envs each.
    out = jax.block_until_ready(policy_net_forward(x, w1, b1, w2, b2))
    ref = jax.vmap(lambda xe: reference_forward(xe, w1, b1, w2, b2))(x)
    assert out.shape == (num_envs, batch, action_dim)
    assert jnp.allclose(out, ref, atol=1e-5, rtol=1e-5), "batched mismatch vs reference"
    # Each action column of a dim=0 softmax sums to 1 within its env.
    assert jnp.allclose(jnp.sum(out, axis=1),
                        jnp.ones((num_envs, action_dim)), atol=1e-5)

    # Single-call path: exact PolicyNet.forward semantics on a (B, S) input.
    out1 = jax.block_until_ready(policy_net_forward(x[0], w1, b1, w2, b2))
    ref1 = reference_forward(x[0], w1, b1, w2, b2)
    assert out1.shape == (batch, action_dim)
    assert jnp.allclose(out1, ref1, atol=1e-5, rtol=1e-5), "single mismatch vs reference"

    print("KERNEL_OK")
</pallas_src>

<mosaic_0001>
module attributes {stable_mosaic.version = 11 : i64} {
  func.func @policy_net_kernel(%arg0: i32, %arg1: memref<32x8x4xf32, #tpu.memory_space<vmem>>, %arg2: memref<4x32xf32, #tpu.memory_space<vmem>>, %arg3: memref<1x32xf32, #tpu.memory_space<vmem>>, %arg4: memref<32x4xf32, #tpu.memory_space<vmem>>, %arg5: memref<1x4xf32, #tpu.memory_space<vmem>>, %arg6: memref<32x8x4xf32, #tpu.memory_space<vmem>>) attributes {dimension_semantics = [#tpu.dimension_semantics<parallel>], iteration_bounds = array<i64: 2>, scalar_prefetch = 0 : i64, scratch_operands = 0 : i64, tpu.core_type = #tpu.core_type<tc>, window_params = [{transform_indices = @transform_0, window_bounds = array<i64: 32, 8, 4>}, {pipeline_mode = #tpu.pipeline_mode<synchronous>, transform_indices = @transform_1, window_bounds = array<i64: 4, 32>}, {pipeline_mode = #tpu.pipeline_mode<synchronous>, transform_indices = @transform_2, window_bounds = array<i64: 1, 32>}, {pipeline_mode = #tpu.pipeline_mode<synchronous>, transform_indices = @transform_3, window_bounds = array<i64: 32, 4>}, {pipeline_mode = #tpu.pipeline_mode<synchronous>, transform_indices = @transform_4, window_bounds = array<i64: 1, 4>}, {transform_indices = @transform_5, window_bounds = array<i64: 32, 8, 4>}]} {
    %c0 = arith.constant 0 : index
    %c0_0 = arith.constant 0 : index
    %c0_1 = arith.constant 0 : index
    %0 = vector.load %arg1[%c0, %c0_0, %c0_1] : memref<32x8x4xf32, #tpu.memory_space<vmem>>, vector<32x8x4xf32>
    %1 = vector.shape_cast %0 : vector<32x8x4xf32> to vector<256x4xf32>
    %c0_2 = arith.constant 0 : index
    %c0_3 = arith.constant 0 : index
    %2 = vector.load %arg2[%c0_2, %c0_3] : memref<4x32xf32, #tpu.memory_space<vmem>>, vector<4x32xf32>
    %cst = arith.constant dense<0.000000e+00> : vector<256x32xf32>
    %3 = tpu.matmul %1, %2, %cst {dimension_numbers = #tpu.dot_dimension_numbers<[1], [0], [0], [1], [0, 0, 1, 1], [], []>, precision = #tpu.contract_precision<fp32>} : vector<256x4xf32>, vector<4x32xf32>, vector<256x32xf32> -> vector<256x32xf32>
    %c0_4 = arith.constant 0 : index
    %c0_5 = arith.constant 0 : index
    %4 = vector.load %arg3[%c0_4, %c0_5] : memref<1x32xf32, #tpu.memory_space<vmem>>, vector<1x32xf32>
    %5 = vector.broadcast %4 : vector<1x32xf32> to vector<256x32xf32>
    %6 = arith.addf %3, %5 : vector<256x32xf32>
    %cst_6 = arith.constant 0.000000e+00 : f32
    %7 = vector.broadcast %cst_6 : f32 to vector<256x32xf32>
    %8 = arith.maximumf %6, %7 : vector<256x32xf32>
    %c0_7 = arith.constant 0 : index
    %c0_8 = arith.constant 0 : index
    %9 = vector.load %arg4[%c0_7, %c0_8] : memref<32x4xf32, #tpu.memory_space<vmem>>, vector<32x4xf32>
    %cst_9 = arith.constant dense<0.000000e+00> : vector<256x4xf32>
    %10 = tpu.matmul %8, %9, %cst_9 {dimension_numbers = #tpu.dot_dimension_numbers<[1], [0], [0], [1], [0, 0, 1, 1], [], []>, precision = #tpu.contract_precision<fp32>} : vector<256x32xf32>, vector<32x4xf32>, vector<256x4xf32> -> vector<256x4xf32>
    %c0_10 = arith.constant 0 : index
    %c0_11 = arith.constant 0 : index
    %11 = vector.load %arg5[%c0_10, %c0_11] : memref<1x4xf32, #tpu.memory_space<vmem>>, vector<1x4xf32>
    %12 = vector.broadcast %11 : vector<1x4xf32> to vector<256x4xf32>
    %13 = arith.addf %10, %12 : vector<256x4xf32>
    %14 = vector.shape_cast %13 : vector<256x4xf32> to vector<32x8x4xf32>
    %cst_12 = arith.constant dense<0xFF800000> : vector<32x4xf32>
    %15 = vector.multi_reduction <maximumf>, %14, %cst_12 [1] : vector<32x8x4xf32> to vector<32x4xf32>
    %16 = vector.shape_cast %15 : vector<32x4xf32> to vector<32x1x4xf32>
    %17 = vector.broadcast %16 : vector<32x1x4xf32> to vector<32x8x4xf32>
    %18 = arith.subf %14, %17 : vector<32x8x4xf32>
    %19 = math.exp %18 : vector<32x8x4xf32>
    %cst_13 = arith.constant dense<0.000000e+00> : vector<32x4xf32>
    %20 = vector.multi_reduction <add>, %19, %cst_13 [1] : vector<32x8x4xf32> to vector<32x4xf32>
    %21 = vector.shape_cast %20 : vector<32x4xf32> to vector<32x1x4xf32>
    %22 = tpu.reciprocal %21 : vector<32x1x4xf32> -> vector<32x1x4xf32>
    %23 = vector.broadcast %22 : vector<32x1x4xf32> to vector<32x8x4xf32>
    %24 = arith.mulf %19, %23 : vector<32x8x4xf32>
    %c0_14 = arith.constant 0 : index
    %c0_15 = arith.constant 0 : index
    %c0_16 = arith.constant 0 : index
    %25 = vector.load %arg6[%c0_14, %c0_15, %c0_16] : memref<32x8x4xf32, #tpu.memory_space<vmem>>, vector<32x8x4xf32>
    tpu.vector_store %arg6[%c0_14, %c0_15, %c0_16], %24 {strides = array<i32>} : memref<32x8x4xf32, #tpu.memory_space<vmem>>, vector<32x8x4xf32>,
    return
  }
  func.func @transform_0(%arg0: i32) -> (i32, i32, i32) {
    %c0_i32 = arith.constant 0 : i32
    %c0_i32_0 = arith.constant 0 : i32
    %c0_i32_1 = arith.constant 0 : i32
    return %arg0, %c0_i32, %c0_i32_0 : i32, i32, i32
  }
  func.func @transform_1(%arg0: i32) -> (i32, i32) {
    %c0_i32 = arith.constant 0 : i32
    %c0_i32_0 = arith.constant 0 : i32
    %c0_i32_1 = arith.constant 0 : i32
    return %c0_i32, %c0_i32_0 : i32, i32
  }
  func.func @transform_2(%arg0: i32) -> (i32, i32) {
    %c0_i32 = arith.constant 0 : i32
    %c0_i32_0 = arith.constant 0 : i32
    %c0_i32_1 = arith.constant 0 : i32
    return %c0_i32, %c0_i32_0 : i32, i32
  }
  func.func @transform_3(%arg0: i32) -> (i32, i32) {
    %c0_i32 = arith.constant 0 : i32
    %c0_i32_0 = arith.constant 0 : i32
    %c0_i32_1 = arith.constant 0 : i32
    return %c0_i32, %c0_i32_0 : i32, i32
  }
  func.func @transform_4(%arg0: i32) -> (i32, i32) {
    %c0_i32 = arith.constant 0 : i32
    %c0_i32_0 = arith.constant 0 : i32
    %c0_i32_1 = arith.constant 0 : i32
    return %c0_i32, %c0_i32_0 : i32, i32
  }
  func.func @transform_5(%arg0: i32) -> (i32, i32, i32) {
    %c0_i32 = arith.constant 0 : i32
    %c0_i32_0 = arith.constant 0 : i32
    %c0_i32_1 = arith.constant 0 : i32
    return %arg0, %c0_i32, %c0_i32_0 : i32, i32, i32
  }
}

</mosaic_0001>

<bundles_post_ra>
// kernel: policy_net_forward.1
= control target key start
LH: loop header
LB: loop body
LE: loop exit
PB: predicated region body
PF: predicated region fallthrough
CT: control target
= control target key end

     0   :  { %s6039_s18 = smov 0   ;;  %s8298_s0 = inlined_call_operand.vmem [shape: f32[64,8,4], index: 0, kind: input, shape index: {}]   ;;  %s8299_s1 = inlined_call_operand.vmem [shape: f32[4,32], index: 1, kind: input, shape index: {}]   ;;  %s8300_s2 = inlined_call_operand.vmem [shape: f32[1,32], index: 2, kind: input, shape index: {}]   ;;  %s8301_s3 = inlined_call_operand.vmem [shape: f32[32,4], index: 3, kind: input, shape index: {}]   ;;  %s8302_s4 = inlined_call_operand.vmem [shape: f32[1,4], index: 4, kind: input, shape index: {}]   ;;  %s8303_s5 = inlined_call_operand.vmem [shape: f32[64,8,4], index: 5, kind: output, shape index: {}]  }
   0x1 LB: > { %s4802_s19 = sadd.s32 4294967295, %s6007_s18   ;;  %p4806_p0 = scmp.ge.s32.totalorder %s6007_s18, 1  ;;  %s6007_s18 = sphi %s6039_s18, %s15_s18  }
   0x2   : > { %p188_p1 = scmp.lt.s32.totalorder %s6007_s18, 3 }
   0x4   : > { %p189_p2 = pnand %p4806_p0, %p188_p1 }
   0x6   : > { %192 = sbr.rel (%p189_p2) target bundleno = 920 (0x398), region = 40 }
   0xb   : > { %v260_v0 = vld [vmem:[%s8299_s1] sm:$0xf]  ;;  %vm365_vm0 = vcmask 1043456   ;;  %s4807_s22 = sshll.u32 %s4802_s19, 5  ;;  %vm268_vm1 = vcmask 31744   ;;  %vm2191_vm2 = vcmask 261120  }
   0xc   : > { %v367_v1 = vsel %vm365_vm0, %v260_v0, 0  ;;  %p217_p3 = scmp.lt.s32.totalorder %s4807_s22, 63 }
   0xd   : > { %v6050_v2 = vand.u32 4294901760, %v367_v1 }
   0xe   : > { %s8708_s22 = smov (!%p217_p3, %s4807_s22), 63 }
   0xf   : > { %5229 = vmatprep.subr.mxu0 %v6050_v2  ;;  %v6056_v3 = vsub.f32 %v367_v1, %v6050_v2  ;;  %s4808_s23 = sshll.u32 %s8708_s22, 3 }
  0x10   : > { %5230 = vmatpush3.msra.mxu0 %v6050_v2  ;;  %s6068_s26 = scalar_lea.vmem %s8298_s0, %s4808_s23  ;;  %s8016_s16 = scalar_lea.vmem %s8303_s5, %s4808_s23 }
  0x11   : > { %v6061_v4 = vand.u32 4294901760, %v6056_v3  ;;  %5329 = vmatprep.subr.mxu0 %v6056_v3  ;;  %v228_v5 = vld [vmem:[%s6068_s26] sm:$0xff]  ;;  %v229_v6 = vld [vmem:[%s6068_s26 + $0x8] sm:$0xff]  ;;  %v230_v7 = vld [vmem:[%s6068_s26 + $0x10] sm:$0xff] }
  0x12   : > { %v270_v9 = vsel %vm268_vm1, %v228_v5, 0  ;;  %v273_v10 = vsel %vm268_vm1, %v229_v6, 0  ;;  %v276_v11 = vsel %vm268_vm1, %v230_v7, 0  ;;  %v231_v12 = vld [vmem:[%s6068_s26 + $0x18] sm:$0xff]  ;;  %v232_v13 = vld [vmem:[%s6068_s26 + $0x20] sm:$0xff]  ;;  %v233_v14 = vld [vmem:[%s6068_s26 + $0x28] sm:$0xff] }
  0x13   : > { %v789_v8 = vsub.f32 %v6056_v3, %v6061_v4  ;;  %v6082_v15 = vand.u32 4294901760, %v270_v9  ;;  %v6084_v16 = vand.u32 4294901760, %v273_v10  ;;  %v6086_v17 = vand.u32 4294901760, %v276_v11  ;;  %v234_v19 = vld [vmem:[%s6068_s26 + $0x30] sm:$0xff]  ;;  %v235_v20 = vld [vmem:[%s6068_s26 + $0x38] sm:$0xff]  ;;  %v236_v49 = vld [vmem:[%s6068_s26 + $0x40] sm:$0xff] }
  0x14   : > { %v279_v18 = vsel %vm268_vm1, %v231_v12, 0  ;;  %v282_v23 = vsel %vm268_vm1, %v232_v13, 0  ;;  %v285_v24 = vsel %vm268_vm1, %v233_v14, 0  ;;  %v288_v31 = vsel %vm268_vm1, %v234_v19, 0  ;;  %v237_v50 = vld [vmem:[%s6068_s26 + $0x48] sm:$0xff]  ;;  %v238_v51 = vld [vmem:[%s6068_s26 + $0x50] sm:$0xff] }
  0x15   : > { %v790_v21 = vand.u32 4294901760, %v789_v8  ;;  %v6091_v22 = vand.u32 4294901760, %v279_v18  ;;  %v6096_v25 = vsub.f32 %v270_v9, %v6082_v15  ;;  %5281 = vmatprep.mubr.f32.mxu1 %v6082_v15  ;;  %v6100_v26 = vsub.f32 %v273_v10, %v6084_v16  ;;  %v239_v59 = vld [vmem:[%s6068_s26 + $0x58] sm:$0xff]  ;;  %v240_v60 = vld [vmem:[%s6068_s26 + $0x60] sm:$0xff]  ;;  %v241_v8 = vld [vmem:[%s6068_s26 + $0x68] sm:$0xff] }
  0x16   : > { %v6103_v27 = vsub.f32 %v276_v11, %v6086_v17  ;;  %v6105_v28 = vand.u32 4294901760, %v282_v23  ;;  %v6110_v30 = vand.u32 4294901760, %v285_v24  ;;  %v291_v32 = vsel %vm268_vm1, %v235_v20, 0  ;;  %v242_v13 = vld [vmem:[%s6068_s26 + $0x70] sm:$0xff] }
  0x17   : > { %5279 = vmatprep.subr.mxu1 %v790_v21  ;;  %v6108_v29 = vsub.f32 %v279_v18, %v6091_v22  ;;  %v8320_v33 = vand.u32 4294901760, %v6096_v25  ;;  %v8317_v34 = vand.u32 4294901760, %v6100_v26  ;;  %v6126_v39 = vand.u32 4294901760, %v288_v31 }
  0x18   : > { %5280 = vmatpush3.msra.mxu1 %v790_v21  ;;  %v8316_v35 = vand.u32 4294901760, %v6103_v27  ;;  %v6118_v36 = vsub.f32 %v282_v23, %v6105_v28  ;;  %v6124_v38 = vsub.f32 %v285_v24, %v6110_v30  ;;  %v6128_v40 = vand.u32 4294901760, %v291_v32 }
  0x19   : > { %5282 = vmatmul.mubr.f32.vlgmr.msra.gmra.mxu1 %v6084_v16  ;;  %5379 = vmatprep.subr.mxu1 %v6050_v2  ;;  %v8315_v37 = vand.u32 4294901760, %v6108_v29  ;;  %v438_v41 = vsub.f32 %v6096_v25, %v8320_v33  ;;  %v448_v42 = vsub.f32 %v6100_v26, %v8317_v34  ;;  %v6147_v47 = vsub.f32 %v288_v31, %v6126_v39  ;;  %v243_v31 = vld [vmem:[%s6068_s26 + $0x78] sm:$0xff] }
  0x1a   : > { %5380 = vmatpush3.msra.mxu1 %v6050_v2  ;;  %v458_v43 = vsub.f32 %v6103_v27, %v8316_v35  ;;  %5284 = vmatprep.mubr.f32.mxu1 %v6086_v17  ;;  %v8314_v44 = vand.u32 4294901760, %v6118_v36  ;;  %v8313_v46 = vand.u32 4294901760, %v6124_v38  ;;  %v6150_v48 = vsub.f32 %v291_v32, %v6128_v40 }
  0x1b   : > { %v468_v45 = vsub.f32 %v6108_v29, %v8315_v37  ;;  %5479 = vmatprep.subr.mxu1 %v6050_v2  ;;  %v439_v52 = vand.u32 4294901760, %v438_v41  ;;  %v449_v53 = vand.u32 4294901760, %v448_v42  ;;  %v8310_v57 = vand.u32 4294901760, %v6147_v47 }
  0x1c   : > { %v459_v54 = vand.u32 4294901760, %v458_v43  ;;  %v478_v55 = vsub.f32 %v6118_v36, %v8314_v44  ;;  %v488_v56 = vsub.f32 %v6124_v38, %v8313_v46  ;;  %v8309_v58 = vand.u32 4294901760, %v6150_v48  ;;  %v252_v46 = vld [vmem:[%s6068_s26 + $0xc0] sm:$0xff] }
  0x1d   : > { %5285 = vmatmul.mubr.f32.gmra.mxu1 %v6091_v22  ;;  %5231 = vmatprep.mubr.f32.mxu0 %v439_v52  ;;  %v469_v61 = vand.u32 4294901760, %v468_v45  ;;  %v294_v62 = vsel %vm268_vm1, %v236_v49, 0  ;;  %v297_v63 = vsel %vm268_vm1, %v237_v50, 0  ;;  %v300_v0 = vsel %vm268_vm1, %v238_v51, 0 }
  0x1e   : > { %5287 = vmatprep.mubr.f32.mxu1 %v6105_v28  ;;  %5232 = vmatmul.mubr.f32.vlgmr.msra.gmra.mxu0 %v449_v53  ;;  %v479_v1 = vand.u32 4294901760, %v478_v55  ;;  %v489_v5 = vand.u32 4294901760, %v488_v56  ;;  %v498_v6 = vsub.f32 %v6147_v47, %v8310_v57  ;;  %v6174_v7 = vand.u32 4294901760, %v294_v62 }
  0x1f   : > { %5330 = vmatpush3.msra.mxu0 %v6056_v3  ;;  %5234 = vmatprep.mubr.f32.mxu0 %v459_v54  ;;  %v6178_v9 = vand.u32 4294901760, %v297_v63  ;;  %v6180_v10 = vand.u32 4294901760, %v300_v0  ;;  %v303_v11 = vsel %vm268_vm1, %v239_v59, 0  ;;  %v306_v12 = vsel %vm268_vm1, %v240_v60, 0  ;;  %v244_v60 = vld [vmem:[%s6068_s26 + $0x80] sm:$0xff] }
  0x20   : > { %v499_v14 = vand.u32 4294901760, %v498_v6  ;;  %v508_v18 = vsub.f32 %v6150_v48, %v8309_v58  ;;  %v6190_v3 = vsub.f32 %v294_v62, %v6174_v7  ;;  %v6192_v19 = vand.u32 4294901760, %v303_v11  ;;  %5429 = vmatprep.subr.mxu0 %v6061_v4 }
  0x21   : > { %8438 = vst [vmem:[#allocation2_spill] sm:$0xff] %v6180_v10  ;;  %5288 = vmatmul.mubr.f32.gmra.mxu1 %v6110_v30  ;;  %v6197_v20 = vsub.f32 %v297_v63, %v6178_v9  ;;  %v6200_v21 = vsub.f32 %v300_v0, %v6180_v10  ;;  %v6202_v23 = vand.u32 4294901760, %v306_v12  ;;  %v309_v24 = vsel %vm268_vm1, %v241_v8, 0  ;;  %v245_v0 = vld [vmem:[%s6068_s26 + $0x88] sm:$0xff]  ;;  %v246_v8 = vld [vmem:[%s6068_s26 + $0x90] sm:$0xff] }
  0x22   : > { %8439 = vst [vmem:[#allocation3_spill] sm:$0xff] %v6192_v19  ;;  %5290 = vmatprep.mubr.f32.mxu1 %v6126_v39  ;;  %5235 = vmatmul.mubr.f32.gmra.mxu0 %v469_v61  ;;  %v8308_v32 = vand.u32 4294901760, %v6190_v3  ;;  %v6208_v41 = vsub.f32 %v303_v11, %v6192_v19  ;;  %v6210_v42 = vand.u32 4294901760, %v309_v24  ;;  %v312_v43 = vsel %vm268_vm1, %v242_v13, 0  ;;  %v247_v13 = vld [vmem:[%s6068_s26 + $0x98] sm:$0xff] }
  0x23   : > { %8440 = vst [vmem:[#allocation4_spill] sm:$0xff] %v6202_v23  ;;  %5237 = vmatprep.mubr.f32.mxu0 %v479_v1  ;;  %v8306_v45 = vand.u32 4294901760, %v6197_v20  ;;  %v8305_v49 = vand.u32 4294901760, %v6200_v21  ;;  %v6216_v50 = vsub.f32 %v306_v12, %v6202_v23  ;;  %v6218_v51 = vand.u32 4294901760, %v312_v43 }
  0x24   : > { %8441 = vst [vmem:[#allocation5_spill] sm:$0xff] %v6210_v42  ;;  %v518_v52 = vsub.f32 %v6190_v3, %v8308_v32  ;;  %v8304_v53 = vand.u32 4294901760, %v6208_v41  ;;  %v6226_v54 = vsub.f32 %v309_v24, %v6210_v42  ;;  %v315_v55 = vsel %vm268_vm1, %v243_v31, 0 }
  0x25   : > { %8442 = vst [vmem:[#allocation6_spill] sm:$0xff] %v6218_v51  ;;  %5291 = vmatmul.mubr.f32.gmra.mxu1 %v6128_v40  ;;  %v8307_v56 = vand.u32 4294901760, %v6216_v50  ;;  %v6232_v59 = vsub.f32 %v312_v43, %v6218_v51  ;;  %v509_v61 = vand.u32 4294901760, %v508_v18  ;;  %v528_v62 = vsub.f32 %v6197_v20, %v8306_v45  ;;  %v248_v43 = vld [vmem:[%s6068_s26 + $0xa0] sm:$0xff] }
  0x26   : > { %5293 = vmatprep.mubr.f32.mxu1 %v6174_v7  ;;  %5238 = vmatmul.mubr.f32.gmra.mxu0 %v489_v5  ;;  %v6238_v63 = vand.u32 4294901760, %v315_v55  ;;  %v519_v1 = vand.u32 4294901760, %v518_v52  ;;  %v538_v6 = vsub.f32 %v6200_v21, %v8305_v49  ;;  %v548_v5 = vsub.f32 %v6208_v41, %v8304_v53 }
  0x27   : > { %5240 = vmatprep.mubr.f32.mxu0 %v499_v14  ;;  %v8311_v11 = vand.u32 4294901760, %v6226_v54  ;;  %v318_v12 = vsel %vm268_vm1, %v244_v60, 0  ;;  %v558_v14 = vsub.f32 %v6216_v50, %v8307_v56  ;;  %v8312_v18 = vand.u32 4294901760, %v6232_v59 }
  0x28   : > { %8443 = vst [vmem:[#allocation7_spill] sm:$0xff] %v6238_v63  ;;  %v6257_v24 = vand.u32 4294901760, %v318_v12  ;;  %v321_v31 = vsel %vm268_vm1, %v245_v0, 0  ;;  %v529_v52 = vand.u32 4294901760, %v528_v62  ;;  %v6262_v60 = vsub.f32 %v315_v55, %v6238_v63  ;;  %v249_v0 = vld [vmem:[%s6068_s26 + $0xa8] sm:$0xff]  ;;  %v250_v55 = vld [vmem:[%s6068_s26 + $0xb0] sm:$0xff] }
  0x29   : > { %5294 = vmatmul.mubr.f32.gmra.mxu1 %v6178_v9  ;;  %v6264_v53 = vand.u32 4294901760, %v321_v31  ;;  %v324_v49 = vsel %vm268_vm1, %v246_v8, 0  ;;  %v539_v45 = vand.u32 4294901760, %v538_v6  ;;  %v327_v58 = vsel %vm268_vm1, %v247_v13, 0 }
  0x2a   : > { %5296 = vmatprep.mubr.f32.mxu1 %v6180_v10  ;;  %8444 = vst [vmem:[#allocation8_spill] sm:$0xff] %v6257_v24  ;;  %5241 = vmatmul.mubr.f32.gmra.mxu0 %v509_v61  ;;  %v6268_v56 = vsub.f32 %v318_v12, %v6257_v24  ;;  %v6270_v32 = vand.u32 4294901760, %v324_v49  ;;  %v330_v61 = vsel %vm268_vm1, %v248_v43, 0  ;;  %v549_v62 = vand.u32 4294901760, %v548_v5 }
  0x2b   : > { %8445 = vst [vmem:[#allocation9_spill] sm:$0xff] %v6264_v53  ;;  %5243 = vmatprep.mubr.f32.mxu0 %v519_v1  ;;  %v559_v57 = vand.u32 4294901760, %v558_v14  ;;  %v568_v1 = vsub.f32 %v6226_v54, %v8311_v11  ;;  %v578_v6 = vsub.f32 %v6232_v59, %v8312_v18  ;;  %v8318_v8 = vand.u32 4294901760, %v6262_v60 }
  0x2c   : > { %8446 = vst [vmem:[#allocation10_spill] sm:$0xff] %v6270_v32  ;;  %v6286_v12 = vsub.f32 %v321_v31, %v6264_v53  ;;  %v6288_v13 = vand.u32 4294901760, %v327_v58  ;;  %v333_v5 = vsel %vm268_vm1, %v249_v0, 0  ;;  %v8319_v14 = vand.u32 4294901760, %v6268_v56 }
  0x2d   : > { %5297 = vmatmul.mubr.f32.gmra.mxu1 %v6192_v19  ;;  %v6293_v43 = vsub.f32 %v324_v49, %v6270_v32  ;;  %v6295_v11 = vand.u32 4294901760, %v330_v61  ;;  %v336_v18 = vsel %vm268_vm1, %v250_v55, 0  ;;  %v569_v31 = vand.u32 4294901760, %v568_v1 }
  0x2e   : > { %5299 = vmatprep.mubr.f32.mxu1 %v6202_v23  ;;  %5244 = vmatmul.mubr.f32.gmra.mxu0 %v529_v52  ;;  %8447 = vst [vmem:[#allocation11_spill] sm:$0xff] %v6288_v13  ;;  %v251_v52 = vld [vmem:[%s6068_s26 + $0xb8] sm:$0xff]  ;;  %v579_v44 = vand.u32 4294901760, %v578_v6  ;;  %v6302_v0 = vand.u32 4294901760, %v333_v5  ;;  %v588_v49 = vsub.f32 %v6262_v60, %v8318_v8  ;;  %v8327_v55 = vand.u32 4294901760, %v6286_v12  ;;  %v253_v8 = vld [vmem:[%s6068_s26 + $0xc8] sm:$0xff] }
  0x2f   : > { %5246 = vmatprep.mubr.f32.mxu0 %v539_v45  ;;  %8448 = vst [vmem:[#allocation12_spill] sm:$0xff] %v6295_v11  ;;  %v6304_v45 = vand.u32 4294901760, %v336_v18  ;;  %v6311_v37 = vsub.f32 %v327_v58, %v6288_v13  ;;  %v339_v1 = vsel %vm268_vm1, %v251_v52, 0  ;;  %v598_v6 = vsub.f32 %v6268_v56, %v8319_v14  ;;  %v254_v14 = vld [vmem:[%s6068_s26 + $0xd0] sm:$0xff] }
  0x30   : > { %8449 = vst [vmem:[#allocation13_spill] sm:$0xff] %v6302_v0  ;;  %v342_v34 = vsel %vm268_vm1, %v252_v46, 0  ;;  %v6326_v58 = vsub.f32 %v333_v5, %v6302_v0  ;;  %v6331_v52 = vand.u32 4294901760, %v339_v1  ;;  %v608_v46 = vsub.f32 %v6286_v12, %v8327_v55  ;;  %v258_v23 = vld [vmem:[%s6068_s26 + $0xf0] sm:$0xff] }
  0x31   : > { %5300 = vmatmul.mubr.f32.gmra.mxu1 %v6210_v42  ;;  %8450 = vst [vmem:[#allocation14_spill] sm:$0xff] %v6304_v45  ;;  %v8332_v33 = vand.u32 4294901760, %v6311_v37  ;;  %v6338_v35 = vand.u32 4294901760, %v342_v34  ;;  %v599_v5 = vand.u32 4294901760, %v598_v6 }
  0x32   : > { %5302 = vmatprep.mubr.f32.mxu1 %v6218_v51  ;;  %5247 = vmatmul.mubr.f32.gmra.mxu0 %v549_v62  ;;  %v6319_v62 = vsub.f32 %v330_v61, %v6295_v11  ;;  %v589_v61 = vand.u32 4294901760, %v588_v49  ;;  %v348_v49 = vsel %vm268_vm1, %v254_v14, 0  ;;  %v255_v51 = vld [vmem:[%s6068_s26 + $0xd8] sm:$0xff]  ;;  %v6352_v6 = vsub.f32 %v339_v1, %v6331_v52 }
  0x33   : > { %5249 = vmatprep.mubr.f32.mxu0 %v559_v57  ;;  %v6329_v57 = vsub.f32 %v336_v18, %v6304_v45  ;;  %8451 = vst [vmem:[#allocation15_spill] sm:$0xff] %v6338_v35  ;;  %v6359_v14 = vsub.f32 %v342_v34, %v6338_v35  ;;  %v8455_v34 = vand.u32 4294901760, %v6326_v58 }
  0x35   : > { %5303 = vmatmul.mubr.f32.gmra.mxu1 %v6238_v63  ;;  %v609_v63 = vand.u32 4294901760, %v608_v46 }
  0x36   : > { %5305 = vmatprep.mubr.f32.mxu1 %v6257_v24  ;;  %5250 = vmatmul.mubr.f32.gmra.mxu0 %v569_v31  ;;  %v8452_v24 = vand.u32 4294901760, %v6293_v43  ;;  %v345_v31 = vsel %vm268_vm1, %v253_v8, 0  ;;  %v628_v8 = vsub.f32 %v6311_v37, %v8332_v33  ;;  %v257_v33 = vld [vmem:[%s6068_s26 + $0xe8] sm:$0xff] }
  0x37   : > { %5252 = vmatprep.mubr.f32.mxu0 %v579_v44  ;;  %v8454_v44 = vand.u32 4294901760, %v6319_v62 }
  0x38   : > { %v618_v18 = vsub.f32 %v6293_v43, %v8452_v24  ;;  %v256_v24 = vld [vmem:[%s6068_s26 + $0xe0] sm:$0xff] }
  0x39   : > { %5306 = vmatmul.mubr.f32.gmra.mxu1 %v6264_v53  ;;  %v638_v1 = vsub.f32 %v6319_v62, %v8454_v44  ;;  %v6366_v53 = vand.u32 4294901760, %v348_v49  ;;  %v354_v46 = vsel %vm268_vm1, %v256_v24, 0 }
  0x3a   : > { %5308 = vmatprep.mubr.f32.mxu1 %v6270_v32  ;;  %5253 = vmatmul.mubr.f32.gmra.mxu0 %v589_v61  ;;  %v6361_v32 = vand.u32 4294901760, %v345_v31  ;;  %v619_v55 = vand.u32 4294901760, %v618_v18  ;;  %v351_v61 = vsel %vm268_vm1, %v255_v51, 0  ;;  %v8456_v18 = vand.u32 4294901760, %v6329_v57 }
  0x3b   : > { %5255 = vmatprep.mubr.f32.mxu0 %v599_v5  ;;  %v648_v5 = vsub.f32 %v6326_v58, %v8455_v34  ;;  %v629_v51 = vand.u32 4294901760, %v628_v8  ;;  %v639_v19 = vand.u32 4294901760, %v638_v1  ;;  %v6388_v34 = vsub.f32 %v348_v49, %v6366_v53  ;;  %v259_v8 = vld [vmem:[%s6068_s26 + $0xf8] sm:$0xff] }
  0x3c   : > { %8453 = vst [vmem:[#allocation16_spill] sm:$0xff] %v6361_v32  ;;  %v658_v44 = vsub.f32 %v6329_v57, %v8456_v18  ;;  %v6383_v24 = vsub.f32 %v345_v31, %v6361_v32  ;;  %v6390_v10 = vand.u32 4294901760, %v354_v46  ;;  %v357_v18 = vsel %vm268_vm1, %v257_v33, 0 }
  0x3d   : > { %5309 = vmatmul.mubr.f32.gmra.mxu1 %v6288_v13  ;;  %v649_v13 = vand.u32 4294901760, %v648_v5  ;;  %v8457_v31 = vand.u32 4294901760, %v6352_v6  ;;  %v8458_v49 = vand.u32 4294901760, %v6359_v14 }
  0x3e   : > { %5311 = vmatprep.mubr.f32.mxu1 %v6295_v11  ;;  %5256 = vmatmul.mubr.f32.gmra.mxu0 %v609_v63  ;;  %v6385_v11 = vand.u32 4294901760, %v351_v61  ;;  %v360_v63 = vsel %vm268_vm1, %v258_v23, 0  ;;  %v659_v42 = vand.u32 4294901760, %v658_v44  ;;  %v8351_v33 = vand.u32 4294901760, %v6383_v24 }
  0x3f   : > { %5258 = vmatprep.mubr.f32.mxu0 %v619_v55  ;;  %v668_v55 = vsub.f32 %v6352_v6, %v8457_v31  ;;  %v678_v1 = vsub.f32 %v6359_v14, %v8458_v49  ;;  %v6407_v23 = vand.u32 4294901760, %v357_v18  ;;  %v6411_v44 = vsub.f32 %v354_v46, %v6390_v10 }
  0x41   : > { %5312 = vmatmul.mubr.f32.gmra.mxu1 %v6302_v0  ;;  %v6405_v0 = vsub.f32 %v351_v61, %v6385_v11  ;;  %v669_v31 = vand.u32 4294901760, %v668_v55  ;;  %v688_v61 = vsub.f32 %v6383_v24, %v8351_v33  ;;  %v6423_v49 = vsub.f32 %v357_v18, %v6407_v23 }
  0x42   : > { %5314 = vmatprep.mubr.f32.mxu1 %v6304_v45  ;;  %5259 = vmatmul.mubr.f32.gmra.mxu0 %v629_v51  ;;  %v6413_v45 = vand.u32 4294901760, %v360_v63  ;;  %v363_v51 = vsel %vm268_vm1, %v259_v8, 0  ;;  %v679_v5 = vand.u32 4294901760, %v678_v1  ;;  %v8459_v8 = vand.u32 4294901760, %v6388_v34 }
  0x43   : > { %5261 = vmatprep.mubr.f32.mxu0 %v639_v19  ;;  %v707_v19 = vand.u32 4294901760, %v6405_v0  ;;  %v6425_v46 = vand.u32 4294901760, %v363_v51  ;;  %v689_v18 = vand.u32 4294901760, %v688_v61  ;;  %v727_v1 = vand.u32 4294901760, %v6423_v49 }
  0x44   : > { %v698_v55 = vsub.f32 %v6388_v34, %v8459_v8 }
  0x45   : > { %5315 = vmatmul.mubr.f32.gmra.mxu1 %v6331_v52  ;;  %v6441_v33 = vsub.f32 %v363_v51, %v6425_v46  ;;  %v728_v61 = vsub.f32 %v6423_v49, %v727_v1 }
  0x46   : > { %5317 = vmatprep.mubr.f32.mxu1 %v6338_v35  ;;  %5262 = vmatmul.mubr.f32.gmra.mxu0 %v649_v13  ;;  %v8354_v35 = vand.u32 4294901760, %v6411_v44  ;;  %v6432_v13 = vsub.f32 %v360_v63, %v6413_v45  ;;  %v699_v8 = vand.u32 4294901760, %v698_v55 }
  0x47   : > { %5264 = vmatprep.mubr.f32.mxu0 %v659_v42  ;;  %v708_v42 = vsub.f32 %v6405_v0, %v707_v19  ;;  %v747_v51 = vand.u32 4294901760, %v6441_v33 }
  0x48   : > { %v718_v63 = vsub.f32 %v6411_v44, %v8354_v35  ;;  %v729_v35 = vand.u32 4294901760, %v728_v61  ;;  %v8463_v61 = vand.u32 4294901760, %v6108_v29 }
  0x49   : > { %5318 = vmatmul.mubr.f32.gmra.mxu1 %v6361_v32  ;;  %v8355_v32 = vand.u32 4294901760, %v6432_v13 }
  0x4a   : > { %5320 = vmatprep.mubr.f32.mxu1 %v6366_v53  ;;  %5265 = vmatmul.mubr.f32.gmra.mxu0 %v669_v31  ;;  %v709_v31 = vand.u32 4294901760, %v708_v42 }
  0x4b   : > { %5267 = vmatprep.mubr.f32.mxu0 %v679_v5  ;;  %v719_v5 = vand.u32 4294901760, %v718_v63  ;;  %v738_v55 = vsub.f32 %v6432_v13, %v8355_v32  ;;  %v8461_v32 = vand.u32 4294901760, %v6100_v26 }
  0x4d   : > { %5321 = vmatmul.mubr.f32.gmra.mxu1 %v6385_v11  ;;  %v739_v42 = vand.u32 4294901760, %v738_v55 }
  0x4e   : > { %5323 = vmatprep.mubr.f32.mxu1 %v6390_v10  ;;  %5268 = vmatmul.mubr.f32.gmra.mxu0 %v689_v18  ;;  %v748_v18 = vsub.f32 %v6441_v33, %v747_v51 }
  0x4f   : > { %5270 = vmatprep.mubr.f32.mxu0 %v699_v8  ;;  %v8460_v8 = vand.u32 4294901760, %v6096_v25 }
  0x50   : > { %v749_v63 = vand.u32 4294901760, %v748_v18 }
  0x51   : > { %5324 = vmatmul.mubr.f32.gmra.mxu1 %v6407_v23 }
  0x52   : > { %5326 = vmatprep.mubr.f32.mxu1 %v6413_v45  ;;  %5271 = vmatmul.mubr.f32.gmra.mxu0 %v709_v31  ;;  %v8462_v31 = vand.u32 4294901760, %v6103_v27 }
  0x53   : > { %5273 = vmatprep.mubr.f32.mxu0 %v719_v5  ;;  %v8464_v5 = vand.u32 4294901760, %v6118_v36 }
  0x55   : > { %5327 = vmatmul.mubr.f32.gmra.mxu1 %v6425_v46 }
  0x56   : > { %5381 = vmatprep.mubr.f32.mxu1 %v8460_v8  ;;  %5274 = vmatmul.mubr.f32.gmra.mxu0 %v729_v35  ;;  %v8466_v35 = vand.u32 4294901760, %v6147_v47 }
  0x57   : > { %5276 = vmatprep.mubr.f32.mxu0 %v739_v42 }
  0x59   : > { %5382 = vmatmul.mubr.f32.vlgmr.msra.gmra.mxu1 %v8461_v32  ;;  %v8468_v32 = vand.u32 4294901760, %v6190_v3 }
  0x5a   : > { %5480 = vmatpush3.msra.mxu1 %v6050_v2  ;;  %5384 = vmatprep.mubr.f32.mxu1 %v8462_v31  ;;  %v8465_v2 = vand.u32 4294901760, %v6124_v38 }
  0x5b   : > { %5277 = vmatmul.mubr.f32.gmra.mxu0 %v749_v63 }
  0x5c   : > { %5331 = vmatprep.mubr.f32.mxu0 %v6096_v25  ;;  %v8467_v25 = vand.u32 4294901760, %v6150_v48 }
  0x5d   : > { %5385 = vmatmul.mubr.f32.gmra.mxu1 %v8463_v61 }
  0x5e   : > { %5387 = vmatprep.mubr.f32.mxu1 %v8464_v5 }
  0x5f   : > { %5332 = vmatmul.mubr.f32.vlgmr.msra.gmra.mxu0 %v6100_v26  ;;  %v8470_v26 = vand.u32 4294901760, %v6200_v21 }
  0x60   : > { %5430 = vmatpush3.msra.mxu0 %v6061_v4  ;;  %5334 = vmatprep.mubr.f32.mxu0 %v6103_v27  ;;  %v8469_v4 = vand.u32 4294901760, %v6197_v20  ;;  %v8471_v27 = vand.u32 4294901760, %v6208_v41 }
  0x61   : > { %5388 = vmatmul.mubr.f32.gmra.mxu1 %v8465_v2 }
  0x62   : > { %5390 = vmatprep.mubr.f32.mxu1 %v8466_v35 }
  0x63   : > { %5335 = vmatmul.mubr.f32.gmra.mxu0 %v6108_v29  ;;  %v8472_v29 = vand.u32 4294901760, %v6216_v50 }
  0x64   : > { %5337 = vmatprep.mubr.f32.mxu0 %v6118_v36  ;;  %v8473_v36 = vand.u32 4294901760, %v6226_v54 }
  0x65   : > { %5391 = vmatmul.mubr.f32.gmra.mxu1 %v8467_v25 }
  0x66   : > { %5393 = vmatprep.mubr.f32.mxu1 %v8468_v32 }
  0x67   : > { %5338 = vmatmul.mubr.f32.gmra.mxu0 %v6124_v38  ;;  %v8474_v38 = vand.u32 4294901760, %v6232_v59 }
  0x68   : > { %5340 = vmatprep.mubr.f32.mxu0 %v6147_v47  ;;  %v8475_v47 = vand.u32 4294901760, %v6262_v60 }
  0x69   : > { %5394 = vmatmul.mubr.f32.gmra.mxu1 %v8469_v4 }
  0x6a   : > { %5396 = vmatprep.mubr.f32.mxu1 %v8470_v26 }
  0x6b   : > { %5341 = vmatmul.mubr.f32.gmra.mxu0 %v6150_v48  ;;  %v8476_v48 = vand.u32 4294901760, %v6268_v56 }
  0x6c   : > { %5343 = vmatprep.mubr.f32.mxu0 %v6190_v3  ;;  %v8477_v3 = vand.u32 4294901760, %v6286_v12 }
  0x6d   : > { %5397 = vmatmul.mubr.f32.gmra.mxu1 %v8471_v27 }
  0x6e   : > { %5399 = vmatprep.mubr.f32.mxu1 %v8472_v29 }
  0x6f   : > { %5344 = vmatmul.mubr.f32.gmra.mxu0 %v6197_v20  ;;  %v8478_v20 = vand.u32 4294901760, %v6293_v43 }
  0x70   : > { %5346 = vmatprep.mubr.f32.mxu0 %v6200_v21  ;;  %v8479_v21 = vand.u32 4294901760, %v6311_v37 }
  0x71   : > { %5400 = vmatmul.mubr.f32.gmra.mxu1 %v8473_v36 }
  0x72   : > { %5402 = vmatprep.mubr.f32.mxu1 %v8474_v38 }
  0x73   : > { %5347 = vmatmul.mubr.f32.gmra.mxu0 %v6208_v41  ;;  %v8480_v41 = vand.u32 4294901760, %v6319_v62 }
  0x74   : > { %5349 = vmatprep.mubr.f32.mxu0 %v6216_v50  ;;  %v8481_v50 = vand.u32 4294901760, %v6326_v58 }
  0x75   : > { %5403 = vmatmul.mubr.f32.gmra.mxu1 %v8475_v47 }
  0x76   : > { %5405 = vmatprep.mubr.f32.mxu1 %v8476_v48 }
  0x77   : > { %5350 = vmatmul.mubr.f32.gmra.mxu0 %v6226_v54  ;;  %v8482_v54 = vand.u32 4294901760, %v6329_v57 }
  0x78   : > { %5352 = vmatprep.mubr.f32.mxu0 %v6232_v59  ;;  %v8484_v59 = vand.u32 4294901760, %v6359_v14 }
  0x79   : > { %5406 = vmatmul.mubr.f32.gmra.mxu1 %v8477_v3 }
  0x7a   : > { %5408 = vmatprep.mubr.f32.mxu1 %v8478_v20 }
  0x7b   : > { %5353 = vmatmul.mubr.f32.gmra.mxu0 %v6262_v60  ;;  %v8485_v60 = vand.u32 4294901760, %v6383_v24 }
  0x7c   : > { %5355 = vmatprep.mubr.f32.mxu0 %v6268_v56  ;;  %v8483_v56 = vand.u32 4294901760, %v6352_v6 }
  0x7d   : > { %5409 = vmatmul.mubr.f32.gmra.mxu1 %v8479_v21 }
  0x7e   : > { %5411 = vmatprep.mubr.f32.mxu1 %v8480_v41 }
  0x7f   : > { %5356 = vmatmul.mubr.f32.gmra.mxu0 %v6286_v12  ;;  %v8486_v12 = vand.u32 4294901760, %v6388_v34 }
  0x80   : > { %5358 = vmatprep.mubr.f32.mxu0 %v6293_v43  ;;  %v8488_v43 = vand.u32 4294901760, %v6432_v13 }
  0x81   : > { %5412 = vmatmul.mubr.f32.gmra.mxu1 %v8481_v50 }
  0x82   : > { %5414 = vmatprep.mubr.f32.mxu1 %v8482_v54 }
  0x83   : > { %5359 = vmatmul.mubr.f32.gmra.mxu0 %v6311_v37  ;;  %v8487_v37 = vand.u32 4294901760, %v6411_v44 }
  0x84   : > { %5361 = vmatprep.mubr.f32.mxu0 %v6319_v62  ;;  %v8499_v62 = vld [vmem:[#allocation10_spill] sm:$0xff] }
  0x85   : > { %5415 = vmatmul.mubr.f32.gmra.mxu1 %v8483_v56 }
  0x86   : > { %5417 = vmatprep.mubr.f32.mxu1 %v8484_v59 }
  0x87   : > { %5362 = vmatmul.mubr.f32.gmra.mxu0 %v6326_v58 }
  0x88   : > { %5364 = vmatprep.mubr.f32.mxu0 %v6329_v57  ;;  %v8501_v57 = vld [vmem:[#allocation11_spill] sm:$0xff] }
  0x89   : > { %5418 = vmatmul.mubr.f32.gmra.mxu1 %v8485_v60 }
  0x8a   : > { %5420 = vmatprep.mubr.f32.mxu1 %v8486_v12 }
  0x8b   : > { %5365 = vmatmul.mubr.f32.gmra.mxu0 %v6352_v6 }
  0x8c   : > { %5367 = vmatprep.mubr.f32.mxu0 %v6359_v14  ;;  %v8502_v14 = vld [vmem:[#allocation12_spill] sm:$0xff] }
  0x8d   : > { %5421 = vmatmul.mubr.f32.gmra.mxu1 %v707_v19  ;;  %v2182_v19 = vld [vmem:[%s8301_s3 + $0x10] sm:$0xff] }
  0x8e   : > { %5423 = vmatprep.mubr.f32.mxu1 %v8487_v37 }
  0x8f   : > { %5368 = vmatmul.mubr.f32.gmra.mxu0 %v6383_v24 }
  0x90   : > { %5370 = vmatprep.mubr.f32.mxu0 %v6388_v34  ;;  %v8503_v34 = vld [vmem:[#allocation13_spill] sm:$0xff] }
  0x91   : > { %5424 = vmatmul.mubr.f32.gmra.mxu1 %v727_v1 }
  0x92   : > { %5426 = vmatprep.mubr.f32.mxu1 %v8488_v43 }
  0x93   : > { %5371 = vmatmul.mubr.f32.gmra.mxu0 %v6405_v0 }
  0x94   : > { %5373 = vmatprep.mubr.f32.mxu0 %v6411_v44  ;;  %v8505_v44 = vld [vmem:[#allocation15_spill] sm:$0xff] }
  0x95   : > { %5427 = vmatmul.mubr.f32.gmra.mxu1 %v747_v51 }
  0x96   : > { %5481 = vmatprep.mubr.f32.mxu1 %v6082_v15 }
  0x97   : > { %5374 = vmatmul.mubr.f32.gmra.mxu0 %v6423_v49  ;;  %v6625_v49 = vand.u32 4294901760, %v2182_v19 }
  0x98   : > { %5376 = vmatprep.mubr.f32.mxu0 %v6432_v13  ;;  %v8507_v13 = vld [vmem:[#allocation16_spill] sm:$0xff] }
  0x99   : > { %5482 = vmatmul.mubr.f32.vlgmr.msra.gmra.mxu1 %v6084_v16  ;;  %v6631_v1 = vsub.f32 %v2182_v19, %v6625_v49 }
  0x9a   : > { %5484 = vmatprep.mubr.f32.mxu1 %v6086_v17 }
  0x9b   : > { %5377 = vmatmul.mubr.f32.gmra.mxu0 %v6441_v33  ;;  %v8504_v33 = vld [vmem:[#allocation14_spill] sm:$0xff]  ;;  %v6637_v51 = vand.u32 4294901760, %v6631_v1 }
  0x9c   : > { %5431 = vmatprep.mubr.f32.mxu0 %v6082_v15  ;;  %v8489_v15 = vld [vmem:[#allocation2_spill] sm:$0xff] }
  0x9d   : > { %5485 = vmatmul.mubr.f32.gmra.mxu1 %v6091_v22  ;;  %v2712_v55 = vsub.f32 %v6631_v1, %v6637_v51 }
  0x9e   : > { %5487 = vmatprep.mubr.f32.mxu1 %v6105_v28 }
  0x9f   : > { %5432 = vmatmul.mubr.f32.vlgmr.msra.gmra.mxu0 %v6084_v16  ;;  %v8490_v16 = vld [vmem:[#allocation3_spill] sm:$0xff]  ;;  %v2713_v18 = vand.u32 4294901760, %v2712_v55 }
  0xa0   : > { %5434 = vmatprep.mubr.f32.mxu0 %v6086_v17  ;;  %v8491_v17 = vld [vmem:[#allocation4_spill] sm:$0xff] }
  0xa1   : > { %5488 = vmatmul.mubr.f32.gmra.mxu1 %v6110_v30 }
  0xa2   : > { %5490 = vmatprep.mubr.f32.mxu1 %v6126_v39 }
  0xa3   : > { %5435 = vmatmul.mubr.f32.gmra.mxu0 %v6091_v22  ;;  %v8492_v22 = vld [vmem:[#allocation5_spill] sm:$0xff] }
  0xa4   : > { %5437 = vmatprep.mubr.f32.mxu0 %v6105_v28  ;;  %v8493_v28 = vld [vmem:[#allocation6_spill] sm:$0xff]  ;;  %8506 = vst [vmem:[#allocation5_spill] sm:$0xff] %v6625_v49 }
  0xa5   : > { %5491 = vmatmul.mubr.f32.gmra.mxu1 %v6128_v40  ;;  %8508 = vst [vmem:[#allocation6_spill] sm:$0xff] %v6631_v1 }
  0xa6   : > { %5493 = vmatprep.mubr.f32.mxu1 %v6174_v7 }
  0xa7   : > { %5438 = vmatmul.mubr.f32.gmra.mxu0 %v6110_v30  ;;  %v8494_v30 = vld [vmem:[#allocation7_spill] sm:$0xff] }
  0xa8   : > { %5440 = vmatprep.mubr.f32.mxu0 %v6126_v39  ;;  %v8495_v39 = vld [vmem:[#allocation8_spill] sm:$0xff]  ;;  %8509 = vst [vmem:[#allocation7_spill] sm:$0xff] %v6637_v51 }
  0xa9   : > { %5494 = vmatmul.mubr.f32.gmra.mxu1 %v6178_v9 }
  0xaa   : > { %5496 = vmatprep.mubr.f32.mxu1 %v8489_v15 }
  0xab   : > { %5441 = vmatmul.mubr.f32.gmra.mxu0 %v6128_v40  ;;  %v2183_v40 = vld [vmem:[%s8301_s3 + $0x18] sm:$0xff] }
  0xac   : > { %5443 = vmatprep.mubr.f32.mxu0 %v6174_v7  ;;  %v6594_v7 = vand.u32 4294901760, %v2183_v40 }
  0xad   : > { %5497 = vmatmul.mubr.f32.gmra.mxu1 %v8490_v16 }
  0xae   : > { %5499 = vmatprep.mubr.f32.mxu1 %v8491_v17  ;;  %8496 = vst [vmem:[#allocation2_spill] sm:$0xff] %v6594_v7  ;;  %5529 = vmatprep.subr.mxu0 %v6594_v7  ;;  %v6600_v0 = vsub.f32 %v2183_v40, %v6594_v7 }
  0xaf   : > { %5444 = vmatmul.mubr.f32.gmra.mxu0 %v6178_v9  ;;  %v8497_v9 = vld [vmem:[#allocation9_spill] sm:$0xff] }
  0xb0   : > { %5446 = vmatprep.mubr.f32.mxu0 %v8489_v15  ;;  %8498 = vst [vmem:[#allocation3_spill] sm:$0xff] %v6600_v0  ;;  %5530 = vmatpush3.msra.mxu0 %v6594_v7  ;;  %v6606_v58 = vand.u32 4294901760, %v6600_v0 }
  0xb1   : > { %5500 = vmatmul.mubr.f32.gmra.mxu1 %v8492_v22  ;;  %5531 = vmatprep.subr.mxu0 %v6625_v49 }
  0xb2   : > { %5502 = vmatprep.mubr.f32.mxu1 %v8493_v28  ;;  %8500 = vst [vmem:[#allocation4_spill] sm:$0xff] %v6606_v58  ;;  %v2705_v6 = vsub.f32 %v6600_v0, %v6606_v58  ;;  %5532 = vmatpush3.msra.mxu0 %v6625_v49 }
  0xb3   : > { %5447 = vmatmul.mubr.f32.gmra.mxu0 %v8490_v16 }
  0xb4   : > { %5449 = vmatprep.mubr.f32.mxu0 %v8491_v17  ;;  %v2706_v24 = vand.u32 4294901760, %v2705_v6 }
  0xb5   : > { %5503 = vmatmul.mubr.f32.gmra.mxu1 %v8494_v30 }
  0xb6   : > { %5505 = vmatprep.mubr.f32.mxu1 %v8495_v39  ;;  %5585 = vmatprep.subr.mxu1 %v2706_v24 }
  0xb7   : > { %5450 = vmatmul.mubr.f32.gmra.mxu0 %v8492_v22  ;;  %5586 = vmatpush3.msra.mxu1 %v2706_v24 }
  0xb8   : > { %5452 = vmatprep.mubr.f32.mxu0 %v8493_v28  ;;  %5587 = vmatprep.subr.mxu1 %v2713_v18 }
  0xb9   : > { %5506 = vmatmul.mubr.f32.gmra.mxu1 %v8497_v9 }
  0xba   : > { %5508 = vmatprep.mubr.f32.mxu1 %v8499_v62  ;;  %5588 = vmatpush3.msra.mxu1 %v2713_v18 }
  0xbb   : > { %5453 = vmatmul.mubr.f32.gmra.mxu0 %v8494_v30 }
  0xbc   : > { %5455 = vmatprep.mubr.f32.mxu0 %v8495_v39 }
  0xbd   : > { %5509 = vmatmul.mubr.f32.gmra.mxu1 %v8501_v57 }
  0xbe   : > { %5511 = vmatprep.mubr.f32.mxu1 %v8502_v14 }
  0xbf   : > { %5456 = vmatmul.mubr.f32.gmra.mxu0 %v8497_v9 }
  0xc0   : > { %5458 = vmatprep.mubr.f32.mxu0 %v8499_v62 }
  0xc1   : > { %5512 = vmatmul.mubr.f32.gmra.mxu1 %v8503_v34 }
  0xc2   : > { %5514 = vmatprep.mubr.f32.mxu1 %v8504_v33 }
  0xc3   : > { %5459 = vmatmul.mubr.f32.gmra.mxu0 %v8501_v57 }
  0xc4   : > { %5461 = vmatprep.mubr.f32.mxu0 %v8502_v14 }
  0xc5   : > { %5515 = vmatmul.mubr.f32.gmra.mxu1 %v6331_v52 }
  0xc6   : > { %5517 = vmatprep.mubr.f32.mxu1 %v8505_v44 }
  0xc7   : > { %5462 = vmatmul.mubr.f32.gmra.mxu0 %v8503_v34 }
  0xc8   : > { %5464 = vmatprep.mubr.f32.mxu0 %v8504_v33 }
  0xc9   : > { %5518 = vmatmul.mubr.f32.gmra.mxu1 %v8507_v13 }
  0xca   : > { %5520 = vmatprep.mubr.f32.mxu1 %v6366_v53 }
  0xcb   : > { %5465 = vmatmul.mubr.f32.gmra.mxu0 %v6331_v52  ;;  %v2181_v52 = vld [vmem:[%s8301_s3 + $0x8] sm:$0xff] }
  0xcc   : > { %5467 = vmatprep.mubr.f32.mxu0 %v8505_v44  ;;  %v6655_v42 = vand.u32 4294901760, %v2181_v52 }
  0xcd   : > { %5521 = vmatmul.mubr.f32.gmra.mxu1 %v6385_v11 }
  0xce   : > { %5523 = vmatprep.mubr.f32.mxu1 %v6390_v10  ;;  %8510 = vst [vmem:[#allocation8_spill] sm:$0xff] %v6655_v42  ;;  %5533 = vmatprep.subr.mxu0 %v6655_v42  ;;  %v6660_v8 = vsub.f32 %v2181_v52, %v6655_v42 }
  0xcf   : > { %5468 = vmatmul.mubr.f32.gmra.mxu0 %v8507_v13 }
  0xd0   : > { %5470 = vmatprep.mubr.f32.mxu0 %v6366_v53  ;;  %8511 = vst [vmem:[#allocation9_spill] sm:$0xff] %v6660_v8  ;;  %5534 = vmatpush3.msra.mxu0 %v6655_v42 }
  0xd1   : > { %5524 = vmatmul.mubr.f32.gmra.mxu1 %v6407_v23 }
  0xd2   : > { %5526 = vmatprep.mubr.f32.mxu1 %v6413_v45 }
  0xd3   : > { %5471 = vmatmul.mubr.f32.gmra.mxu0 %v6385_v11  ;;  %v6667_v11 = vand.u32 4294901760, %v6660_v8 }
  0xd4   : > { %5473 = vmatprep.mubr.f32.mxu0 %v6390_v10 }
  0xd5   : > { %5527 = vmatmul.mubr.f32.gmra.mxu1 %v6425_v46  ;;  %8512 = vst [vmem:[#allocation10_spill] sm:$0xff] %v6667_v11  ;;  %v2719_v63 = vsub.f32 %v6660_v8, %v6667_v11 }
  0xd7   : > { %5474 = vmatmul.mubr.f32.gmra.mxu0 %v6407_v23  ;;  %v6672_v23 = vld [vmem:[%s8300_s2] ss:$0 sm:$0xff]  ;;  %v2720_v5 = vand.u32 4294901760, %v2719_v63 }
  0xd8   : > { %5476 = vmatprep.mubr.f32.mxu0 %v6413_v45 }
  0xd9   : > { %v5283_v53 = vpop.f32.mrf.mxu1  ;;  %5589 = vmatprep.subr.mxu1 %v2720_v5 }
  0xda   : > { %5590 = vmatpush3.msra.mxu1 %v2720_v5 }
  0xdb   : > { %5477 = vmatmul.mubr.f32.gmra.mxu0 %v6425_v46  ;;  %v6664_v10 = vpop.f32.mrf.mxu1  ;;  %v2180_v46 = vld [vmem:[%s8301_s3] sm:$0xff] }
  0xdc   : > { %v6682_v35 = vand.u32 4294901760, %v2180_v46 }
  0xdd   : > { %v5286_v45 = vpop.f32.mrf.mxu1 }
  0xde   : > { %v5233_v31 = vpop.f32.mrf.mxu0  ;;  %8513 = vst [vmem:[#allocation11_spill] sm:$0xff] %v6682_v35  ;;  %5535 = vmatprep.subr.mxu0 %v6682_v35  ;;  %v6690_v26 = vsub.f32 %v2180_v46, %v6682_v35 }
  0xdf   : > { %v6676_v61 = vpop.f32.mrf.mxu1  ;;  %v452_v2 = vadd.f32 %v5233_v31, %v6672_v23  ;;  %5536 = vmatpush3.msra.mxu0 %v6682_v35 }
  0xe0   : > { %v6684_v25 = vpop.f32.mrf.mxu0  ;;  %8514 = vst [vmem:[#allocation12_spill] sm:$0xff] %v6690_v26  ;;  %v6697_v38 = vand.u32 4294901760, %v6690_v26  ;;  %5641 = vmatprep.subr.mxu0 %v6600_v0 }
  0xe1   : > { %v5289_v32 = vpop.f32.mrf.mxu1  ;;  %v6686_v4 = vadd.f32 %v5283_v53, %v452_v2 }
  0xe2   : > { %v5236_v27 = vpop.f32.mrf.mxu0  ;;  %8515 = vst [vmem:[#allocation13_spill] sm:$0xff] %v6697_v38  ;;  %v2726_v20 = vsub.f32 %v6690_v26, %v6697_v38 }
  0xe3   : > { %v6692_v29 = vpop.f32.mrf.mxu1  ;;  %v472_v36 = vadd.f32 %v5236_v27, %v6672_v23 }
  0xe4   : > { %v6700_v47 = vpop.f32.mrf.mxu0  ;;  %v2727_v54 = vand.u32 4294901760, %v2726_v20 }
  0xe5   : > { %v5292_v48 = vpop.f32.mrf.mxu1  ;;  %v6702_v3 = vadd.f32 %v5286_v45, %v472_v36 }
  0xe6   : > { %v5239_v21 = vpop.f32.mrf.mxu0  ;;  %5591 = vmatprep.subr.mxu1 %v2727_v54 }
  0xe7   : > { %v6706_v41 = vpop.f32.mrf.mxu1  ;;  %v492_v50 = vadd.f32 %v5239_v21, %v6672_v23  ;;  %5592 = vmatpush3.msra.mxu1 %v2727_v54 }
  0xe8   : > { %v6709_v56 = vpop.f32.mrf.mxu0  ;;  %5697 = vmatprep.subr.mxu1 %v6594_v7 }
  0xe9   : > { %v5295_v59 = vpop.f32.mrf.mxu1  ;;  %v6711_v60 = vadd.f32 %v5289_v32, %v492_v50 }
  0xea   : > { %v5242_v12 = vpop.f32.mrf.mxu0 }
  0xeb   : > { %v6713_v37 = vpop.f32.mrf.mxu1  ;;  %v512_v43 = vadd.f32 %v5242_v12, %v6672_v23 }
  0xec   : > { %v6717_v15 = vpop.f32.mrf.mxu0 }
  0xed   : > { %v5298_v16 = vpop.f32.mrf.mxu1  ;;  %v6719_v17 = vadd.f32 %v5292_v48, %v512_v43 }
  0xee   : > { %v5245_v22 = vpop.f32.mrf.mxu0 }
  0xef   : > { %v6721_v28 = vpop.f32.mrf.mxu1  ;;  %v532_v30 = vadd.f32 %v5245_v22, %v6672_v23 }
  0xf0   : > { %v6724_v39 = vpop.f32.mrf.mxu0 }
  0xf1   : > { %v5301_v40 = vpop.f32.mrf.mxu1  ;;  %v6726_v9 = vadd.f32 %v5295_v59, %v532_v30 }
  0xf2   : > { %v5248_v62 = vpop.f32.mrf.mxu0 }
  0xf3   : > { %8516 = vst [vmem:[#allocation14_spill] sm:$0xff] %v6726_v9  ;;  %v6728_v57 = vpop.f32.mrf.mxu1  ;;  %v552_v6 = vadd.f32 %v5248_v62, %v6672_v23 }
  0xf4   : > { %v6731_v14 = vpop.f32.mrf.mxu0 }
  0xf5   : > { %v5304_v24 = vpop.f32.mrf.mxu1  ;;  %v6733_v34 = vadd.f32 %v5298_v16, %v552_v6 }
  0xf6   : > { %v5251_v33 = vpop.f32.mrf.mxu0 }
  0xf7   : > { %8517 = vst [vmem:[#allocation15_spill] sm:$0xff] %v6733_v34  ;;  %v6735_v44 = vpop.f32.mrf.mxu1  ;;  %v572_v19 = vadd.f32 %v5251_v33, %v6672_v23 }
  0xf8   : > { %v6738_v13 = vpop.f32.mrf.mxu0 }
  0xf9   : > { %v5307_v55 = vpop.f32.mrf.mxu1  ;;  %v6740_v18 = vadd.f32 %v5301_v40, %v572_v19 }
  0xfa   : > { %v5254_v52 = vpop.f32.mrf.mxu0 }
  0xfb   : > { %8518 = vst [vmem:[#allocation16_spill] sm:$0xff] %v6740_v18  ;;  %v6742_v53 = vpop.f32.mrf.mxu1  ;;  %v592_v45 = vadd.f32 %v5254_v52, %v6672_v23 }
  0xfc   : > { %v6745_v63 = vpop.f32.mrf.mxu0 }
  0xfd   : > { %v5310_v31 = vpop.f32.mrf.mxu1  ;;  %v6747_v5 = vadd.f32 %v5304_v24, %v592_v45 }
  0xfe   : > { %v5257_v46 = vpop.f32.mrf.mxu0 }
  0xff   : > { %8519 = vst [vmem:[#allocation17_spill] sm:$0xff] %v6747_v5  ;;  %v6749_v2 = vpop.f32.mrf.mxu1  ;;  %v612_v32 = vadd.f32 %v5257_v46, %v6672_v23 }
 0x100   : > { %v6752_v27 = vpop.f32.mrf.mxu0 }
 0x101   : > { %v5313_v36 = vpop.f32.mrf.mxu1  ;;  %v6754_v48 = vadd.f32 %v5307_v55, %v612_v32 }
 0x102   : > { %v5260_v20 = vpop.f32.mrf.mxu0 }
 0x103   : > { %8520 = vst [vmem:[#allocation18_spill] sm:$0xff] %v6754_v48  ;;  %v6756_v21 = vpop.f32.mrf.mxu1  ;;  %v632_v50 = vadd.f32 %v5260_v20, %v6672_v23 }
 0x104   : > { %v6759_v54 = vpop.f32.mrf.mxu0 }
 0x105   : > { %v5316_v59 = vpop.f32.mrf.mxu1  ;;  %v6761_v12 = vadd.f32 %v5310_v31, %v632_v50 }
 0x106   : > { %v5263_v43 = vpop.f32.mrf.mxu0 }
 0x107   : > { %8521 = vst [vmem:[#allocation19_spill] sm:$0xff] %v6761_v12  ;;  %v6763_v16 = vpop.f32.mrf.mxu1  ;;  %v652_v22 = vadd.f32 %v5263_v43, %v6672_v23 }
 0x108   : > { %v6766_v30 = vpop.f32.mrf.mxu0 }
 0x109   : > { %v5319_v40 = vpop.f32.mrf.mxu1  ;;  %v6768_v62 = vadd.f32 %v5313_v36, %v652_v22 }
 0x10a   : > { %v5266_v6 = vpop.f32.mrf.mxu0 }
 0x10b   : > { %v6770_v24 = vpop.f32.mrf.mxu1  ;;  %v672_v33 = vadd.f32 %v5266_v6, %v6672_v23 }
 0x10c   : > { %v6773_v19 = vpop.f32.mrf.mxu0 }
 0x10d   : > { %v5322_v55 = vpop.f32.mrf.mxu1  ;;  %v6775_v52 = vadd.f32 %v5316_v59, %v672_v33 }
 0x10e   : > { %v5269_v45 = vpop.f32.mrf.mxu0 }
 0x10f   : > { %v6777_v31 = vpop.f32.mrf.mxu1  ;;  %v692_v46 = vadd.f32 %v5269_v45, %v6672_v23 }
 0x110   : > { %v6780_v32 = vpop.f32.mrf.mxu0 }
 0x111   : > { %v5325_v20 = vpop.f32.mrf.mxu1  ;;  %v6782_v36 = vadd.f32 %v5319_v40, %v692_v46 }
 0x112   : > { %v5272_v50 = vpop.f32.mrf.mxu0 }
 0x113   : > { %v6784_v43 = vpop.f32.mrf.mxu1  ;;  %v712_v22 = vadd.f32 %v5272_v50, %v6672_v23 }
 0x114   : > { %v6787_v6 = vpop.f32.mrf.mxu0 }
 0x115   : > { %v5328_v38 = vpop.f32.mrf.mxu1  ;;  %v6789_v59 = vadd.f32 %v5322_v55, %v712_v22 }
 0x116   : > { %v5275_v33 = vpop.f32.mrf.mxu0 }
 0x117   : > { %v6791_v11 = vpop.f32.mrf.mxu1  ;;  %v732_v45 = vadd.f32 %v5275_v33, %v6672_v23 }
 0x118   : > { %v6794_v51 = vpop.f32.mrf.mxu0 }
 0x119   : > { %v6796_v58 = vpop.f32.mrf.mxu1  ;;  %v6798_v40 = vadd.f32 %v5325_v20, %v732_v45 }
 0x11b   : > { %v5278_v46 = vpop.f32.mrf.mxu0  ;;  %v6800_v26 = vpop.f32.mrf.mxu1 }
 0x11c   : > { %8522 = vst [vmem:[#allocation20_spill] sm:$0xff] %v6800_v26  ;;  %v752_v50 = vadd.f32 %v5278_v46, %v6672_v23 }
 0x11d   : > { %v6803_v8 = vpop.f32.mrf.mxu0  ;;  %v6805_v55 = vpop.f32.mrf.mxu1 }
 0x11e   : > { %8523 = vst [vmem:[#allocation21_spill] sm:$0xff] %v6805_v55  ;;  %v6807_v22 = vadd.f32 %v5328_v38, %v752_v50 }
 0x11f   : > { %v6809_v1 = vpop.f32.mrf.mxu0  ;;  %v6811_v33 = vpop.f32.mrf.mxu1 }
 0x120   : > { %8524 = vst [vmem:[#allocation22_spill] sm:$0xff] %v6807_v22  ;;  %8525 = vst [vmem:[#allocation23_spill] sm:$0xff] %v6811_v33 }
 0x121   : > { %v6813_v0 = vpop.f32.mrf.mxu0  ;;  %v6815_v35 = vpop.f32.mrf.mxu1 }
 0x122   : > { %8526 = vst [vmem:[#allocation24_spill] sm:$0xff] %v6815_v35 }
 0x123   : > { %v6817_v20 = vpop.f32.mrf.mxu0  ;;  %v6819_v45 = vpop.f32.mrf.mxu1 }
 0x124   : > { %8527 = vst [vmem:[#allocation25_spill] sm:$0xff] %v6819_v45 }
 0x125   : > { %v6821_v42 = vpop.f32.mrf.mxu0  ;;  %v6823_v46 = vpop.f32.mrf.mxu1 }
 0x126   : > { %8528 = vst [vmem:[#allocation26_spill] sm:$0xff] %v6823_v46 }
 0x127   : > { %v6825_v49 = vpop.f32.mrf.mxu0  ;;  %v6827_v38 = vpop.f32.mrf.mxu1 }
 0x128   : > { %8529 = vst [vmem:[#allocation27_spill] sm:$0xff] %v6827_v38 }
 0x129   : > { %v6829_v50 = vpop.f32.mrf.mxu0  ;;  %v6831_v7 = vpop.f32.mrf.mxu1 }
 0x12a   : > { %8530 = vst [vmem:[#allocation28_spill] sm:$0xff] %v6831_v7 }
 0x12b   : > { %v6833_v12 = vpop.f32.mrf.mxu0  ;;  %v6835_v48 = vpop.f32.mrf.mxu1 }
 0x12c   : > { %8531 = vst [vmem:[#allocation29_spill] sm:$0xff] %v6835_v48 }
 0x12d   : > { %v6837_v5 = vpop.f32.mrf.mxu0  ;;  %v6839_v18 = vpop.f32.mrf.mxu1 }
 0x12e   : > { %8532 = vst [vmem:[#allocation30_spill] sm:$0xff] %v6837_v5  ;;  %8533 = vst [vmem:[#allocation31_spill] sm:$0xff] %v6839_v18 }
 0x12f   : > { %v6841_v45 = vpop.f32.mrf.mxu0  ;;  %v6843_v35 = vpop.f32.mrf.mxu1 }
 0x130   : > { %8534 = vst [vmem:[#allocation32_spill] sm:$0xff] %v6841_v45  ;;  %8535 = vst [vmem:[#allocation33_spill] sm:$0xff] %v6843_v35 }
 0x131   : > { %v6845_v46 = vpop.f32.mrf.mxu0  ;;  %v6847_v33 = vpop.f32.mrf.mxu1 }
 0x132   : > { %8536 = vst [vmem:[#allocation34_spill] sm:$0xff] %v6845_v46  ;;  %8537 = vst [vmem:[#allocation35_spill] sm:$0xff] %v6847_v33 }
 0x133   : > { %v6849_v38 = vpop.f32.mrf.mxu0  ;;  %v6851_v22 = vpop.f32.mrf.mxu1 }
 0x134   : > { %8538 = vst [vmem:[#allocation36_spill] sm:$0xff] %v6849_v38  ;;  %8539 = vst [vmem:[#allocation37_spill] sm:$0xff] %v6851_v22 }
 0x135   : > { %v6853_v7 = vpop.f32.mrf.mxu0  ;;  %v6855_v34 = vpop.f32.mrf.mxu1 }
 0x136   : > { %8540 = vst [vmem:[#allocation38_spill] sm:$0xff] %v6853_v7  ;;  %8541 = vst [vmem:[#allocation39_spill] sm:$0xff] %v6855_v34 }
 0x137   : > { %v6857_v48 = vpop.f32.mrf.mxu0  ;;  %v6859_v55 = vpop.f32.mrf.mxu1 }
 0x138   : > { %8542 = vst [vmem:[#allocation40_spill] sm:$0xff] %v6857_v48  ;;  %8543 = vst [vmem:[#allocation41_spill] sm:$0xff] %v6859_v55 }
 0x139   : > { %v6861_v18 = vpop.f32.mrf.mxu0  ;;  %v6863_v45 = vpop.f32.mrf.mxu1 }
 0x13a   : > { %8544 = vst [vmem:[#allocation42_spill] sm:$0xff] %v6861_v18  ;;  %8545 = vst [vmem:[#allocation43_spill] sm:$0xff] %v6863_v45 }
 0x13b   : > { %v6865_v35 = vpop.f32.mrf.mxu0  ;;  %v6867_v46 = vpop.f32.mrf.mxu1 }
 0x13c   : > { %8546 = vst [vmem:[#allocation44_spill] sm:$0xff] %v6865_v35  ;;  %8547 = vst [vmem:[#allocation45_spill] sm:$0xff] %v6867_v46 }
 0x13d   : > { %v6869_v33 = vpop.f32.mrf.mxu0  ;;  %v6871_v38 = vpop.f32.mrf.mxu1 }
 0x13e   : > { %8548 = vst [vmem:[#allocation46_spill] sm:$0xff] %v6869_v33  ;;  %8549 = vst [vmem:[#allocation47_spill] sm:$0xff] %v6871_v38 }
 0x13f   : > { %v6873_v22 = vpop.f32.mrf.mxu0  ;;  %v6875_v7 = vpop.f32.mrf.mxu1 }
 0x140   : > { %8550 = vst [vmem:[#allocation48_spill] sm:$0xff] %v6873_v22  ;;  %8551 = vst [vmem:[#allocation49_spill] sm:$0xff] %v6875_v7 }
 0x141   : > { %v6877_v34 = vpop.f32.mrf.mxu0  ;;  %v5413_v48 = vpop.f32.mrf.mxu1 }
 0x142   : > { %8552 = vst [vmem:[#allocation50_spill] sm:$0xff] %v6877_v34 }
 0x143   : > { %v6879_v55 = vpop.f32.mrf.mxu0  ;;  %v6881_v18 = vpop.f32.mrf.mxu1 }
 0x144   : > { %8553 = vst [vmem:[#allocation51_spill] sm:$0xff] %v6879_v55  ;;  %8554 = vst [vmem:[#allocation52_spill] sm:$0xff] %v6881_v18 }
 0x145   : > { %v6883_v45 = vpop.f32.mrf.mxu0  ;;  %v5416_v35 = vpop.f32.mrf.mxu1 }
 0x146   : > { %8555 = vst [vmem:[#allocation53_spill] sm:$0xff] %v6883_v45  ;;  %v442_v45 = vadd.f32 %v6672_v23, %v6684_v25  ;;  %v542_v25 = vadd.f32 %v6672_v23, %v6731_v14 }
 0x147   : > { %v5363_v9 = vpop.f32.mrf.mxu0  ;;  %v6885_v46 = vpop.f32.mrf.mxu1 }
 0x148   : > { %8556 = vst [vmem:[#allocation54_spill] sm:$0xff] %v6885_v46  ;;  %v1235_v33 = vadd.f32 %v5363_v9, %v6768_v62  ;;  %v462_v46 = vadd.f32 %v6672_v23, %v6700_v47  ;;  %v502_v62 = vadd.f32 %v6672_v23, %v6717_v15  ;;  %v582_v47 = vadd.f32 %v6672_v23, %v6745_v63 }
 0x149   : > { %v6888_v38 = vpop.f32.mrf.mxu0  ;;  %v5419_v22 = vpop.f32.mrf.mxu1  ;;  %v642_v63 = vadd.f32 %v6672_v23, %v6766_v30  ;;  %v702_v30 = vadd.f32 %v6672_v23, %v6787_v6 }
 0x14a   : > { %v6890_v5 = vadd.f32 %v5413_v48, %v1235_v33  ;;  %v482_v48 = vadd.f32 %v6672_v23, %v6709_v56 }
 0x14b   : > { %v5366_v7 = vpop.f32.mrf.mxu0  ;;  %v6892_v34 = vpop.f32.mrf.mxu1 }
 0x14c   : > { %8557 = vst [vmem:[#allocation55_spill] sm:$0xff] %v6890_v5  ;;  %8558 = vst [vmem:[#allocation56_spill] sm:$0xff] %v6892_v34  ;;  %v1249_v55 = vadd.f32 %v5366_v7, %v6775_v52  ;;  %v522_v7 = vadd.f32 %v6672_v23, %v6724_v39  ;;  %v602_v39 = vadd.f32 %v6672_v23, %v6752_v27 }
 0x14d   : > { %v6895_v26 = vpop.f32.mrf.mxu0  ;;  %v5422_v18 = vpop.f32.mrf.mxu1  ;;  %v852_v14 = vadd.f32 %v6692_v29, %v482_v48  ;;  %v682_v27 = vadd.f32 %v6672_v23, %v6780_v32 }
 0x14e   : > { %v6901_v9 = vadd.f32 %v5416_v35, %v1249_v55  ;;  %v562_v35 = vadd.f32 %v6672_v23, %v6738_v13  ;;  %v828_v55 = vadd.f32 %v6664_v10, %v442_v45  ;;  %v622_v13 = vadd.f32 %v6672_v23, %v6759_v54 }
 0x14f   : > { %v5369_v33 = vpop.f32.mrf.mxu0  ;;  %v6907_v5 = vpop.f32.mrf.mxu1  ;;  %v876_v10 = vadd.f32 %v6713_v37, %v522_v7 }
 0x150   : > { %8559 = vst [vmem:[#allocation57_spill] sm:$0xff] %v6901_v9  ;;  %8560 = vst [vmem:[#allocation58_spill] sm:$0xff] %v6907_v5  ;;  %v1263_v52 = vadd.f32 %v5369_v33, %v6782_v36  ;;  %v840_v9 = vadd.f32 %v6676_v61, %v462_v46  ;;  %v864_v33 = vadd.f32 %v6706_v41, %v502_v62 }
 0x151   : > { %v6918_v56 = vpop.f32.mrf.mxu0  ;;  %v5425_v15 = vpop.f32.mrf.mxu1  ;;  %v662_v61 = vadd.f32 %v6672_v23, %v6773_v19  ;;  %v888_v41 = vadd.f32 %v6721_v28, %v542_v25  ;;  %v900_v54 = vadd.f32 %v6728_v57, %v562_v35  ;;  %v924_v46 = vadd.f32 %v6742_v53, %v602_v39  ;;  %v8566_v25 = vld [vmem:[#allocation34_spill] sm:$0xff] }
 0x152   : > { %v6924_v36 = vadd.f32 %v5419_v22, %v1263_v52  ;;  %v912_v22 = vadd.f32 %v6735_v44, %v582_v47  ;;  %v722_v19 = vadd.f32 %v6672_v23, %v6794_v51  ;;  %v936_v28 = vadd.f32 %v6749_v2, %v622_v13  ;;  %v8565_v52 = vld [vmem:[#allocation21_spill] sm:$0xff]  ;;  %v8567_v47 = vld [vmem:[#allocation15_spill] sm:$0xff] }
 0x153   : > { %v5372_v5 = vpop.f32.mrf.mxu0  ;;  %v6932_v34 = vpop.f32.mrf.mxu1  ;;  %v948_v57 = vadd.f32 %v6756_v21, %v642_v63  ;;  %v1095_v44 = vadd.f32 %v6809_v1, %v6686_v4  ;;  %v1088_v6 = vadd.f32 %v6813_v0, %v828_v55  ;;  %v960_v53 = vadd.f32 %v6763_v16, %v662_v61  ;;  %v8573_v61 = vld [vmem:[#allocation38_spill] sm:$0xff] }
 0x154   : > { %v1277_v29 = vadd.f32 %v5372_v5, %v6789_v59  ;;  %v742_v5 = vadd.f32 %v6672_v23, %v6803_v8  ;;  %v6963_v51 = vadd.f32 %v6770_v24, %v682_v27  ;;  %v1109_v8 = vadd.f32 %v6817_v20, %v6702_v3 }
 0x155   : > { %v6945_v45 = vpop.f32.mrf.mxu0  ;;  %v5428_v37 = vpop.f32.mrf.mxu1  ;;  %v1102_v1 = vadd.f32 %v6821_v42, %v840_v9  ;;  %v1123_v0 = vadd.f32 %v6825_v49, %v6711_v60  ;;  %v1116_v4 = vadd.f32 %v6829_v50, %v852_v14  ;;  %v6978_v16 = vadd.f32 %v6784_v43, %v722_v19  ;;  %v8562_v60 = vld [vmem:[#allocation30_spill] sm:$0xff]  ;;  %v8564_v9 = vld [vmem:[#allocation32_spill] sm:$0xff] }
 0x156   : > { %v6952_v32 = vadd.f32 %v5422_v18, %v1277_v29  ;;  %v6969_v18 = vadd.f32 %v6777_v31, %v702_v30  ;;  %v6981_v3 = vadd.f32 %v6791_v11, %v742_v5  ;;  %v1137_v24 = vadd.f32 %v6833_v12, %v6719_v17  ;;  %v8563_v50 = vld [vmem:[#allocation14_spill] sm:$0xff]  ;;  %v8568_v17 = vld [vmem:[#allocation36_spill] sm:$0xff] }
 0x157   : > { %v5375_v59 = vpop.f32.mrf.mxu0  ;;  %v6959_v48 = vpop.f32.mrf.mxu1  ;;  %v1387_v42 = vadd.f32 %v6796_v58, %v1095_v44  ;;  %v1130_v20 = vadd.f32 %v8562_v60, %v864_v33  ;;  %v1151_v62 = vadd.f32 %v8564_v9, %v8563_v50  ;;  %v1403_v11 = vadd.f32 %v8565_v52, %v1109_v8  ;;  %v8570_v58 = vld [vmem:[#allocation23_spill] sm:$0xff]  ;;  %v8571_v14 = vld [vmem:[#allocation24_spill] sm:$0xff]  ;;  %v8572_v33 = vld [vmem:[#allocation25_spill] sm:$0xff] }
 0x158   : > { %v1291_v23 = vadd.f32 %v5375_v59, %v6798_v40  ;;  %v8561_v40 = vld [vmem:[#allocation20_spill] sm:$0xff]  ;;  %v1144_v35 = vadd.f32 %v8566_v25, %v876_v10  ;;  %v1165_v12 = vadd.f32 %v8568_v17, %v8567_v47  ;;  %v1395_v39 = vadd.f32 %v8570_v58, %v1102_v1  ;;  %v8574_v19 = vld [vmem:[#allocation26_spill] sm:$0xff]  ;;  %v8578_v1 = vld [vmem:[#allocation27_spill] sm:$0xff] }
 0x159   : > { %v6975_v2 = vpop.f32.mrf.mxu0  ;;  %v5483_v21 = vpop.f32.mrf.mxu1  ;;  %v1379_v49 = vadd.f32 %v8561_v40, %v1088_v6  ;;  %v1419_v13 = vadd.f32 %v8571_v14, %v1123_v0  ;;  %v7000_v63 = vadd.f32 %v8572_v33, %v1116_v4  ;;  %v1158_v27 = vadd.f32 %v8573_v61, %v888_v41  ;;  %v8575_v10 = vld [vmem:[#allocation16_spill] sm:$0xff]  ;;  %v8577_v59 = vld [vmem:[#allocation42_spill] sm:$0xff]  ;;  %v8580_v41 = vld [vmem:[#allocation17_spill] sm:$0xff] }
 0x15a   : > { %v6985_v31 = vadd.f32 %v5425_v15, %v1291_v23  ;;  %v8569_v15 = vld [vmem:[#allocation22_spill] sm:$0xff]  ;;  %v7006_v5 = vadd.f32 %v8574_v19, %v1137_v24  ;;  %v8576_v44 = vld [vmem:[#allocation40_spill] sm:$0xff]  ;;  %v1172_v8 = vadd.f32 %v8577_v59, %v900_v54  ;;  %v7014_v0 = vadd.f32 %v8578_v1, %v1130_v20  ;;  %v8583_v25 = vld [vmem:[#allocation29_spill] sm:$0xff] }
 0x15b   : > { %v5378_v7 = vpop.f32.mrf.mxu0  ;;  %v1958_v43 = vpop.f32.mrf.mxu1  ;;  %v1179_v6 = vadd.f32 %v8576_v44, %v8575_v10  ;;  %v8579_v4 = vld [vmem:[#allocation28_spill] sm:$0xff]  ;;  %v8582_v9 = vld [vmem:[#allocation46_spill] sm:$0xff]  ;;  %v7023_v47 = vadd.f32 %v8583_v25, %v1144_v35  ;;  %v8584_v17 = vld [vmem:[#allocation31_spill] sm:$0xff]  ;;  %v1228_v25 = vadd.f32 %v6888_v38, %v948_v57 }
 0x15c   : > { %v1305_v55 = vadd.f32 %v5378_v7, %v8569_v15  ;;  %v7017_v40 = vadd.f32 %v8579_v4, %v1151_v62  ;;  %v8581_v60 = vld [vmem:[#allocation44_spill] sm:$0xff]  ;;  %v1186_v7 = vadd.f32 %v8582_v9, %v912_v22  ;;  %v7026_v54 = vadd.f32 %v8584_v17, %v1165_v12  ;;  %v8587_v58 = vld [vmem:[#allocation33_spill] sm:$0xff]  ;;  %v8588_v14 = vld [vmem:[#allocation50_spill] sm:$0xff] }
 0x15d   : > { %v7003_v29 = vpop.f32.mrf.mxu0  ;;  %v5486_v30 = vpop.f32.mrf.mxu1  ;;  %v1193_v50 = vadd.f32 %v8581_v60, %v8580_v41  ;;  %v8586_v15 = vld [vmem:[#allocation48_spill] sm:$0xff]  ;;  %v7031_v62 = vadd.f32 %v8587_v58, %v1158_v27  ;;  %v1200_v33 = vadd.f32 %v8588_v14, %v924_v46  ;;  %v8589_v61 = vld [vmem:[#allocation19_spill] sm:$0xff]  ;;  %v8591_v10 = vld [vmem:[#allocation53_spill] sm:$0xff] }
 0x15e   : > { %v7011_v23 = vadd.f32 %v5428_v37, %v1305_v55  ;;  %v8585_v37 = vld [vmem:[#allocation18_spill] sm:$0xff]  ;;  %v8590_v19 = vld [vmem:[#allocation51_spill] sm:$0xff]  ;;  %v1214_v44 = vadd.f32 %v8591_v10, %v936_v28  ;;  %v8593_v12 = vld [vmem:[#allocation37_spill] sm:$0xff]  ;;  %v1242_v28 = vadd.f32 %v6895_v26, %v960_v53  ;;  %v1256_v26 = vadd.f32 %v6918_v56, %v6963_v51 }
 0x15f   : > { %v5433_v24 = vpop.f32.mrf.mxu0  ;;  %v1970_v52 = vpop.f32.mrf.mxu1  ;;  %v1207_v20 = vadd.f32 %v8586_v15, %v8585_v37  ;;  %v1221_v22 = vadd.f32 %v8590_v19, %v8589_v61  ;;  %v8592_v1 = vld [vmem:[#allocation35_spill] sm:$0xff]  ;;  %v7041_v41 = vadd.f32 %v8593_v12, %v1172_v8 }
 0x160   : > { %v1707_v55 = vadd.f32 %v5433_v24, %v1387_v42  ;;  %v7038_v4 = vadd.f32 %v8592_v1, %v1179_v6  ;;  %v8594_v9 = vld [vmem:[#allocation39_spill] sm:$0xff]  ;;  %v8595_v24 = vld [vmem:[#allocation41_spill] sm:$0xff] }
 0x161   : > { %v1700_v59 = vpop.f32.mrf.mxu0  ;;  %v5489_v35 = vpop.f32.mrf.mxu1  ;;  %v7044_v27 = vadd.f32 %v8594_v9, %v1193_v50  ;;  %v7047_v46 = vadd.f32 %v8595_v24, %v1186_v7  ;;  %v8596_v15 = vld [vmem:[#allocation43_spill] sm:$0xff]  ;;  %v8599_v7 = vld [vmem:[#allocation49_spill] sm:$0xff]  ;;  %v1284_v9 = vadd.f32 %v6975_v2, %v6978_v16 }
 0x162   : > { %v1965_v60 = vadd.f32 %v5483_v21, %v1707_v55  ;;  %v1701_v42 = vadd.f32 %v1700_v59, %v1379_v49  ;;  %v7052_v6 = vadd.f32 %v8596_v15, %v1207_v20  ;;  %v8597_v21 = vld [vmem:[#allocation45_spill] sm:$0xff]  ;;  %v8598_v50 = vld [vmem:[#allocation47_spill] sm:$0xff]  ;;  %v7061_v61 = vadd.f32 %v8599_v7, %v1214_v44 }
 0x163   : > { %v5436_v17 = vpop.f32.mrf.mxu0  ;;  %v1982_v37 = vpop.f32.mrf.mxu1  ;;  %v7055_v49 = vadd.f32 %v8597_v21, %v1200_v33  ;;  %v7058_v55 = vadd.f32 %v8598_v50, %v1221_v22  ;;  %v8601_v33 = vld [vmem:[#allocation54_spill] sm:$0xff]  ;;  %v1270_v22 = vadd.f32 %v6945_v45, %v6969_v18 }
 0x164   : > { %v2149_v58 = vmax.f32 %v1965_v60, 0.0  ;;  %v1959_v8 = vadd.f32 %v1958_v43, %v1701_v42  ;;  %v1719_v14 = vadd.f32 %v5436_v17, %v1403_v11  ;;  %v8600_v11 = vld [vmem:[#allocation52_spill] sm:$0xff]  ;;  %v7070_v59 = vadd.f32 %v8601_v33, %v1242_v28 }
 0x165   : > { %v1712_v38 = vpop.f32.mrf.mxu0  ;;  %v5492_v57 = vpop.f32.mrf.mxu1  ;;  %v7067_v10 = vadd.f32 %v8600_v11, %v1228_v25  ;;  %v8604_v11 = vld [vmem:[#allocation2_spill] sm:$0xff] }
 0x166   : > { %v2196_v53 = vsel %vm2191_vm2, %v2149_v58, 0  ;;  %v2148_v20 = vmax.f32 %v1959_v8, 0.0  ;;  %v1977_v19 = vadd.f32 %v5486_v30, %v1719_v14  ;;  %v1713_v43 = vadd.f32 %v1712_v38, %v1395_v39  ;;  %v8602_v30 = vld [vmem:[#allocation56_spill] sm:$0xff] }
 0x167   : > { %v7074_v44 = vand.u32 4294901760, %v2196_v53  ;;  %v5439_v1 = vpop.f32.mrf.mxu0  ;;  %v1994_v56 = vpop.f32.mrf.mxu1  ;;  %v7078_v39 = vadd.f32 %v8602_v30, %v1256_v26  ;;  %v7103_v26 = vadd.f32 %v6932_v34, %v1284_v9  ;;  %v8605_v34 = vld [vmem:[#allocation5_spill] sm:$0xff] }
 0x168   : > { %v2193_v51 = vsel %vm2191_vm2, %v2148_v20, 0  ;;  %v2151_v12 = vmax.f32 %v1977_v19, 0.0  ;;  %v1971_v60 = vadd.f32 %v1970_v52, %v1713_v43  ;;  %v1731_v42 = vadd.f32 %v5439_v1, %v1419_v13  ;;  %v8603_v13 = vld [vmem:[#allocation58_spill] sm:$0xff] }
 0x169   : > { %v7083_v24 = vsub.f32 %v2196_v53, %v7074_v44  ;;  %v7085_v25 = vand.u32 4294901760, %v2193_v51  ;;  %v1724_v45 = vpop.f32.mrf.mxu0  ;;  %v5495_v18 = vpop.f32.mrf.mxu1  ;;  %v7090_v58 = vadd.f32 %v8603_v13, %v1270_v22 }
 0x16a   : > { %v2202_v28 = vsel %vm2191_vm2, %v2151_v12, 0  ;;  %v2150_v17 = vmax.f32 %v1971_v60, 0.0  ;;  %v1989_v15 = vadd.f32 %v5489_v35, %v1731_v42  ;;  %v1725_v52 = vadd.f32 %v1724_v45, %v7000_v63 }
 0x16b   : > { %v8383_v8 = vand.u32 4294901760, %v7083_v24  ;;  %v7094_v2 = vsub.f32 %v2193_v51, %v7085_v25  ;;  %v7096_v16 = vand.u32 4294901760, %v2202_v28  ;;  %v5442_v14 = vpop.f32.mrf.mxu0  ;;  %5593 = vmatprep.mubr.f32.mxu1 %v7085_v25  ;;  %v2006_v21 = vpop.f32.mrf.mxu1 }
 0x16c   : > { %v2199_v50 = vsel %vm2191_vm2, %v2150_v17, 0  ;;  %v2153_v7 = vmax.f32 %v1989_v15, 0.0  ;;  %v1983_v35 = vadd.f32 %v1982_v37, %v1725_v52  ;;  %v1743_v63 = vadd.f32 %v5442_v14, %v7006_v5  ;;  %5594 = vmatmul.mubr.f32.vlgmr.msra.gmra.mxu1 %v7074_v44 }
 0x16d   : > { %v2370_v38 = vsub.f32 %v7083_v24, %v8383_v8  ;;  %v7108_v53 = vand.u32 4294901760, %v2199_v50  ;;  %v1736_v20 = vpop.f32.mrf.mxu0  ;;  %v5498_v19 = vpop.f32.mrf.mxu1  ;;  %v8384_v43 = vand.u32 4294901760, %v7094_v2  ;;  %5698 = vmatpush3.msra.mxu1 %v8604_v11  ;;  %v7116_v1 = vsub.f32 %v2202_v28, %v7096_v16  ;;  %v8607_v28 = vld [vmem:[#allocation8_spill] sm:$0xff] }
 0x16e   : > { %v2208_v37 = vsel %vm2191_vm2, %v2153_v7, 0  ;;  %v2152_v5 = vmax.f32 %v1983_v35, 0.0  ;;  %v2001_v33 = vadd.f32 %v5492_v57, %v1743_v63  ;;  %v1737_v22 = vadd.f32 %v1736_v20, %v7014_v0  ;;  %5699 = vmatprep.subr.mxu1 %v8605_v34  ;;  %v8609_v63 = vld [vmem:[#allocation11_spill] sm:$0xff] }
 0x16f   : > { %v7119_v51 = vsub.f32 %v2199_v50, %v7108_v53  ;;  %v7121_v12 = vand.u32 4294901760, %v2208_v37  ;;  %v5445_v60 = vpop.f32.mrf.mxu0  ;;  %5596 = vmatprep.mubr.f32.mxu1 %v7108_v53  ;;  %v2360_v42 = vsub.f32 %v7094_v2, %v8384_v43  ;;  %v2018_v57 = vpop.f32.mrf.mxu1  ;;  %5700 = vmatpush3.msra.mxu1 %v8605_v34  ;;  %v2371_v17 = vand.u32 4294901760, %v2370_v38  ;;  %v8620_v43 = vld [vmem:[#allocation4_spill] sm:$0xff] }
 0x170   : > { %v2205_v0 = vsel %vm2191_vm2, %v2152_v5, 0  ;;  %v2155_v30 = vmax.f32 %v2001_v33, 0.0  ;;  %v1995_v9 = vadd.f32 %v1994_v56, %v1737_v22  ;;  %v1755_v45 = vadd.f32 %v5445_v60, %v7017_v40  ;;  %5597 = vmatmul.mubr.f32.gmra.mxu1 %v7096_v16  ;;  %5701 = vmatprep.subr.mxu1 %v8607_v28 }
 0x171   : > { %8606 = vst [vmem:[#allocation20_spill] sm:$0xff] %v7121_v12  ;;  %v7132_v15 = vand.u32 4294901760, %v2205_v0  ;;  %v1748_v52 = vpop.f32.mrf.mxu0  ;;  %v2361_v13 = vand.u32 4294901760, %v2360_v42  ;;  %v5501_v14 = vpop.f32.mrf.mxu1  ;;  %v8381_v50 = vand.u32 4294901760, %v7119_v51  ;;  %5702 = vmatpush3.msra.mxu1 %v8607_v28  ;;  %v7140_v20 = vsub.f32 %v2208_v37, %v7121_v12 }
 0x172   : > { %v2214_v7 = vsel %vm2191_vm2, %v2155_v30, 0  ;;  %v2154_v35 = vmax.f32 %v1995_v9, 0.0  ;;  %v2013_v56 = vadd.f32 %v5495_v18, %v1755_v45  ;;  %v1749_v40 = vadd.f32 %v1748_v52, %v7023_v47  ;;  %5703 = vmatprep.subr.mxu1 %v8609_v63  ;;  %v8612_v9 = vld [vmem:[#allocation3_spill] sm:$0xff] }
 0x173   : > { %8608 = vst [vmem:[#allocation30_spill] sm:$0xff] %v7132_v15  ;;  %v7143_v38 = vsub.f32 %v2205_v0, %v7132_v15  ;;  %v5448_v5 = vpop.f32.mrf.mxu0  ;;  %5537 = vmatprep.mubr.f32.mxu0 %v2361_v13  ;;  %5599 = vmatprep.mubr.f32.mxu1 %v7132_v15  ;;  %v2380_v33 = vsub.f32 %v7119_v51, %v8381_v50  ;;  %v8379_v18 = vand.u32 4294901760, %v7116_v1  ;;  %v2030_v22 = vpop.f32.mrf.mxu1  ;;  %v7153_v0 = vand.u32 4294901760, %v2214_v7 }
 0x174   : > { %v2211_v47 = vsel %vm2191_vm2, %v2154_v35, 0  ;;  %v2157_v60 = vmax.f32 %v2013_v56, 0.0  ;;  %v2007_v42 = vadd.f32 %v2006_v21, %v1749_v40  ;;  %v1767_v37 = vadd.f32 %v5448_v5, %v7026_v54  ;;  %5538 = vmatmul.mubr.f32.vlgmr.msra.gmra.mxu0 %v2371_v17  ;;  %5600 = vmatmul.mubr.f32.gmra.mxu1 %v7121_v12  ;;  %v8613_v40 = vld [vmem:[#allocation6_spill] sm:$0xff] }
 0x175   : > { %8610 = vst [vmem:[#allocation14_spill] sm:$0xff] %v7153_v0  ;;  %v7155_v30 = vand.u32 4294901760, %v2211_v47  ;;  %5642 = vmatpush3.msra.mxu0 %v8612_v9  ;;  %v1760_v45 = vpop.f32.mrf.mxu0  ;;  %v2381_v52 = vand.u32 4294901760, %v2380_v33  ;;  %v2390_v13 = vsub.f32 %v7116_v1, %v8379_v18  ;;  %v5504_v35 = vpop.f32.mrf.mxu1  ;;  %5704 = vmatpush3.msra.mxu1 %v8609_v63  ;;  %v1298_v5 = vadd.f32 %v7003_v29, %v6981_v3 }
 0x176   : > { %v2220_v54 = vsel %vm2191_vm2, %v2157_v60, 0  ;;  %v2156_v21 = vmax.f32 %v2007_v42, 0.0  ;;  %v2025_v17 = vadd.f32 %v5498_v19, %v1767_v37  ;;  %v1761_v56 = vadd.f32 %v1760_v45, %v7031_v62  ;;  %5643 = vmatprep.subr.mxu0 %v8613_v40  ;;  %5809 = vmatprep.subr.mxu1 %v8604_v11 }
 0x177   : > { %8611 = vst [vmem:[#allocation32_spill] sm:$0xff] %v7155_v30  ;;  %v7169_v33 = vsub.f32 %v2211_v47, %v7155_v30  ;;  %v5451_v9 = vpop.f32.mrf.mxu0  ;;  %5540 = vmatprep.mubr.f32.mxu0 %v2381_v52  ;;  %5602 = vmatprep.mubr.f32.mxu1 %v7155_v30  ;;  %v2391_v18 = vand.u32 4294901760, %v2390_v13  ;;  %v8380_v60 = vand.u32 4294901760, %v7143_v38  ;;  %v2042_v19 = vpop.f32.mrf.mxu1  ;;  %v7177_v3 = vand.u32 4294901760, %v2220_v54 }
 0x178   : > { %v2217_v62 = vsel %vm2191_vm2, %v2156_v21, 0  ;;  %v2159_v42 = vmax.f32 %v2025_v17, 0.0  ;;  %v2019_v37 = vadd.f32 %v2018_v57, %v1761_v56  ;;  %v1779_v45 = vadd.f32 %v5451_v9, %v7038_v4  ;;  %5603 = vmatmul.mubr.f32.gmra.mxu1 %v7153_v0  ;;  %5644 = vmatpush3.msra.mxu0 %v8613_v40  ;;  %v8616_v57 = vld [vmem:[#allocation9_spill] sm:$0xff] }
 0x179   : > { %8614 = vst [vmem:[#allocation21_spill] sm:$0xff] %v7177_v3  ;;  %v7179_v29 = vand.u32 4294901760, %v2217_v62  ;;  %5541 = vmatmul.mubr.f32.gmra.mxu0 %v2391_v18  ;;  %v1772_v47 = vpop.f32.mrf.mxu0  ;;  %v2400_v52 = vsub.f32 %v7143_v38, %v8380_v60  ;;  %v8382_v13 = vand.u32 4294901760, %v7140_v20  ;;  %v5507_v21 = vpop.f32.mrf.mxu1  ;;  %5645 = vmatprep.subr.mxu0 %v8616_v57  ;;  %v7190_v18 = vadd.f32 %v6959_v48, %v1298_v5 }
 0x17a   : > { %v2226_v4 = vsel %vm2191_vm2, %v2159_v42, 0  ;;  %v2158_v17 = vmax.f32 %v2019_v37, 0.0  ;;  %v2037_v56 = vadd.f32 %v5501_v14, %v1779_v45  ;;  %v1773_v40 = vadd.f32 %v1772_v47, %v7041_v41  ;;  %5646 = vmatpush3.msra.mxu0 %v8616_v57  ;;  %v8617_v14 = vld [vmem:[#allocation12_spill] sm:$0xff] }
 0x17b   : > { %8615 = vst [vmem:[#allocation34_spill] sm:$0xff] %v7179_v29  ;;  %v7193_v9 = vsub.f32 %v2214_v7, %v7153_v0  ;;  %v5454_v60 = vpop.f32.mrf.mxu0  ;;  %v2401_v50 = vand.u32 4294901760, %v2400_v52  ;;  %5605 = vmatprep.mubr.f32.mxu1 %v7179_v29  ;;  %v2410_v42 = vsub.f32 %v7140_v20, %v8382_v13  ;;  %v2054_v37 = vpop.f32.mrf.mxu1  ;;  %5647 = vmatprep.subr.mxu0 %v8617_v14  ;;  %v7204_v7 = vand.u32 4294901760, %v2226_v4 }
 0x17c   : > { %v2223_v41 = vsel %vm2191_vm2, %v2158_v17, 0  ;;  %v2161_v45 = vmax.f32 %v2037_v56, 0.0  ;;  %v2031_v47 = vadd.f32 %v2030_v22, %v1773_v40  ;;  %v1791_v48 = vadd.f32 %v5454_v60, %v7044_v27  ;;  %5606 = vmatmul.mubr.f32.gmra.mxu1 %v7177_v3  ;;  %5648 = vmatpush3.msra.mxu0 %v8617_v14 }
 0x17d   : > { %8618 = vst [vmem:[#allocation15_spill] sm:$0xff] %v7204_v7  ;;  %v7206_v5 = vand.u32 4294901760, %v2223_v41  ;;  %5543 = vmatprep.mubr.f32.mxu0 %v2401_v50  ;;  %v2411_v52 = vand.u32 4294901760, %v2410_v42  ;;  %v1784_v57 = vpop.f32.mrf.mxu0  ;;  %v8385_v13 = vand.u32 4294901760, %v7169_v33  ;;  %v5510_v8 = vpop.f32.mrf.mxu1  ;;  %5753 = vmatprep.subr.mxu0 %v8620_v43  ;;  %v7213_v56 = vsub.f32 %v2220_v54, %v7177_v3 }
 0x17e   : > { %v2232_v22 = vsel %vm2191_vm2, %v2161_v45, 0  ;;  %v2160_v17 = vmax.f32 %v2031_v47, 0.0  ;;  %v2049_v27 = vadd.f32 %v5504_v35, %v1791_v48  ;;  %v1785_v60 = vadd.f32 %v1784_v57, %v7047_v46 }
 0x17f   : > { %8619 = vst [vmem:[#allocation36_spill] sm:$0xff] %v7206_v5  ;;  %v7216_v40 = vsub.f32 %v2217_v62, %v7179_v29  ;;  %5544 = vmatmul.mubr.f32.gmra.mxu0 %v2411_v52  ;;  %v5457_v50 = vpop.f32.mrf.mxu0  ;;  %v2420_v42 = vsub.f32 %v7169_v33, %v8385_v13  ;;  %5608 = vmatprep.mubr.f32.mxu1 %v7206_v5  ;;  %v8392_v14 = vand.u32 4294901760, %v7193_v9  ;;  %v2066_v45 = vpop.f32.mrf.mxu1  ;;  %v7226_v62 = vand.u32 4294901760, %v2232_v22 }
 0x180   : > { %v2229_v35 = vsel %vm2191_vm2, %v2160_v17, 0  ;;  %v2163_v46 = vmax.f32 %v2049_v27, 0.0  ;;  %v2043_v47 = vadd.f32 %v2042_v19, %v1785_v60  ;;  %v1803_v54 = vadd.f32 %v5457_v50, %v7052_v6  ;;  %5609 = vmatmul.mubr.f32.gmra.mxu1 %v7204_v7 }
 0x181   : > { %8621 = vst [vmem:[#allocation22_spill] sm:$0xff] %v7226_v62  ;;  %v7228_v48 = vand.u32 4294901760, %v2229_v35  ;;  %v2421_v52 = vand.u32 4294901760, %v2420_v42  ;;  %v2430_v57 = vsub.f32 %v7193_v9, %v8392_v14  ;;  %v1796_v13 = vpop.f32.mrf.mxu0  ;;  %v5513_v3 = vpop.f32.mrf.mxu1  ;;  %v7236_v6 = vsub.f32 %v2226_v4, %v7204_v7 }
 0x182   : > { %v2238_v29 = vsel %vm2191_vm2, %v2163_v46, 0  ;;  %v2162_v17 = vmax.f32 %v2043_v47, 0.0  ;;  %v2061_v27 = vadd.f32 %v5507_v21, %v1803_v54  ;;  %v1797_v19 = vadd.f32 %v1796_v13, %v7055_v49 }
 0x183   : > { %8622 = vst [vmem:[#allocation23_spill] sm:$0xff] %v7228_v48  ;;  %v7239_v60 = vsub.f32 %v2223_v41, %v7206_v5  ;;  %5546 = vmatprep.mubr.f32.mxu0 %v2421_v52  ;;  %v2431_v50 = vand.u32 4294901760, %v2430_v57  ;;  %v5460_v42 = vpop.f32.mrf.mxu0  ;;  %v8393_v0 = vand.u32 4294901760, %v7216_v40  ;;  %5611 = vmatprep.mubr.f32.mxu1 %v7228_v48  ;;  %v2078_v14 = vpop.f32.mrf.mxu1  ;;  %v7246_v13 = vand.u32 4294901760, %v2238_v29 }
 0x184   : > { %v2235_v46 = vsel %vm2191_vm2, %v2162_v17, 0  ;;  %v2165_v47 = vmax.f32 %v2061_v27, 0.0  ;;  %v2055_v21 = vadd.f32 %v2054_v37, %v1797_v19  ;;  %v1815_v49 = vadd.f32 %v5460_v42, %v7058_v55  ;;  %5612 = vmatmul.mubr.f32.gmra.mxu1 %v7226_v62 }
 0x185   : > { %8623 = vst [vmem:[#allocation24_spill] sm:$0xff] %v7246_v13  ;;  %v7248_v4 = vand.u32 4294901760, %v2235_v46  ;;  %5547 = vmatmul.mubr.f32.gmra.mxu0 %v2431_v50  ;;  %v2440_v41 = vsub.f32 %v7216_v40, %v8393_v0  ;;  %v8398_v54 = vand.u32 4294901760, %v7213_v56  ;;  %v1808_v52 = vpop.f32.mrf.mxu0  ;;  %v5516_v57 = vpop.f32.mrf.mxu1  ;;  %v7257_v19 = vsub.f32 %v2232_v22, %v7226_v62 }
 0x186   : > { %v2244_v17 = vsel %vm2191_vm2, %v2165_v47, 0  ;;  %v2164_v37 = vmax.f32 %v2055_v21, 0.0  ;;  %v2073_v27 = vadd.f32 %v5510_v8, %v1815_v49  ;;  %v1809_v55 = vadd.f32 %v1808_v52, %v7061_v61  ;;  %v8625_v61 = vld [vmem:[#allocation55_spill] sm:$0xff] }
 0x187   : > { %8624 = vst [vmem:[#allocation25_spill] sm:$0xff] %v7248_v4  ;;  %v7260_v42 = vsub.f32 %v2229_v35, %v7228_v48  ;;  %v2441_v50 = vand.u32 4294901760, %v2440_v41  ;;  %v2450_v0 = vsub.f32 %v7213_v56, %v8398_v54  ;;  %v5463_v7 = vpop.f32.mrf.mxu0  ;;  %5614 = vmatprep.mubr.f32.mxu1 %v7248_v4  ;;  %v2090_v5 = vpop.f32.mrf.mxu1  ;;  %v7269_v22 = vand.u32 4294901760, %v2244_v17 }
 0x188   : > { %v2241_v47 = vsel %vm2191_vm2, %v2164_v37, 0  ;;  %v2167_v8 = vmax.f32 %v2073_v27, 0.0  ;;  %v2067_v21 = vadd.f32 %v2066_v45, %v1809_v55  ;;  %v1827_v49 = vadd.f32 %v5463_v7, %v8625_v61  ;;  %5615 = vmatmul.mubr.f32.gmra.mxu1 %v7246_v13 }
 0x189   : > { %8626 = vst [vmem:[#allocation38_spill] sm:$0xff] %v7269_v22  ;;  %v7271_v35 = vand.u32 4294901760, %v2241_v47  ;;  %5549 = vmatprep.mubr.f32.mxu0 %v2441_v50  ;;  %v2451_v41 = vand.u32 4294901760, %v2450_v0  ;;  %v8405_v52 = vand.u32 4294901760, %v7239_v60  ;;  %v1820_v54 = vpop.f32.mrf.mxu0  ;;  %v5519_v62 = vpop.f32.mrf.mxu1  ;;  %v8412_v45 = vand.u32 4294901760, %v7236_v6 }
 0x18a   : > { %v2250_v48 = vsel %vm2191_vm2, %v2167_v8, 0  ;;  %v2166_v30 = vmax.f32 %v2067_v21, 0.0  ;;  %v2085_v37 = vadd.f32 %v5513_v3, %v1827_v49  ;;  %v7277_v7 = vsub.f32 %v2238_v29, %v7246_v13 }
 0x18b   : > { %v7280_v27 = vsub.f32 %v2235_v46, %v7248_v4  ;;  %5550 = vmatmul.mubr.f32.gmra.mxu0 %v2451_v41  ;;  %v2460_v0 = vsub.f32 %v7239_v60, %v8405_v52  ;;  %v5466_v55 = vpop.f32.mrf.mxu0  ;;  %5617 = vmatprep.mubr.f32.mxu1 %v7271_v35  ;;  %v7286_v50 = vpop.f32.mrf.mxu1  ;;  %v2470_v29 = vsub.f32 %v7236_v6, %v8412_v45  ;;  %v7294_v21 = vand.u32 4294901760, %v2250_v48  ;;  %v8628_v41 = vld [vmem:[#allocation57_spill] sm:$0xff] }
 0x18c   : > { %v2247_v3 = vsel %vm2191_vm2, %v2166_v30, 0  ;;  %v2169_v8 = vmax.f32 %v2085_v37, 0.0  ;;  %v1821_v46 = vadd.f32 %v1820_v54, %v7067_v10  ;;  %5618 = vmatmul.mubr.f32.gmra.mxu1 %v7269_v22  ;;  %v1839_v52 = vadd.f32 %v5466_v55, %v8628_v41 }
 0x18d   : > { %8627 = vst [vmem:[#allocation26_spill] sm:$0xff] %v7294_v21  ;;  %v7296_v61 = vand.u32 4294901760, %v2247_v3  ;;  %v2461_v49 = vand.u32 4294901760, %v2460_v0  ;;  %v1832_v13 = vpop.f32.mrf.mxu0  ;;  %v2471_v30 = vand.u32 4294901760, %v2470_v29  ;;  %v8415_v12 = vand.u32 4294901760, %v7260_v42  ;;  %v5522_v55 = vpop.f32.mrf.mxu1 }
 0x18e   : > { %v2256_v4 = vsel %vm2191_vm2, %v2169_v8, 0  ;;  %v2079_v37 = vadd.f32 %v2078_v14, %v1821_v46  ;;  %v7302_v45 = vsub.f32 %v2244_v17, %v7269_v22  ;;  %v7305_v10 = vsub.f32 %v2241_v47, %v7271_v35 }
 0x18f   : > { %v7307_v54 = vand.u32 4294901760, %v2256_v4  ;;  %5552 = vmatprep.mubr.f32.mxu0 %v2461_v49  ;;  %v2097_v15 = vadd.f32 %v5516_v57, %v1839_v52  ;;  %v5469_v0 = vpop.f32.mrf.mxu0  ;;  %5620 = vmatprep.mubr.f32.mxu1 %v7296_v61  ;;  %v2480_v14 = vsub.f32 %v7260_v42, %v8415_v12  ;;  %v8418_v17 = vand.u32 4294901760, %v7257_v19 }
 0x190   : > { %5553 = vmatmul.mubr.f32.gmra.mxu0 %v2471_v30  ;;  %v2168_v8 = vmax.f32 %v2079_v37, 0.0  ;;  %v1833_v29 = vadd.f32 %v1832_v13, %v7070_v59  ;;  %5621 = vmatmul.mubr.f32.gmra.mxu1 %v7294_v21  ;;  %v7317_v47 = vsub.f32 %v2250_v48, %v7294_v21  ;;  %v1851_v52 = vadd.f32 %v5469_v0, %v6924_v36  ;;  %v2114_v0 = vpop.f32.mrf.mxu1 }
 0x191   : > { %8629 = vst [vmem:[#allocation16_spill] sm:$0xff] %v7307_v54  ;;  %v2171_v57 = vmax.f32 %v2097_v15, 0.0  ;;  %v1844_v49 = vpop.f32.mrf.mxu0  ;;  %v2481_v30 = vand.u32 4294901760, %v2480_v14  ;;  %v2490_v37 = vsub.f32 %v7257_v19, %v8418_v17  ;;  %v7326_v59 = vsub.f32 %v2256_v4, %v7307_v54 }
 0x192   : > { %v2253_v41 = vsel %vm2191_vm2, %v2168_v8, 0  ;;  %v2091_v12 = vadd.f32 %v2090_v5, %v1833_v29  ;;  %v2109_v48 = vadd.f32 %v5519_v62, %v1851_v52  ;;  %v8632_v21 = vand.u32 4294901760, %v7280_v27 }
 0x193   : > { %v7328_v13 = vand.u32 4294901760, %v2253_v41  ;;  %v2262_v15 = vsel %vm2191_vm2, %v2171_v57, 0  ;;  %v5472_v36 = vpop.f32.mrf.mxu0  ;;  %5555 = vmatprep.mubr.f32.mxu0 %v2481_v30  ;;  %v2491_v8 = vand.u32 4294901760, %v2490_v37  ;;  %v8423_v29 = vand.u32 4294901760, %v7277_v7 }
 0x194   : > { %v7331_v46 = vand.u32 4294901760, %v2262_v15  ;;  %v2170_v14 = vmax.f32 %v2091_v12, 0.0  ;;  %v2500_v17 = vsub.f32 %v7280_v27, %v8632_v21  ;;  %v2173_v4 = vmax.f32 %v2109_v48, 0.0  ;;  %v5525_v48 = vpop.f32.mrf.mxu1 }
 0x195   : > { %8630 = vst [vmem:[#allocation40_spill] sm:$0xff] %v7328_v13  ;;  %v1845_v22 = vadd.f32 %v1844_v49, %v7078_v39  ;;  %5623 = vmatprep.mubr.f32.mxu1 %v7328_v13  ;;  %v1856_v62 = vpop.f32.mrf.mxu0  ;;  %v7341_v57 = vsub.f32 %v2247_v3, %v7296_v61  ;;  %5556 = vmatmul.mubr.f32.gmra.mxu0 %v2491_v8 }
 0x196   : > { %8631 = vst [vmem:[#allocation42_spill] sm:$0xff] %v7331_v46  ;;  %v2259_v12 = vsel %vm2191_vm2, %v2170_v14, 0  ;;  %v2501_v52 = vand.u32 4294901760, %v2500_v17  ;;  %v1863_v30 = vadd.f32 %v5472_v36, %v6952_v32  ;;  %5624 = vmatmul.mubr.f32.gmra.mxu1 %v7307_v54  ;;  %v7347_v21 = vsub.f32 %v2262_v15, %v7331_v46 }
 0x197   : > { %v7349_v37 = vand.u32 4294901760, %v2259_v12  ;;  %v2510_v39 = vsub.f32 %v7277_v7, %v8423_v29  ;;  %v2103_v3 = vadd.f32 %v7286_v50, %v1845_v22  ;;  %v5475_v49 = vpop.f32.mrf.mxu0  ;;  %v8424_v36 = vand.u32 4294901760, %v7305_v10 }
 0x198   : > { %5558 = vmatprep.mubr.f32.mxu0 %v2501_v52  ;;  %v2121_v32 = vadd.f32 %v5522_v55, %v1863_v30  ;;  %v2268_v15 = vsel %vm2191_vm2, %v2173_v4, 0  ;;  %v8633_v54 = vand.u32 4294901760, %v7302_v45  ;;  %v7364_v50 = vsub.f32 %v2253_v41, %v7328_v13  ;;  %v2126_v41 = vpop.f32.mrf.mxu1 }
 0x199   : > { %v2511_v14 = vand.u32 4294901760, %v2510_v39  ;;  %v2172_v5 = vmax.f32 %v2103_v3, 0.0  ;;  %5626 = vmatprep.mubr.f32.mxu1 %v7349_v37  ;;  %v1868_v22 = vpop.f32.mrf.mxu0  ;;  %v2520_v55 = vsub.f32 %v7305_v10, %v8424_v36  ;;  %v1857_v52 = vadd.f32 %v1856_v62, %v7090_v58 }
 0x19a   : > { %v2530_v29 = vsub.f32 %v7302_v45, %v8633_v54  ;;  %v2175_v8 = vmax.f32 %v2121_v32, 0.0  ;;  %5627 = vmatmul.mubr.f32.gmra.mxu1 %v7331_v46  ;;  %v1875_v30 = vadd.f32 %v5475_v49, %v6985_v31  ;;  %v8430_v39 = vand.u32 4294901760, %v7341_v57 }
 0x19b   : > { %5559 = vmatmul.mubr.f32.gmra.mxu0 %v2511_v14  ;;  %v2265_v54 = vsel %vm2191_vm2, %v2172_v5, 0  ;;  %v5478_v3 = vpop.f32.mrf.mxu0  ;;  %v7375_v32 = vand.u32 4294901760, %v2268_v15  ;;  %v2521_v58 = vand.u32 4294901760, %v2520_v55  ;;  %v2115_v46 = vadd.f32 %v2114_v0, %v1857_v52  ;;  %v5528_v52 = vpop.f32.mrf.mxu1 }
 0x19c   : > { %v7377_v17 = vand.u32 4294901760, %v2265_v54  ;;  %v2274_v36 = vsel %vm2191_vm2, %v2175_v8, 0  ;;  %v2531_v62 = vand.u32 4294901760, %v2530_v29  ;;  %v2133_v13 = vadd.f32 %v5525_v48, %v1875_v30 }
 0x19d   : > { %v2540_v5 = vsub.f32 %v7341_v57, %v8430_v39  ;;  %v7384_v31 = vsub.f32 %v2259_v12, %v7349_v37  ;;  %5561 = vmatprep.mubr.f32.mxu0 %v2521_v58  ;;  %v8634_v49 = vand.u32 4294901760, %v7317_v47  ;;  %v1869_v4 = vadd.f32 %v1868_v22, %v7103_v26  ;;  %v1880_v26 = vpop.f32.mrf.mxu0 }
 0x19e   : > { %v1887_v8 = vadd.f32 %v5478_v3, %v7011_v23  ;;  %v7391_v55 = vand.u32 4294901760, %v2274_v36  ;;  %v2174_v0 = vmax.f32 %v2115_v46, 0.0  ;;  %v2177_v29 = vmax.f32 %v2133_v13, 0.0  ;;  %5629 = vmatprep.mubr.f32.mxu1 %v7377_v17 }
 0x19f   : > { %v2550_v14 = vsub.f32 %v7317_v47, %v8634_v49  ;;  %5562 = vmatmul.mubr.f32.gmra.mxu0 %v2531_v62  ;;  %v2541_v48 = vand.u32 4294901760, %v2540_v5  ;;  %v7395_v12 = vsub.f32 %v2268_v15, %v7375_v32  ;;  %v2127_v30 = vadd.f32 %v2126_v41, %v1869_v4  ;;  %5630 = vmatmul.mubr.f32.gmra.mxu1 %v7375_v32 }
 0x1a0   : > { %v2145_v58 = vadd.f32 %v5528_v52, %v1887_v8  ;;  %v8429_v49 = vand.u32 4294901760, %v7364_v50  ;;  %v2271_v23 = vsel %vm2191_vm2, %v2174_v0, 0  ;;  %v2280_v22 = vsel %vm2191_vm2, %v2177_v29, 0 }
 0x1a1   : > { %5564 = vmatprep.mubr.f32.mxu0 %v2541_v48  ;;  %v2551_v46 = vand.u32 4294901760, %v2550_v14  ;;  %v8635_v13 = vand.u32 4294901760, %v7326_v59  ;;  %v7405_v15 = vsub.f32 %v2265_v54, %v7377_v17  ;;  %v7407_v4 = vand.u32 4294901760, %v2271_v23 }
 0x1a2   : > { %v2176_v41 = vmax.f32 %v2127_v30, 0.0  ;;  %v2179_v62 = vmax.f32 %v2145_v58, 0.0  ;;  %v7410_v5 = vsub.f32 %v2274_v36, %v7391_v55  ;;  %v2560_v8 = vsub.f32 %v7364_v50, %v8429_v49  ;;  %v2138_v36 = vpop.f32.mrf.mxu1 }
 0x1a3   : > { %v2570_v3 = vsub.f32 %v7326_v59, %v8635_v13  ;;  %5565 = vmatmul.mubr.f32.gmra.mxu0 %v2551_v46  ;;  %v1881_v14 = vadd.f32 %v1880_v26, %v7190_v18  ;;  %v8431_v0 = vand.u32 4294901760, %v7384_v31  ;;  %v8434_v29 = vand.u32 4294901760, %v7395_v12  ;;  %5632 = vmatprep.mubr.f32.mxu1 %v7407_v4 }
 0x1a4   : > { %v7419_v54 = vsub.f32 %v2271_v23, %v7407_v4  ;;  %v7421_v48 = vand.u32 4294901760, %v2280_v22  ;;  %v2277_v52 = vsel %vm2191_vm2, %v2176_v41, 0  ;;  %v2561_v58 = vand.u32 4294901760, %v2560_v8  ;;  %5633 = vmatmul.mubr.f32.gmra.mxu1 %v7391_v55 }
 0x1a5   : > { %v7425_v30 = vand.u32 4294901760, %v2277_v52  ;;  %v2571_v46 = vand.u32 4294901760, %v2570_v3  ;;  %v2139_v13 = vadd.f32 %v2138_v36, %v1881_v14  ;;  %v2286_v18 = vsel %vm2191_vm2, %v2179_v62, 0 }
 0x1a6   : > { %v2580_v26 = vsub.f32 %v7384_v31, %v8431_v0  ;;  %v8636_v23 = vand.u32 4294901760, %v7347_v21  ;;  %v8432_v49 = vand.u32 4294901760, %v7405_v15  ;;  %5567 = vmatprep.mubr.f32.mxu0 %v2561_v58  ;;  %v7442_v62 = vsub.f32 %v2280_v22, %v7421_v48 }
 0x1a7   : > { %v7438_v8 = vsub.f32 %v2277_v52, %v7425_v30  ;;  %v2178_v3 = vmax.f32 %v2139_v13, 0.0  ;;  %5635 = vmatprep.mubr.f32.mxu1 %v7425_v30  ;;  %5568 = vmatmul.mubr.f32.gmra.mxu0 %v2571_v46  ;;  %v7448_v0 = vand.u32 4294901760, %v2286_v18  ;;  %v2610_v58 = vsub.f32 %v7395_v12, %v8434_v29 }
 0x1a8   : > { %v2590_v41 = vsub.f32 %v7347_v21, %v8636_v23  ;;  %v2581_v14 = vand.u32 4294901760, %v2580_v26  ;;  %v2600_v36 = vsub.f32 %v7405_v15, %v8432_v49  ;;  %v8433_v23 = vand.u32 4294901760, %v7419_v54  ;;  %5636 = vmatmul.mubr.f32.gmra.mxu1 %v7421_v48 }
 0x1a9   : > { %8637 = vst [vmem:[#allocation27_spill] sm:$0xff] %v7448_v0  ;;  %v2283_v52 = vsel %vm2191_vm2, %v2178_v3, 0  ;;  %v8435_v26 = vand.u32 4294901760, %v7438_v8  ;;  %v8639_v29 = vand.u32 4294901760, %v7094_v2 }
 0x1aa   : > { %v2591_v39 = vand.u32 4294901760, %v2590_v41  ;;  %v7455_v22 = vand.u32 4294901760, %v2283_v52  ;;  %5570 = vmatprep.mubr.f32.mxu0 %v2581_v14  ;;  %v2601_v46 = vand.u32 4294901760, %v2600_v36  ;;  %v2620_v13 = vsub.f32 %v7419_v54, %v8433_v23 }
 0x1ab   : > { %v2640_v14 = vsub.f32 %v7438_v8, %v8435_v26  ;;  %v7471_v36 = vsub.f32 %v2286_v18, %v7448_v0  ;;  %v2611_v23 = vand.u32 4294901760, %v2610_v58  ;;  %v8640_v41 = vand.u32 4294901760, %v7083_v24 }
 0x1ac   : > { %v7462_v49 = vsub.f32 %v2283_v52, %v7455_v22  ;;  %5571 = vmatmul.mubr.f32.gmra.mxu0 %v2591_v39  ;;  %5638 = vmatprep.mubr.f32.mxu1 %v7455_v22  ;;  %v2621_v3 = vand.u32 4294901760, %v2620_v13  ;;  %v8638_v52 = vand.u32 4294901760, %v7410_v5 }
 0x1ad   : > { %5573 = vmatprep.mubr.f32.mxu0 %v2601_v46  ;;  %5639 = vmatmul.mubr.f32.gmra.mxu1 %v7448_v0  ;;  %v2641_v13 = vand.u32 4294901760, %v2640_v14  ;;  %v2669_v58 = vand.u32 4294901760, %v7471_v36 }
 0x1ae   : > { %v2630_v39 = vsub.f32 %v7410_v5, %v8638_v52  ;;  %5705 = vmatprep.mubr.f32.mxu1 %v8639_v29  ;;  %v2659_v46 = vand.u32 4294901760, %v7462_v49  ;;  %v8641_v52 = vand.u32 4294901760, %v7442_v62  ;;  %v8642_v29 = vand.u32 4294901760, %v7119_v51 }
 0x1af   : > { %v2670_v14 = vsub.f32 %v7471_v36, %v2669_v58 }
 0x1b0   : > { %5574 = vmatmul.mubr.f32.gmra.mxu0 %v2611_v23  ;;  %v2660_v18 = vsub.f32 %v7462_v49, %v2659_v46  ;;  %v2631_v26 = vand.u32 4294901760, %v2630_v39  ;;  %v2650_v0 = vsub.f32 %v7442_v62, %v8641_v52  ;;  %v8644_v39 = vand.u32 4294901760, %v7143_v38 }
 0x1b1   : > { %5576 = vmatprep.mubr.f32.mxu0 %v2621_v3  ;;  %5706 = vmatmul.mubr.f32.vlgmr.msra.gmra.mxu1 %v8640_v41  ;;  %v8643_v41 = vand.u32 4294901760, %v7116_v1  ;;  %v8658_v52 = vand.u32 4294901760, %v7277_v7 }
 0x1b2   : > { %5708 = vmatprep.mubr.f32.mxu1 %v8642_v29  ;;  %5810 = vmatpush3.msra.mxu1 %v8604_v11  ;;  %v2661_v23 = vand.u32 4294901760, %v2660_v18  ;;  %v2651_v3 = vand.u32 4294901760, %v2650_v0  ;;  %v8645_v11 = vand.u32 4294901760, %v7140_v20  ;;  %v8646_v0 = vand.u32 4294901760, %v7169_v33  ;;  %v8650_v18 = vld [vmem:[#allocation7_spill] sm:$0xff] }
 0x1b3   : > { %5811 = vmatprep.subr.mxu1 %v8605_v34  ;;  %v8659_v29 = vand.u32 4294901760, %v7305_v10 }
 0x1b4   : > { %5577 = vmatmul.mubr.f32.gmra.mxu0 %v2631_v26  ;;  %5812 = vmatpush3.msra.mxu1 %v8605_v34  ;;  %v2671_v34 = vand.u32 4294901760, %v2670_v14  ;;  %v8647_v26 = vand.u32 4294901760, %v7193_v9 }
 0x1b5   : > { %5579 = vmatprep.mubr.f32.mxu0 %v2641_v13  ;;  %5709 = vmatmul.mubr.f32.gmra.mxu1 %v8643_v41  ;;  %v8649_v13 = vand.u32 4294901760, %v7213_v56 }
 0x1b6   : > { %5711 = vmatprep.mubr.f32.mxu1 %v8644_v39  ;;  %5813 = vmatprep.subr.mxu1 %v8607_v28 }
 0x1b7   : > { %5814 = vmatpush3.msra.mxu1 %v8607_v28  ;;  %v8648_v28 = vand.u32 4294901760, %v7216_v40 }
 0x1b8   : > { %5580 = vmatmul.mubr.f32.gmra.mxu0 %v2651_v3  ;;  %5815 = vmatprep.subr.mxu1 %v8609_v63 }
 0x1b9   : > { %5582 = vmatprep.mubr.f32.mxu0 %v2661_v23  ;;  %5712 = vmatmul.mubr.f32.gmra.mxu1 %v8645_v11 }
 0x1ba   : > { %5714 = vmatprep.mubr.f32.mxu1 %v8646_v0  ;;  %5816 = vmatpush3.msra.mxu1 %v8609_v63  ;;  %v8651_v63 = vand.u32 4294901760, %v7239_v60 }
 0x1bc   : > { %5583 = vmatmul.mubr.f32.gmra.mxu0 %v2671_v34 }
 0x1bd   : > { %5649 = vmatprep.mubr.f32.mxu0 %v7094_v2  ;;  %5715 = vmatmul.mubr.f32.gmra.mxu1 %v8647_v26  ;;  %v8652_v2 = vld [vmem:[#allocation10_spill] sm:$0xff] }
 0x1be   : > { %5717 = vmatprep.mubr.f32.mxu1 %v8648_v28 }
 0x1c0   : > { %5650 = vmatmul.mubr.f32.vlgmr.msra.gmra.mxu0 %v7083_v24  ;;  %v8653_v24 = vand.u32 4294901760, %v7236_v6 }
 0x1c1   : > { %5754 = vmatpush3.msra.mxu0 %v8620_v43  ;;  %5652 = vmatprep.mubr.f32.mxu0 %v7119_v51  ;;  %v8654_v43 = vld [vmem:[#allocation13_spill] sm:$0xff]  ;;  %v8655_v51 = vand.u32 4294901760, %v7260_v42 }
 0x1c2   : > { %5718 = vmatmul.mubr.f32.gmra.mxu1 %v8649_v13  ;;  %5755 = vmatprep.subr.mxu0 %v8650_v18 }
 0x1c3   : > { %5720 = vmatprep.mubr.f32.mxu1 %v8651_v63  ;;  %5756 = vmatpush3.msra.mxu0 %v8650_v18 }
 0x1c4   : > { %5653 = vmatmul.mubr.f32.gmra.mxu0 %v7116_v1  ;;  %5757 = vmatprep.subr.mxu0 %v8652_v2  ;;  %v8656_v1 = vand.u32 4294901760, %v7257_v19 }
 0x1c5   : > { %5655 = vmatprep.mubr.f32.mxu0 %v7143_v38  ;;  %5758 = vmatpush3.msra.mxu0 %v8652_v2  ;;  %v8657_v38 = vand.u32 4294901760, %v7280_v27 }
 0x1c6   : > { %5721 = vmatmul.mubr.f32.gmra.mxu1 %v8653_v24  ;;  %5759 = vmatprep.subr.mxu0 %v8654_v43 }
 0x1c7   : > { %5723 = vmatprep.mubr.f32.mxu1 %v8655_v51  ;;  %5760 = vmatpush3.msra.mxu0 %v8654_v43 }
 0x1c8   : > { %5656 = vmatmul.mubr.f32.gmra.mxu0 %v7140_v20  ;;  %v8660_v20 = vand.u32 4294901760, %v7302_v45 }
 0x1c9   : > { %5658 = vmatprep.mubr.f32.mxu0 %v7169_v33  ;;  %v8661_v33 = vand.u32 4294901760, %v7341_v57 }
 0x1ca   : > { %5724 = vmatmul.mubr.f32.gmra.mxu1 %v8656_v1 }
 0x1cb   : > { %5726 = vmatprep.mubr.f32.mxu1 %v8657_v38 }
 0x1cc   : > { %5659 = vmatmul.mubr.f32.gmra.mxu0 %v7193_v9  ;;  %v8662_v9 = vand.u32 4294901760, %v7317_v47 }
 0x1cd   : > { %5661 = vmatprep.mubr.f32.mxu0 %v7216_v40  ;;  %v8663_v40 = vand.u32 4294901760, %v7364_v50 }
 0x1ce   : > { %5727 = vmatmul.mubr.f32.gmra.mxu1 %v8658_v52 }
 0x1cf   : > { %5729 = vmatprep.mubr.f32.mxu1 %v8659_v29 }
 0x1d0   : > { %5662 = vmatmul.mubr.f32.gmra.mxu0 %v7213_v56  ;;  %v8664_v56 = vand.u32 4294901760, %v7326_v59 }
 0x1d1   : > { %5664 = vmatprep.mubr.f32.mxu0 %v7239_v60  ;;  %v8665_v60 = vand.u32 4294901760, %v7384_v31 }
 0x1d2   : > { %5730 = vmatmul.mubr.f32.gmra.mxu1 %v8660_v20 }
 0x1d3   : > { %5732 = vmatprep.mubr.f32.mxu1 %v8661_v33 }
 0x1d4   : > { %5665 = vmatmul.mubr.f32.gmra.mxu0 %v7236_v6  ;;  %v8666_v6 = vand.u32 4294901760, %v7347_v21 }
 0x1d5   : > { %5667 = vmatprep.mubr.f32.mxu0 %v7260_v42  ;;  %v8667_v42 = vand.u32 4294901760, %v7405_v15 }
 0x1d6   : > { %5733 = vmatmul.mubr.f32.gmra.mxu1 %v8662_v9 }
 0x1d7   : > { %5735 = vmatprep.mubr.f32.mxu1 %v8663_v40 }
 0x1d8   : > { %5668 = vmatmul.mubr.f32.gmra.mxu0 %v7257_v19  ;;  %v8668_v19 = vand.u32 4294901760, %v7395_v12 }
 0x1d9   : > { %5670 = vmatprep.mubr.f32.mxu0 %v7280_v27  ;;  %v8669_v27 = vand.u32 4294901760, %v7419_v54 }
 0x1da   : > { %5736 = vmatmul.mubr.f32.gmra.mxu1 %v8664_v56 }
 0x1db   : > { %5738 = vmatprep.mubr.f32.mxu1 %v8665_v60 }
 0x1dc   : > { %5671 = vmatmul.mubr.f32.gmra.mxu0 %v7277_v7  ;;  %v8670_v7 = vand.u32 4294901760, %v7410_v5 }
 0x1dd   : > { %5673 = vmatprep.mubr.f32.mxu0 %v7305_v10  ;;  %v8671_v10 = vand.u32 4294901760, %v7438_v8 }
 0x1de   : > { %5739 = vmatmul.mubr.f32.gmra.mxu1 %v8666_v6 }
 0x1df   : > { %5741 = vmatprep.mubr.f32.mxu1 %v8667_v42 }
 0x1e0   : > { %5674 = vmatmul.mubr.f32.gmra.mxu0 %v7302_v45  ;;  %v8672_v45 = vand.u32 4294901760, %v7442_v62 }
 0x1e1   : > { %5676 = vmatprep.mubr.f32.mxu0 %v7341_v57  ;;  %v8675_v57 = vld [vmem:[#allocation32_spill] sm:$0xff] }
 0x1e2   : > { %5742 = vmatmul.mubr.f32.gmra.mxu1 %v8668_v19 }
 0x1e3   : > { %5744 = vmatprep.mubr.f32.mxu1 %v8669_v27 }
 0x1e4   : > { %5677 = vmatmul.mubr.f32.gmra.mxu0 %v7317_v47  ;;  %v8673_v47 = vld [vmem:[#allocation30_spill] sm:$0xff] }
 0x1e5   : > { %5679 = vmatprep.mubr.f32.mxu0 %v7364_v50  ;;  %v8677_v50 = vld [vmem:[#allocation34_spill] sm:$0xff] }
 0x1e6   : > { %5745 = vmatmul.mubr.f32.gmra.mxu1 %v8670_v7 }
 0x1e7   : > { %5747 = vmatprep.mubr.f32.mxu1 %v8671_v10 }
 0x1e8   : > { %5680 = vmatmul.mubr.f32.gmra.mxu0 %v7326_v59  ;;  %v8674_v59 = vld [vmem:[#allocation20_spill] sm:$0xff] }
 0x1e9   : > { %5682 = vmatprep.mubr.f32.mxu0 %v7384_v31  ;;  %v8678_v31 = vld [vmem:[#allocation21_spill] sm:$0xff] }
 0x1ea   : > { %5748 = vmatmul.mubr.f32.gmra.mxu1 %v8672_v45 }
 0x1eb   : > { %5750 = vmatprep.mubr.f32.mxu1 %v2659_v46 }
 0x1ec   : > { %5683 = vmatmul.mubr.f32.gmra.mxu0 %v7347_v21  ;;  %v8676_v21 = vld [vmem:[#allocation14_spill] sm:$0xff] }
 0x1ed   : > { %5685 = vmatprep.mubr.f32.mxu0 %v7405_v15  ;;  %v8681_v15 = vld [vmem:[#allocation23_spill] sm:$0xff] }
 0x1ee   : > { %5751 = vmatmul.mubr.f32.gmra.mxu1 %v2669_v58 }
 0x1ef   : > { %5817 = vmatprep.mubr.f32.mxu1 %v7085_v25 }
 0x1f0   : > { %5686 = vmatmul.mubr.f32.gmra.mxu0 %v7395_v12  ;;  %v8679_v12 = vld [vmem:[#allocation36_spill] sm:$0xff] }
 0x1f1   : > { %5688 = vmatprep.mubr.f32.mxu0 %v7419_v54  ;;  %v8687_v54 = vld [vmem:[#allocation40_spill] sm:$0xff] }
 0x1f2   : > { %5818 = vmatmul.mubr.f32.vlgmr.msra.gmra.mxu1 %v7074_v44 }
 0x1f3   : > { %5820 = vmatprep.mubr.f32.mxu1 %v7108_v53 }
 0x1f4   : > { %5689 = vmatmul.mubr.f32.gmra.mxu0 %v7410_v5  ;;  %v8686_v5 = vld [vmem:[#allocation26_spill] sm:$0xff] }
 0x1f5   : > { %5691 = vmatprep.mubr.f32.mxu0 %v7438_v8  ;;  %v8688_v8 = vld [vmem:[#allocation16_spill] sm:$0xff] }
 0x1f6   : > { %5821 = vmatmul.mubr.f32.gmra.mxu1 %v7096_v16 }
 0x1f7   : > { %5823 = vmatprep.mubr.f32.mxu1 %v8673_v47 }
 0x1f8   : > { %5692 = vmatmul.mubr.f32.gmra.mxu0 %v7442_v62  ;;  %v8689_v62 = vld [vmem:[#allocation42_spill] sm:$0xff] }
 0x1f9   : > { %5694 = vmatprep.mubr.f32.mxu0 %v7462_v49  ;;  %v8680_v49 = vld [vmem:[#allocation15_spill] sm:$0xff] }
 0x1fa   : > { %5824 = vmatmul.mubr.f32.gmra.mxu1 %v8674_v59 }
 0x1fb   : > { %5826 = vmatprep.mubr.f32.mxu1 %v8675_v57 }
 0x1fc   : > { %5695 = vmatmul.mubr.f32.gmra.mxu0 %v7471_v36 }
 0x1fd   : > { %5761 = vmatprep.mubr.f32.mxu0 %v7085_v25  ;;  %v8682_v25 = vld [vmem:[#allocation22_spill] sm:$0xff] }
 0x1fe   : > { %5827 = vmatmul.mubr.f32.gmra.mxu1 %v8676_v21 }
 0x1ff   : > { %5829 = vmatprep.mubr.f32.mxu1 %v8677_v50 }
 0x200   : > { %5762 = vmatmul.mubr.f32.vlgmr.msra.gmra.mxu0 %v7074_v44  ;;  %v8683_v44 = vld [vmem:[#allocation25_spill] sm:$0xff] }
 0x201   : > { %5764 = vmatprep.mubr.f32.mxu0 %v7108_v53  ;;  %v8684_v53 = vld [vmem:[#allocation24_spill] sm:$0xff] }
 0x202   : > { %5830 = vmatmul.mubr.f32.gmra.mxu1 %v8678_v31 }
 0x203   : > { %5832 = vmatprep.mubr.f32.mxu1 %v8679_v12 }
 0x204   : > { %5765 = vmatmul.mubr.f32.gmra.mxu0 %v7096_v16  ;;  %v8685_v16 = vld [vmem:[#allocation38_spill] sm:$0xff] }
 0x205   : > { %5767 = vmatprep.mubr.f32.mxu0 %v8673_v47 }
 0x206   : > { %5833 = vmatmul.mubr.f32.gmra.mxu1 %v8680_v49 }
 0x207   : > { %5835 = vmatprep.mubr.f32.mxu1 %v8681_v15 }
 0x208   : > { %5768 = vmatmul.mubr.f32.gmra.mxu0 %v8674_v59 }
 0x209   : > { %5770 = vmatprep.mubr.f32.mxu0 %v8675_v57 }
 0x20a   : > { %5836 = vmatmul.mubr.f32.gmra.mxu1 %v8682_v25 }
 0x20b   : > { %5838 = vmatprep.mubr.f32.mxu1 %v8683_v44 }
 0x20c   : > { %5771 = vmatmul.mubr.f32.gmra.mxu0 %v8676_v21 }
 0x20d   : > { %5773 = vmatprep.mubr.f32.mxu0 %v8677_v50 }
 0x20e   : > { %5839 = vmatmul.mubr.f32.gmra.mxu1 %v8684_v53 }
 0x20f   : > { %5841 = vmatprep.mubr.f32.mxu1 %v7271_v35 }
 0x210   : > { %5774 = vmatmul.mubr.f32.gmra.mxu0 %v8678_v31 }
 0x211   : > { %5776 = vmatprep.mubr.f32.mxu0 %v8679_v12 }
 0x212   : > { %5842 = vmatmul.mubr.f32.gmra.mxu1 %v8685_v16 }
 0x213   : > { %5844 = vmatprep.mubr.f32.mxu1 %v7296_v61 }
 0x214   : > { %5777 = vmatmul.mubr.f32.gmra.mxu0 %v8680_v49 }
 0x215   : > { %5779 = vmatprep.mubr.f32.mxu0 %v8681_v15 }
 0x216   : > { %5845 = vmatmul.mubr.f32.gmra.mxu1 %v8686_v5 }
 0x217   : > { %5847 = vmatprep.mubr.f32.mxu1 %v8687_v54 }
 0x218   : > { %5780 = vmatmul.mubr.f32.gmra.mxu0 %v8682_v25 }
 0x219   : > { %5782 = vmatprep.mubr.f32.mxu0 %v8683_v44 }
 0x21a   : > { %5848 = vmatmul.mubr.f32.gmra.mxu1 %v8688_v8 }
 0x21b   : > { %5850 = vmatprep.mubr.f32.mxu1 %v7349_v37 }
 0x21c   : > { %5783 = vmatmul.mubr.f32.gmra.mxu0 %v8684_v53 }
 0x21d   : > { %5785 = vmatprep.mubr.f32.mxu0 %v7271_v35 }
 0x21e   : > { %5851 = vmatmul.mubr.f32.gmra.mxu1 %v8689_v62 }
 0x21f   : > { %5853 = vmatprep.mubr.f32.mxu1 %v7377_v17 }
 0x220   : > { %5786 = vmatmul.mubr.f32.gmra.mxu0 %v8685_v16 }
 0x221   : > { %5788 = vmatprep.mubr.f32.mxu0 %v7296_v61  ;;  %v8690_v61 = vld [vmem:[#allocation27_spill] sm:$0xff] }
 0x222   : > { %5854 = vmatmul.mubr.f32.gmra.mxu1 %v7375_v32 }
 0x223   : > { %5856 = vmatprep.mubr.f32.mxu1 %v7407_v4 }
 0x224   : > { %5789 = vmatmul.mubr.f32.gmra.mxu0 %v8686_v5 }
 0x225   : > { %5791 = vmatprep.mubr.f32.mxu0 %v8687_v54 }
 0x226   : > { %5857 = vmatmul.mubr.f32.gmra.mxu1 %v7391_v55 }
 0x227   : > { %5859 = vmatprep.mubr.f32.mxu1 %v7425_v30 }
 0x228   : > { %5792 = vmatmul.mubr.f32.gmra.mxu0 %v8688_v8 }
 0x229   : > { %5794 = vmatprep.mubr.f32.mxu0 %v7349_v37  ;;  %v7659_v37 = vld [vmem:[%s8302_s4] ss:$0 sm:$0xff] }
 0x22a   : > { %5860 = vmatmul.mubr.f32.gmra.mxu1 %v7421_v48 }
 0x22b   : > { %5862 = vmatprep.mubr.f32.mxu1 %v7455_v22 }
 0x22c   : > { %5795 = vmatmul.mubr.f32.gmra.mxu0 %v8689_v62  ;;  %v5595_v35 = vpop.f32.mrf.mxu1 }
 0x22d   : > { %5797 = vmatprep.mubr.f32.mxu0 %v7377_v17 }
 0x22e   : > { %5863 = vmatmul.mubr.f32.gmra.mxu1 %v8690_v61  ;;  %v2764_v36 = vpop.f32.mrf.mxu1 }
 0x230   : > { %5798 = vmatmul.mubr.f32.gmra.mxu0 %v7375_v32  ;;  %v5598_v46 = vpop.f32.mrf.mxu1 }
 0x231   : > { %5800 = vmatprep.mubr.f32.mxu0 %v7407_v4 }
 0x232   : > { %v2776_v58 = vpop.f32.mrf.mxu1 }
 0x234   : > { %5801 = vmatmul.mubr.f32.gmra.mxu0 %v7391_v55  ;;  %v5539_v23 = vpop.f32.mrf.mxu0  ;;  %v5601_v41 = vpop.f32.mrf.mxu1 }
 0x235   : > { %5803 = vmatprep.mubr.f32.mxu0 %v7425_v30  ;;  %v2374_v17 = vadd.f32 %v5539_v23, %v7659_v37 }
 0x236   : > { %v2363_v3 = vpop.f32.mrf.mxu0  ;;  %v2788_v14 = vpop.f32.mrf.mxu1 }
 0x237   : > { %v2364_v32 = vadd.f32 %v7659_v37, %v2363_v3  ;;  %v7665_v39 = vadd.f32 %v5595_v35, %v2374_v17 }
 0x238   : > { %5804 = vmatmul.mubr.f32.gmra.mxu0 %v7421_v48  ;;  %v5604_v4 = vpop.f32.mrf.mxu1 }
 0x239   : > { %5806 = vmatprep.mubr.f32.mxu0 %v7455_v22  ;;  %v5542_v11 = vpop.f32.mrf.mxu0  ;;  %v7669_v34 = vadd.f32 %v2764_v36, %v2364_v32 }
 0x23a   : > { %v2394_v55 = vadd.f32 %v5542_v11, %v7659_v37  ;;  %v2800_v0 = vpop.f32.mrf.mxu1 }
 0x23b   : > { %v2383_v30 = vpop.f32.mrf.mxu0 }
 0x23c   : > { %5807 = vmatmul.mubr.f32.gmra.mxu0 %v8690_v61  ;;  %v2384_v26 = vadd.f32 %v7659_v37, %v2383_v30  ;;  %v5607_v28 = vpop.f32.mrf.mxu1  ;;  %v7674_v13 = vadd.f32 %v5598_v46, %v2394_v55 }
 0x23e   : > { %v2812_v18 = vpop.f32.mrf.mxu1  ;;  %v7676_v63 = vadd.f32 %v2776_v58, %v2384_v26 }
 0x23f   : > { %v5545_v48 = vpop.f32.mrf.mxu0 }
 0x240   : > { %v2414_v22 = vadd.f32 %v5545_v48, %v7659_v37  ;;  %v5610_v2 = vpop.f32.mrf.mxu1 }
 0x241   : > { %v2403_v24 = vpop.f32.mrf.mxu0 }
 0x242   : > { %v2404_v43 = vadd.f32 %v7659_v37, %v2403_v24  ;;  %v2824_v51 = vpop.f32.mrf.mxu1  ;;  %v7680_v1 = vadd.f32 %v5601_v41, %v2414_v22 }
 0x244   : > { %v5613_v38 = vpop.f32.mrf.mxu1  ;;  %v7682_v52 = vadd.f32 %v2788_v14, %v2404_v43 }
 0x245   : > { %v5548_v29 = vpop.f32.mrf.mxu0 }
 0x246   : > { %v2434_v20 = vadd.f32 %v5548_v29, %v7659_v37  ;;  %v2836_v33 = vpop.f32.mrf.mxu1 }
 0x247   : > { %v2423_v9 = vpop.f32.mrf.mxu0 }
 0x248   : > { %v2424_v40 = vadd.f32 %v7659_v37, %v2423_v9  ;;  %v5616_v56 = vpop.f32.mrf.mxu1  ;;  %v7686_v60 = vadd.f32 %v5604_v4, %v2434_v20 }
 0x24a   : > { %8691 = vst [vmem:[#allocation28_spill] sm:$0xff] %v7686_v60  ;;  %v2848_v6 = vpop.f32.mrf.mxu1  ;;  %v7688_v42 = vadd.f32 %v2800_v0, %v2424_v40 }
 0x24b   : > { %v5551_v19 = vpop.f32.mrf.mxu0 }
 0x24c   : > { %8692 = vst [vmem:[#allocation17_spill] sm:$0xff] %v7688_v42  ;;  %v2454_v27 = vadd.f32 %v5551_v19, %v7659_v37  ;;  %v5619_v7 = vpop.f32.mrf.mxu1 }
 0x24d   : > { %v2443_v10 = vpop.f32.mrf.mxu0 }
 0x24e   : > { %v2444_v45 = vadd.f32 %v7659_v37, %v2443_v10  ;;  %v2860_v47 = vpop.f32.mrf.mxu1  ;;  %v7692_v59 = vadd.f32 %v5607_v28, %v2454_v27 }
 0x250   : > { %v5554_v57 = vpop.f32.mrf.mxu0  ;;  %v5622_v21 = vpop.f32.mrf.mxu1  ;;  %v7694_v50 = vadd.f32 %v2812_v18, %v2444_v45 }
 0x251   : > { %v2474_v31 = vadd.f32 %v5554_v57, %v7659_v37 }
 0x252   : > { %v2463_v12 = vpop.f32.mrf.mxu0  ;;  %v2872_v49 = vpop.f32.mrf.mxu1 }
 0x253   : > { %v2464_v15 = vadd.f32 %v7659_v37, %v2463_v12  ;;  %v7698_v25 = vadd.f32 %v5610_v2, %v2474_v31 }
 0x255   : > { %v7700_v44 = vadd.f32 %v2824_v51, %v2464_v15  ;;  %v5557_v53 = vpop.f32.mrf.mxu0 }
 0x256   : > { %v5625_v16 = vpop.f32.mrf.mxu1  ;;  %v2494_v5 = vadd.f32 %v5557_v53, %v7659_v37 }
 0x257   : > { %v2483_v54 = vpop.f32.mrf.mxu0 }
 0x258   : > { %v2884_v8 = vpop.f32.mrf.mxu1  ;;  %v2484_v62 = vadd.f32 %v7659_v37, %v2483_v54  ;;  %v7704_v35 = vadd.f32 %v5613_v38, %v2494_v5 }
 0x25a   : > { %v5628_v61 = vpop.f32.mrf.mxu1  ;;  %v7706_v46 = vadd.f32 %v2836_v33, %v2484_v62 }
 0x25b   : > { %v5560_v36 = vpop.f32.mrf.mxu0 }
 0x25c   : > { %v2514_v58 = vadd.f32 %v5560_v36, %v7659_v37  ;;  %v2896_v23 = vpop.f32.mrf.mxu1 }
 0x25d   : > { %v2503_v41 = vpop.f32.mrf.mxu0 }
 0x25e   : > { %v2504_v17 = vadd.f32 %v7659_v37, %v2503_v41  ;;  %v7710_v3 = vadd.f32 %v5616_v56, %v2514_v58 }
 0x25f   : > { %v5563_v14 = vpop.f32.mrf.mxu0  ;;  %v5631_v4 = vpop.f32.mrf.mxu1 }
 0x260   : > { %v2534_v32 = vadd.f32 %v5563_v14, %v7659_v37  ;;  %v7713_v11 = vadd.f32 %v2848_v6, %v2504_v17 }
 0x261   : > { %v2523_v55 = vpop.f32.mrf.mxu0  ;;  %v2908_v30 = vpop.f32.mrf.mxu1 }
 0x262   : > { %v2524_v0 = vadd.f32 %v7659_v37, %v2523_v55  ;;  %v7716_v26 = vadd.f32 %v5619_v7, %v2534_v32 }
 0x263   : > { %v5566_v28 = vpop.f32.mrf.mxu0 }
 0x264   : > { %v2554_v18 = vadd.f32 %v5566_v28, %v7659_v37  ;;  %v7719_v48 = vadd.f32 %v2860_v47, %v2524_v0  ;;  %v5634_v2 = vpop.f32.mrf.mxu1 }
 0x265   : > { %v2543_v22 = vpop.f32.mrf.mxu0 }
 0x266   : > { %v2544_v24 = vadd.f32 %v7659_v37, %v2543_v22  ;;  %v7722_v43 = vadd.f32 %v5622_v21, %v2554_v18  ;;  %v2920_v51 = vpop.f32.mrf.mxu1 }
 0x267   : > { %v5569_v38 = vpop.f32.mrf.mxu0 }
 0x268   : > { %v7724_v29 = vadd.f32 %v2872_v49, %v2544_v24  ;;  %v2574_v20 = vadd.f32 %v5569_v38, %v7659_v37  ;;  %v5637_v33 = vpop.f32.mrf.mxu1 }
 0x269   : > { %v2563_v9 = vpop.f32.mrf.mxu0 }
 0x26a   : > { %v2564_v40 = vadd.f32 %v7659_v37, %v2563_v9  ;;  %v2932_v56 = vpop.f32.mrf.mxu1  ;;  %v7728_v6 = vadd.f32 %v5625_v16, %v2574_v20 }
 0x26c   : > { %v5572_v19 = vpop.f32.mrf.mxu0  ;;  %v7731_v10 = vadd.f32 %v2884_v8, %v2564_v40 }
 0x26d   : > { %v2594_v27 = vadd.f32 %v5572_v19, %v7659_v37  ;;  %v5640_v7 = vpop.f32.mrf.mxu1 }
 0x26e   : > { %v2583_v45 = vpop.f32.mrf.mxu0 }
 0x26f   : > { %v2584_v47 = vadd.f32 %v7659_v37, %v2583_v45  ;;  %v2944_v57 = vpop.f32.mrf.mxu1  ;;  %v7734_v21 = vadd.f32 %v5628_v61, %v2594_v27 }
 0x270   : > { %v5575_v31 = vpop.f32.mrf.mxu0 }
 0x271   : > { %v2614_v12 = vadd.f32 %v5575_v31, %v7659_v37  ;;  %v7737_v49 = vpop.f32.mrf.mxu1  ;;  %v7739_v15 = vadd.f32 %v2896_v23, %v2584_v47 }
 0x272   : > { %v2603_v53 = vpop.f32.mrf.mxu0 }
 0x273   : > { %v2604_v16 = vadd.f32 %v7659_v37, %v2603_v53  ;;  %v7742_v5 = vpop.f32.mrf.mxu1  ;;  %v7744_v54 = vadd.f32 %v5631_v4, %v2614_v12 }
 0x274   : > { %v5578_v8 = vpop.f32.mrf.mxu0 }
 0x275   : > { %v2634_v62 = vadd.f32 %v5578_v8, %v7659_v37  ;;  %v7747_v36 = vpop.f32.mrf.mxu1  ;;  %v7749_v61 = vadd.f32 %v2908_v30, %v2604_v16 }
 0x276   : > { %v2623_v58 = vpop.f32.mrf.mxu0 }
 0x277   : > { %v2624_v41 = vadd.f32 %v7659_v37, %v2623_v58  ;;  %v7752_v17 = vpop.f32.mrf.mxu1  ;;  %v7754_v23 = vadd.f32 %v5634_v2, %v2634_v62 }
 0x278   : > { %v5581_v14 = vpop.f32.mrf.mxu0 }
 0x279   : > { %v2654_v32 = vadd.f32 %v5581_v14, %v7659_v37  ;;  %v7757_v55 = vpop.f32.mrf.mxu1  ;;  %v7759_v4 = vadd.f32 %v2920_v51, %v2624_v41 }
 0x27a   : > { %8693 = vst [vmem:[#allocation44_spill] sm:$0xff] %v7757_v55  ;;  %v2643_v0 = vpop.f32.mrf.mxu0 }
 0x27b   : > { %v2644_v28 = vadd.f32 %v7659_v37, %v2643_v0  ;;  %v7762_v18 = vpop.f32.mrf.mxu1  ;;  %v7764_v30 = vadd.f32 %v5637_v33, %v2654_v32 }
 0x27c   : > { %8694 = vst [vmem:[#allocation46_spill] sm:$0xff] %v7762_v18  ;;  %v5584_v22 = vpop.f32.mrf.mxu0 }
 0x27d   : > { %v2674_v24 = vadd.f32 %v5584_v22, %v7659_v37  ;;  %v7767_v38 = vpop.f32.mrf.mxu1  ;;  %v7769_v2 = vadd.f32 %v2932_v56, %v2644_v28 }
 0x27e   : > { %8695 = vst [vmem:[#allocation29_spill] sm:$0xff] %v7767_v38  ;;  %v2663_v20 = vpop.f32.mrf.mxu0 }
 0x27f   : > { %v2664_v9 = vadd.f32 %v7659_v37, %v2663_v20  ;;  %v7772_v40 = vpop.f32.mrf.mxu1  ;;  %v7774_v51 = vadd.f32 %v5640_v7, %v2674_v24 }
 0x280   : > { %8696 = vst [vmem:[#allocation31_spill] sm:$0xff] %v7772_v40  ;;  %v7776_v19 = vpop.f32.mrf.mxu0 }
 0x281   : > { %v7778_v27 = vadd.f32 %v2944_v57, %v2664_v9 }
 0x282   : > { %v7780_v33 = vpop.f32.mrf.mxu0  ;;  %v5719_v45 = vpop.f32.mrf.mxu1 }
 0x284   : > { %v7782_v47 = vpop.f32.mrf.mxu0  ;;  %v3388_v31 = vpop.f32.mrf.mxu1 }
 0x286   : > { %v7784_v12 = vpop.f32.mrf.mxu0  ;;  %v5722_v56 = vpop.f32.mrf.mxu1 }
 0x288   : > { %v7786_v53 = vpop.f32.mrf.mxu0  ;;  %v3404_v37 = vpop.f32.mrf.mxu1 }
 0x28a   : > { %v7788_v16 = vpop.f32.mrf.mxu0  ;;  %v5725_v7 = vpop.f32.mrf.mxu1 }
 0x28c   : > { %v7790_v8 = vpop.f32.mrf.mxu0  ;;  %v3420_v62 = vpop.f32.mrf.mxu1 }
 0x28d   : > { %8697 = vst [vmem:[#allocation18_spill] sm:$0xff] %v7790_v8 }
 0x28e   : > { %v7792_v57 = vpop.f32.mrf.mxu0  ;;  %v5728_v58 = vpop.f32.mrf.mxu1 }
 0x28f   : > { %8698 = vst [vmem:[#allocation48_spill] sm:$0xff] %v7792_v57 }
 0x290   : > { %v5663_v41 = vpop.f32.mrf.mxu0  ;;  %v3436_v14 = vpop.f32.mrf.mxu1 }
 0x291   : > { %v3094_v32 = vadd.f32 %v5663_v41, %v7692_v59 }
 0x292   : > { %v3086_v0 = vpop.f32.mrf.mxu0  ;;  %v5731_v28 = vpop.f32.mrf.mxu1 }
 0x293   : > { %v3087_v22 = vadd.f32 %v3086_v0, %v7694_v50  ;;  %v7796_v24 = vadd.f32 %v5719_v45, %v3094_v32 }
 0x294   : > { %v5666_v20 = vpop.f32.mrf.mxu0  ;;  %v3452_v9 = vpop.f32.mrf.mxu1 }
 0x295   : > { %v3108_v40 = vadd.f32 %v5666_v20, %v7698_v25  ;;  %v7799_v38 = vadd.f32 %v3388_v31, %v3087_v22 }
 0x296   : > { %v3100_v42 = vpop.f32.mrf.mxu0  ;;  %v5734_v18 = vpop.f32.mrf.mxu1 }
 0x297   : > { %v3101_v57 = vadd.f32 %v3100_v42, %v7700_v44  ;;  %v7802_v8 = vadd.f32 %v5722_v56, %v3108_v40 }
 0x298   : > { %v5669_v60 = vpop.f32.mrf.mxu0  ;;  %v3468_v59 = vpop.f32.mrf.mxu1 }
 0x299   : > { %v3122_v41 = vadd.f32 %v5669_v60, %v7704_v35  ;;  %v7805_v55 = vadd.f32 %v3404_v37, %v3101_v57 }
 0x29a   : > { %v3114_v50 = vpop.f32.mrf.mxu0  ;;  %v5737_v45 = vpop.f32.mrf.mxu1 }
 0x29b   : > { %v3115_v32 = vadd.f32 %v3114_v50, %v7706_v46  ;;  %v7808_v0 = vadd.f32 %v5725_v7, %v3122_v41 }
 0x29c   : > { %v5672_v25 = vpop.f32.mrf.mxu0  ;;  %v3484_v31 = vpop.f32.mrf.mxu1 }
 0x29d   : > { %v3136_v22 = vadd.f32 %v5672_v25, %v7710_v3  ;;  %v7811_v20 = vadd.f32 %v3420_v62, %v3115_v32 }
 0x29e   : > { %v3128_v42 = vpop.f32.mrf.mxu0  ;;  %v5740_v44 = vpop.f32.mrf.mxu1 }
 0x29f   : > { %v3129_v40 = vadd.f32 %v3128_v42, %v7713_v11  ;;  %v7814_v56 = vadd.f32 %v5728_v58, %v3136_v22 }
 0x2a0   : > { %v5675_v60 = vpop.f32.mrf.mxu0  ;;  %v3500_v35 = vpop.f32.mrf.mxu1 }
 0x2a1   : > { %v3150_v37 = vadd.f32 %v5675_v60, %v7716_v26  ;;  %v7817_v57 = vadd.f32 %v3436_v14, %v3129_v40 }
 0x2a2   : > { %v3142_v46 = vpop.f32.mrf.mxu0  ;;  %v5743_v7 = vpop.f32.mrf.mxu1 }
 0x2a3   : > { %v3143_v41 = vadd.f32 %v3142_v46, %v7719_v48  ;;  %v7820_v50 = vadd.f32 %v5731_v28, %v3150_v37 }
 0x2a4   : > { %v5678_v3 = vpop.f32.mrf.mxu0  ;;  %v3516_v62 = vpop.f32.mrf.mxu1 }
 0x2a5   : > { %v3164_v32 = vadd.f32 %v5678_v3, %v7722_v43  ;;  %v7823_v25 = vadd.f32 %v3452_v9, %v3143_v41 }
 0x2a6   : > { %v3156_v11 = vpop.f32.mrf.mxu0  ;;  %v5746_v58 = vpop.f32.mrf.mxu1 }
 0x2a7   : > { %v3157_v22 = vadd.f32 %v3156_v11, %v7724_v29  ;;  %v7826_v42 = vadd.f32 %v5734_v18, %v3164_v32 }
 0x2a8   : > { %v5681_v26 = vpop.f32.mrf.mxu0  ;;  %v3532_v14 = vpop.f32.mrf.mxu1 }
 0x2a9   : > { %v3178_v40 = vadd.f32 %v5681_v26, %v7728_v6  ;;  %v7829_v60 = vadd.f32 %v3468_v59, %v3157_v22 }
 0x2aa   : > { %v3170_v48 = vpop.f32.mrf.mxu0  ;;  %v5749_v28 = vpop.f32.mrf.mxu1 }
 0x2ab   : > { %v3171_v37 = vadd.f32 %v3170_v48, %v7731_v10  ;;  %v7832_v46 = vadd.f32 %v5737_v45, %v3178_v40 }
 0x2ac   : > { %v5684_v43 = vpop.f32.mrf.mxu0  ;;  %v3548_v9 = vpop.f32.mrf.mxu1 }
 0x2ad   : > { %v3192_v41 = vadd.f32 %v5684_v43, %v7734_v21  ;;  %v7835_v3 = vadd.f32 %v3484_v31, %v3171_v37 }
 0x2ae   : > { %v3184_v29 = vpop.f32.mrf.mxu0  ;;  %v5752_v18 = vpop.f32.mrf.mxu1 }
 0x2af   : > { %v3185_v32 = vadd.f32 %v3184_v29, %v7739_v15  ;;  %v7838_v11 = vadd.f32 %v5740_v44, %v3192_v41 }
 0x2b0   : > { %v5687_v6 = vpop.f32.mrf.mxu0  ;;  %v3564_v59 = vpop.f32.mrf.mxu1 }
 0x2b1   : > { %v3206_v22 = vadd.f32 %v5687_v6, %v7744_v54  ;;  %v7841_v26 = vadd.f32 %v3500_v35, %v3185_v32 }
 0x2b2   : > { %v3198_v10 = vpop.f32.mrf.mxu0  ;;  %v5819_v40 = vpop.f32.mrf.mxu1 }
 0x2b3   : > { %v3199_v45 = vadd.f32 %v3198_v10, %v7749_v61  ;;  %v7844_v48 = vadd.f32 %v5743_v7, %v3206_v22  ;;  %v3038_v7 = vadd.f32 %v7776_v19, %v7665_v39 }
 0x2b4   : > { %v5690_v21 = vpop.f32.mrf.mxu0  ;;  %v3916_v43 = vpop.f32.mrf.mxu1 }
 0x2b5   : > { %v3220_v31 = vadd.f32 %v5690_v21, %v7754_v23  ;;  %v7847_v37 = vadd.f32 %v3516_v62, %v3199_v45  ;;  %v3045_v45 = vadd.f32 %v7784_v12, %v7676_v63 }
 0x2b6   : > { %v3212_v15 = vpop.f32.mrf.mxu0  ;;  %v5822_v23 = vpop.f32.mrf.mxu1 }
 0x2b7   : > { %v3213_v44 = vadd.f32 %v3212_v15, %v7759_v4  ;;  %v7850_v41 = vadd.f32 %v5746_v58, %v3220_v31  ;;  %v3031_v4 = vadd.f32 %v7780_v33, %v7669_v34 }
 0x2b8   : > { %v5693_v54 = vpop.f32.mrf.mxu0  ;;  %v3928_v39 = vpop.f32.mrf.mxu1 }
 0x2b9   : > { %v3234_v35 = vadd.f32 %v5693_v54, %v7764_v30  ;;  %v7853_v29 = vadd.f32 %v3532_v14, %v3213_v44  ;;  %v3052_v14 = vadd.f32 %v7782_v47, %v7674_v13  ;;  %v8700_v44 = vld [vmem:[#allocation28_spill] sm:$0xff]  ;;  %v8701_v54 = vld [vmem:[#allocation18_spill] sm:$0xff] }
 0x2ba   : > { %v3226_v61 = vpop.f32.mrf.mxu0 }
 0x2bb   : > { %v3227_v32 = vadd.f32 %v3226_v61, %v7769_v2  ;;  %v7858_v62 = vadd.f32 %v5749_v28, %v3234_v35  ;;  %v3333_v2 = vadd.f32 %v7737_v49, %v3038_v7  ;;  %v3349_v49 = vadd.f32 %v7747_v36, %v3052_v14 }
 0x2bc   : > { %v5696_v6 = vpop.f32.mrf.mxu0  ;;  %v3080_v35 = vadd.f32 %v8701_v54, %v8700_v44 }
 0x2bd   : > { %v3248_v58 = vadd.f32 %v5696_v6, %v7774_v51  ;;  %v7863_v22 = vadd.f32 %v3548_v9, %v3227_v32  ;;  %v3325_v51 = vadd.f32 %v7742_v5, %v3031_v4  ;;  %v3066_v9 = vadd.f32 %v7786_v53, %v7680_v1  ;;  %v8702_v6 = vld [vmem:[#allocation46_spill] sm:$0xff] }
 0x2be   : > { %v3240_v30 = vpop.f32.mrf.mxu0 }
 0x2bf   : > { %v3241_v10 = vadd.f32 %v3240_v30, %v7778_v27  ;;  %v7869_v19 = vadd.f32 %v5752_v18, %v3248_v58  ;;  %v5825_v27 = vpop.f32.mrf.mxu1  ;;  %v3059_v18 = vadd.f32 %v7788_v16, %v7682_v52  ;;  %v8704_v58 = vld [vmem:[#allocation48_spill] sm:$0xff] }
 0x2c0   : > { %v5763_v28 = vpop.f32.mrf.mxu0 }
 0x2c1   : > { %v3662_v34 = vadd.f32 %v5763_v28, %v3333_v2  ;;  %v7874_v33 = vadd.f32 %v3564_v59, %v3241_v10  ;;  %v3341_v59 = vadd.f32 %v7752_v17, %v3045_v45  ;;  %v3940_v52 = vpop.f32.mrf.mxu1  ;;  %v3357_v4 = vadd.f32 %v8702_v6, %v3059_v18  ;;  %v8703_v17 = vld [vmem:[#allocation17_spill] sm:$0xff] }
 0x2c2   : > { %v3655_v13 = vpop.f32.mrf.mxu0  ;;  %v3073_v30 = vadd.f32 %v8704_v58, %v8703_v17 }
 0x2c3   : > { %v7878_v47 = vadd.f32 %v5819_v40, %v3662_v34  ;;  %v3656_v21 = vadd.f32 %v3655_v13, %v3325_v51  ;;  %v8699_v40 = vld [vmem:[#allocation44_spill] sm:$0xff]  ;;  %v5828_v51 = vpop.f32.mrf.mxu1 }
 0x2c4   : > { %v5766_v31 = vpop.f32.mrf.mxu0  ;;  %v3365_v15 = vadd.f32 %v8699_v40, %v3066_v9 }
 0x2c5   : > { %v4113_v63 = vsel %vm268_vm1, %v7878_v47, -inf  ;;  %v7885_v5 = vadd.f32 %v3916_v43, %v3656_v21  ;;  %v3674_v12 = vadd.f32 %v5766_v31, %v3349_v49  ;;  %v8705_v49 = vld [vmem:[#allocation29_spill] sm:$0xff] }
 0x2c6   : > { %v4114_v1 = vrot.slane %v4113_v63, 4  ;;  %v3667_v53 = vpop.f32.mrf.mxu0  ;;  %v3381_v18 = vadd.f32 %v8705_v49, %v3080_v35 }
 0x2c7   : > { %v4106_v36 = vsel %vm268_vm1, %v7885_v5, -inf  ;;  %v7893_v16 = vadd.f32 %v5822_v23, %v3674_v12  ;;  %v3668_v61 = vadd.f32 %v3667_v53, %v3341_v59 }
 0x2c8   : > { %v4115_v7 = vmax.f32 %v4113_v63, %v4114_v1  ;;  %v4107_v43 = vrot.slane %v4106_v36, 4  ;;  %v5769_v32 = vpop.f32.mrf.mxu0 }
 0x2c9   : > { %v4127_v14 = vsel %vm268_vm1, %v7893_v16, -inf  ;;  %v7900_v10 = vadd.f32 %v3928_v39, %v3668_v61  ;;  %v3686_v2 = vadd.f32 %v5769_v32, %v3365_v15  ;;  %v8706_v15 = vld [vmem:[#allocation31_spill] sm:$0xff]  ;;  %v3952_v32 = vpop.f32.mrf.mxu1 }
 0x2ca   : > { %v4116_v28 = vrot.slane %v4115_v7, 2  ;;  %v4108_v45 = vmax.f32 %v4106_v36, %v4107_v43  ;;  %v4128_v34 = vrot.slane %v4127_v14, 4  ;;  %v3679_v23 = vpop.f32.mrf.mxu0  ;;  %v3373_v44 = vadd.f32 %v8706_v15, %v3073_v30 }
 0x2cb   : > { %v4120_v9 = vsel %vm268_vm1, %v7900_v10, -inf  ;;  %v7904_v13 = vadd.f32 %v5825_v27, %v3686_v2  ;;  %v3680_v21 = vadd.f32 %v3679_v23, %v3357_v4 }
 0x2cc   : > { %v4117_v31 = vmax.f32 %v4115_v7, %v4116_v28  ;;  %v4109_v63 = vrot.slane %v4108_v45, 2  ;;  %v4129_v12 = vmax.f32 %v4127_v14, %v4128_v34  ;;  %v4121_v59 = vrot.slane %v4120_v9, 4  ;;  %v5772_v39 = vpop.f32.mrf.mxu0 }
 0x2cd   : > { %v4141_v1 = vsel %vm268_vm1, %v7904_v13, -inf  ;;  %v7909_v53 = vadd.f32 %v3940_v52, %v3680_v21  ;;  %v3698_v40 = vadd.f32 %v5772_v39, %v3381_v18  ;;  %v5831_v18 = vpop.f32.mrf.mxu1 }
 0x2ce   : > { %v4118_v54 = vrot.slane %v4117_v31, 1  ;;  %v4110_v36 = vmax.f32 %v4108_v45, %v4109_v63  ;;  %v4130_v27 = vrot.slane %v4129_v12, 2  ;;  %v4122_v61 = vmax.f32 %v4120_v9, %v4121_v59  ;;  %v3691_v43 = vpop.f32.mrf.mxu0 }
 0x2cf   : > { %v4142_v35 = vrot.slane %v4141_v1, 4  ;;  %v4134_v7 = vsel %vm268_vm1, %v7909_v53, -inf  ;;  %v7914_v6 = vadd.f32 %v5828_v51, %v3698_v40  ;;  %v3692_v4 = vadd.f32 %v3691_v43, %v3373_v44 }
 0x2d0   : > { %v4119_v17 = vmax.f32 %v4117_v31, %v4118_v54  ;;  %v4111_v58 = vrot.slane %v4110_v36, 1  ;;  %v4131_v52 = vmax.f32 %v4129_v12, %v4130_v27  ;;  %v4123_v14 = vrot.slane %v4122_v61, 2  ;;  %v5775_v2 = vpop.f32.mrf.mxu0 }
 0x2d1   : > { %v4143_v28 = vmax.f32 %v4141_v1, %v4142_v35  ;;  %v4135_v30 = vrot.slane %v4134_v7, 4  ;;  %v4155_v45 = vsel %vm268_vm1, %v7914_v6, -inf  ;;  %v7918_v34 = vadd.f32 %v3952_v32, %v3692_v4 }
 0x2d2   : > { %v4331_v23 = vsub.f32 %v7878_v47, %v4119_v17  ;;  %v4112_v9 = vmax.f32 %v4110_v36, %v4111_v58  ;;  %v4132_v21 = vrot.slane %v4131_v52, 1  ;;  %v4124_v49 = vmax.f32 %v4122_v61, %v4123_v14  ;;  %v3703_v59 = vpop.f32.mrf.mxu0 }
 0x2d3   : > { %v4144_v51 = vrot.slane %v4143_v28, 2  ;;  %v4136_v63 = vmax.f32 %v4134_v7, %v4135_v30  ;;  %v4156_v31 = vrot.slane %v4155_v45, 4  ;;  %v4148_v12 = vsel %vm268_vm1, %v7918_v34, -inf  ;;  %v3964_v7 = vpop.f32.mrf.mxu1 }
 0x2d4   : > { %v4364_v39 = vmul.f32 1.442695, %v4331_v23  ;;  %v4330_v1 = vsub.f32 %v7885_v5, %v4112_v9  ;;  %v4133_v40 = vmax.f32 %v4131_v52, %v4132_v21  ;;  %v4125_v15 = vrot.slane %v4124_v49, 1  ;;  %v5778_v58 = vpop.f32.mrf.mxu0 }
 0x2d5   : > { %v4145_v44 = vmax.f32 %v4143_v28, %v4144_v51  ;;  %v4137_v54 = vrot.slane %v4136_v63, 2  ;;  %v4157_v27 = vmax.f32 %v4155_v45, %v4156_v31  ;;  %v4149_v47 = vrot.slane %v4148_v12, 4  ;;  %v5834_v31 = vpop.f32.mrf.mxu1 }
 0x2d6   : > { %5873 = vpow2.f32 %v4364_v39  ;;  %v4362_v36 = vmul.f32 1.442695, %v4330_v1  ;;  %v4333_v61 = vsub.f32 %v7893_v16, %v4133_v40  ;;  %v4126_v43 = vmax.f32 %v4124_v49, %v4125_v15  ;;  %v3715_v39 = vpop.f32.mrf.mxu0 }
 0x2d7   : > { %v4146_v32 = vrot.slane %v4145_v44, 1  ;;  %v4138_v35 = vmax.f32 %v4136_v63, %v4137_v54  ;;  %v4158_v4 = vrot.slane %v4157_v27, 2  ;;  %v4150_v17 = vmax.f32 %v4148_v12, %v4149_v47 }
 0x2d8   : > { %5875 = vpow2.f32 %v4362_v36  ;;  %v4368_v14 = vmul.f32 1.442695, %v4333_v61  ;;  %v4332_v5 = vsub.f32 %v7900_v10, %v4126_v43  ;;  %v3710_v52 = vadd.f32 %v5775_v2, %v7796_v24  ;;  %v3976_v36 = vpop.f32.mrf.mxu1 }
 0x2d9   : > { %v4147_v28 = vmax.f32 %v4145_v44, %v4146_v32  ;;  %v4139_v30 = vrot.slane %v4138_v35, 1  ;;  %v4159_v45 = vmax.f32 %v4157_v27, %v4158_v4  ;;  %v4151_v23 = vrot.slane %v4150_v17, 2 }
 0x2da   : > { %5877 = vpow2.f32 %v4368_v14  ;;  %v4366_v9 = vmul.f32 1.442695, %v4332_v5  ;;  %v7927_v16 = vadd.f32 %v5831_v18, %v3710_v52  ;;  %v3704_v21 = vadd.f32 %v3703_v59, %v7799_v38  ;;  %v5837_v52 = vpop.f32.mrf.mxu1 }
 0x2db   : > { %v4335_v49 = vsub.f32 %v7904_v13, %v4147_v28  ;;  %v4140_v51 = vmax.f32 %v4138_v35, %v4139_v30  ;;  %v4160_v63 = vrot.slane %v4159_v45, 1  ;;  %v4152_v12 = vmax.f32 %v4150_v17, %v4151_v23 }
 0x2dc   : > { %5879 = vpow2.f32 %v4366_v9  ;;  %v4169_v24 = vsel %vm268_vm1, %v7927_v16, -inf  ;;  %v7933_v10 = vadd.f32 %v3964_v7, %v3704_v21  ;;  %v3722_v2 = vadd.f32 %v5778_v58, %v7802_v8  ;;  %v5781_v8 = vpop.f32.mrf.mxu0 }
 0x2dd   : > { %v4372_v1 = vmul.f32 1.442695, %v4335_v49  ;;  %v4334_v18 = vsub.f32 %v7909_v53, %v4140_v51  ;;  %v4161_v40 = vmax.f32 %v4159_v45, %v4160_v63  ;;  %v4153_v38 = vrot.slane %v4152_v12, 1 }
 0x2de   : > { %v4170_v59 = vrot.slane %v4169_v24, 4  ;;  %v4162_v13 = vsel %vm268_vm1, %v7933_v10, -inf  ;;  %v7939_v15 = vadd.f32 %v5834_v31, %v3722_v2  ;;  %v3716_v44 = vadd.f32 %v3715_v39, %v7805_v55 }
 0x2df   : > { %5881 = vpow2.f32 %v4372_v1  ;;  %v4370_v54 = vmul.f32 1.442695, %v4334_v18  ;;  %v4337_v27 = vsub.f32 %v7914_v6, %v4161_v40  ;;  %v4154_v47 = vmax.f32 %v4152_v12, %v4153_v38 }
 0x2e0   : > { %v4171_v61 = vmax.f32 %v4169_v24, %v4170_v59  ;;  %v4163_v43 = vrot.slane %v4162_v13, 4  ;;  %v4183_v53 = vsel %vm268_vm1, %v7939_v15, -inf  ;;  %v7945_v32 = vadd.f32 %v3976_v36, %v3716_v44 }
 0x2e1   : > { %5883 = vpow2.f32 %v4370_v54  ;;  %v4376_v35 = vmul.f32 1.442695, %v4337_v27  ;;  %v4336_v7 = vsub.f32 %v7918_v34, %v4154_v47  ;;  %v4184_v4 = vrot.slane %v4183_v53, 4 }
 0x2e2   : > { %v4172_v55 = vrot.slane %v4171_v61, 2  ;;  %v4164_v17 = vmax.f32 %v4162_v13, %v4163_v43  ;;  %v4176_v6 = vsel %vm268_vm1, %v7945_v32, -inf  ;;  %v3734_v58 = vadd.f32 %v5781_v8, %v7808_v0 }
 0x2e3   : > { %v7951_v14 = vpop.eup %5873  ;;  %5885 = vpow2.f32 %v4376_v35  ;;  %v4374_v5 = vmul.f32 1.442695, %v4336_v7  ;;  %v4185_v28 = vmax.f32 %v4183_v53, %v4184_v4  ;;  %v4177_v30 = vrot.slane %v4176_v6, 4 }
 0x2e4   : > { %v4433_v45 = vsel %vm268_vm1, %v7951_v14, 0.0  ;;  %v4173_v23 = vmax.f32 %v4171_v61, %v4172_v55  ;;  %v4165_v34 = vrot.slane %v4164_v17, 2  ;;  %v7955_v9 = vadd.f32 %v5837_v52, %v3734_v58 }
 0x2e5   : > { %v7957_v21 = vpop.eup %5875  ;;  %v4434_v49 = vrot.slane %v4433_v45, 4  ;;  %5887 = vpow2.f32 %v4374_v5  ;;  %v4186_v51 = vrot.slane %v4185_v28, 2  ;;  %v4178_v0 = vmax.f32 %v4176_v6, %v4177_v30 }
 0x2e6   : > { %v4426_v63 = vsel %vm268_vm1, %v7957_v21, 0.0  ;;  %v4174_v31 = vrot.slane %v4173_v23, 1  ;;  %v4166_v12 = vmax.f32 %v4164_v17, %v4165_v34  ;;  %v7963_v39 = vsel %vm268_vm1, %v7955_v9, -inf }
 0x2e7   : > { %v7965_v24 = vpop.eup %5877  ;;  %v4435_v2 = vadd.f32 %v4434_v49, %v4433_v45  ;;  %v4427_v1 = vrot.slane %v4426_v63, 4  ;;  %v4187_v18 = vmax.f32 %v4185_v28, %v4186_v51  ;;  %v4179_v40 = vrot.slane %v4178_v0, 2 }
 0x2e8   : > { %v4447_v38 = vsel %vm268_vm1, %v7965_v24, 0.0  ;;  %v4175_v59 = vmax.f32 %v4173_v23, %v4174_v31  ;;  %v4167_v13 = vrot.slane %v4166_v12, 1  ;;  %v4198_v44 = vrot.slane %v7963_v39, 4 }
 0x2e9   : > { %v7970_v54 = vpop.eup %5879  ;;  %v4436_v27 = vrot.slane %v4435_v2, 2  ;;  %v4428_v47 = vadd.f32 %v4427_v1, %v4426_v63  ;;  %v4448_v36 = vrot.slane %v4447_v38, 4  ;;  %v4188_v8 = vrot.slane %v4187_v18, 1 }
 0x2ea   : > { %v4440_v61 = vsel %vm268_vm1, %v7970_v54, 0.0  ;;  %v4339_v43 = vsub.f32 %v7927_v16, %v4175_v59  ;;  %v4168_v53 = vmax.f32 %v4166_v12, %v4167_v13  ;;  %v4180_v35 = vmax.f32 %v4178_v0, %v4179_v40 }
 0x2eb   : > { %v4437_v7 = vadd.f32 %v4436_v27, %v4435_v2  ;;  %v4429_v4 = vrot.slane %v4428_v47, 2  ;;  %v4449_v55 = vadd.f32 %v4448_v36, %v4447_v38  ;;  %v4441_v17 = vrot.slane %v4440_v61, 4 }
 0x2ec   : > { %v7975_v6 = vpop.eup %5881  ;;  %v4380_v58 = vmul.f32 1.442695, %v4339_v43  ;;  %v4338_v5 = vsub.f32 %v7933_v10, %v4168_v53  ;;  %v4189_v52 = vmax.f32 %v4187_v18, %v4188_v8  ;;  %v4181_v28 = vrot.slane %v4180_v35, 1  ;;  %v3727_v8 = vpop.f32.mrf.mxu0 }
 0x2ed   : > { %v4438_v30 = vrot.slane %v4437_v7, 1  ;;  %v4430_v45 = vadd.f32 %v4429_v4, %v4428_v47  ;;  %v4450_v23 = vrot.slane %v4449_v55, 2  ;;  %v4442_v34 = vadd.f32 %v4441_v17, %v4440_v61 }
 0x2ee   : > { %v7978_v49 = vpop.eup %5883  ;;  %v4461_v16 = vsel %vm268_vm1, %v7975_v6, 0.0  ;;  %5889 = vpow2.f32 %v4380_v58  ;;  %v4378_v51 = vmul.f32 1.442695, %v4338_v5  ;;  %v4341_v0 = vsub.f32 %v7939_v15, %v4189_v52 }
 0x2ef   : > { %v4439_v63 = vadd.f32 %v4438_v30, %v4437_v7  ;;  %v4431_v31 = vrot.slane %v4430_v45, 1  ;;  %v4451_v12 = vadd.f32 %v4450_v23, %v4449_v55  ;;  %v4443_v2 = vrot.slane %v4442_v34, 2  ;;  %v3988_v23 = vpop.f32.mrf.mxu1 }
 0x2f0   : > { %v7983_v10 = vpop.eup %5885  ;;  %v4462_v1 = vrot.slane %v4461_v16, 4  ;;  %v4454_v18 = vsel %vm268_vm1, %v7978_v49, 0.0  ;;  %5891 = vpow2.f32 %v4378_v51  ;;  %v4384_v40 = vmul.f32 1.442695, %v4341_v0  ;;  %v5784_v51 = vpop.f32.mrf.mxu0 }
 0x2f1   : > { %5893 = vrcp.f32 %v4439_v63  ;;  %v4432_v38 = vadd.f32 %v4431_v31, %v4430_v45  ;;  %v4452_v59 = vrot.slane %v4451_v12, 1  ;;  %v4444_v13 = vadd.f32 %v4443_v2, %v4442_v34 }
 0x2f2   : > { %v7987_v27 = vpop.eup %5887  ;;  %v4463_v47 = vadd.f32 %v4462_v1, %v4461_v16  ;;  %v4455_v15 = vrot.slane %v4454_v18, 4  ;;  %v4475_v36 = vsel %vm268_vm1, %v7983_v10, 0.0  ;;  %5895 = vpow2.f32 %v4384_v40 }
 0x2f3   : > { %5897 = vrcp.f32 %v4432_v38  ;;  %v4453_v61 = vadd.f32 %v4452_v59, %v4451_v12  ;;  %v4445_v43 = vrot.slane %v4444_v13, 1  ;;  %v4476_v53 = vrot.slane %v4475_v36, 4 }
 0x2f4   : > { %v4464_v7 = vrot.slane %v4463_v47, 2  ;;  %v4456_v4 = vadd.f32 %v4455_v15, %v4454_v18  ;;  %v4468_v55 = vsel %vm268_vm1, %v7987_v27, 0.0  ;;  %v4182_v17 = vmax.f32 %v4180_v35, %v4181_v28 }
 0x2f5   : > { %5899 = vrcp.f32 %v4453_v61  ;;  %v4446_v58 = vadd.f32 %v4445_v43, %v4444_v13  ;;  %v4477_v5 = vadd.f32 %v4476_v53, %v4475_v36  ;;  %v4469_v52 = vrot.slane %v4468_v55, 4  ;;  %v5840_v13 = vpop.f32.mrf.mxu1  ;;  %v3739_v43 = vpop.f32.mrf.mxu0 }
 0x2f6   : > { %v4465_v30 = vadd.f32 %v4464_v7, %v4463_v47  ;;  %v4457_v45 = vrot.slane %v4456_v4, 2  ;;  %v4340_v34 = vsub.f32 %v7945_v32, %v4182_v17  ;;  %v4199_v16 = vmax.f32 %v7963_v39, %v4198_v44 }
 0x2f7   : > { %5901 = vrcp.f32 %v4446_v58  ;;  %v4478_v0 = vrot.slane %v4477_v5, 2  ;;  %v4470_v63 = vadd.f32 %v4469_v52, %v4468_v55  ;;  %v3728_v31 = vadd.f32 %v3727_v8, %v7811_v20 }
 0x2f8   : > { %v4466_v35 = vrot.slane %v4465_v30, 1  ;;  %v4458_v28 = vadd.f32 %v4457_v45, %v4456_v4  ;;  %v4382_v12 = vmul.f32 1.442695, %v4340_v34  ;;  %v4200_v2 = vrot.slane %v4199_v16, 2 }
 0x2f9   : > { %v4479_v1 = vadd.f32 %v4478_v0, %v4477_v5  ;;  %v4471_v18 = vrot.slane %v4470_v63, 2  ;;  %v7998_v40 = vadd.f32 %v3988_v23, %v3728_v31  ;;  %v3746_v32 = vadd.f32 %v5784_v51, %v7814_v56 }
 0x2fa   : > { %v4467_v38 = vadd.f32 %v4466_v35, %v4465_v30  ;;  %v4459_v59 = vrot.slane %v4458_v28, 1  ;;  %5903 = vpow2.f32 %v4382_v12  ;;  %v4201_v39 = vmax.f32 %v4199_v16, %v4200_v2 }
 0x2fb   : > { %v8001_v44 = vpop.eup %5889  ;;  %v4480_v47 = vrot.slane %v4479_v1, 1  ;;  %v4472_v20 = vadd.f32 %v4471_v18, %v4470_v63  ;;  %v4190_v15 = vsel %vm268_vm1, %v7998_v40, -inf  ;;  %v8005_v36 = vadd.f32 %v5840_v13, %v3746_v32 }
 0x2fc   : > { %5905 = vrcp.f32 %v4467_v38  ;;  %v4460_v8 = vadd.f32 %v4459_v59, %v4458_v28  ;;  %v4489_v56 = vsel %vm268_vm1, %v8001_v44, 0.0  ;;  %v4202_v61 = vrot.slane %v4201_v39, 1  ;;  %v5787_v28 = vpop.f32.mrf.mxu0 }
 0x2fd   : > { %v8009_v53 = vpop.eup %5891  ;;  %v4481_v7 = vadd.f32 %v4480_v47, %v4479_v1  ;;  %v4473_v4 = vrot.slane %v4472_v20, 1  ;;  %v4490_v55 = vrot.slane %v4489_v56, 4  ;;  %v4191_v17 = vrot.slane %v4190_v15, 4  ;;  %v4000_v1 = vpop.f32.mrf.mxu1 }
 0x2fe   : > { %v5894_v58 = vpop.eup %5893  ;;  %5907 = vrcp.f32 %v4460_v8  ;;  %v4482_v5 = vsel %vm268_vm1, %v8009_v53, 0.0  ;;  %v4203_v52 = vmax.f32 %v4201_v39, %v4202_v61  ;;  %v4211_v30 = vsel %vm268_vm1, %v8005_v36, -inf  ;;  %v3751_v61 = vpop.f32.mrf.mxu0 }
 0x2ff   : > { %v8022_v45 = vpop.eup %5895  ;;  %v4683_v23 = vmul.f32 %v5894_v58, %v7951_v14  ;;  %5909 = vrcp.f32 %v4481_v7  ;;  %v4474_v34 = vadd.f32 %v4473_v4, %v4472_v20  ;;  %v4491_v16 = vadd.f32 %v4490_v55, %v4489_v56 }
 0x300   : > { %v5898_v51 = vpop.eup %5897  ;;  %v4483_v0 = vrot.slane %v4482_v5, 4  ;;  %v4503_v63 = vsel %vm268_vm1, %v8022_v45, 0.0  ;;  %v4343_v31 = vsub.f32 %v7955_v9, %v4203_v52  ;;  %v4192_v35 = vmax.f32 %v4190_v15, %v4191_v17  ;;  %v5843_v17 = vpop.f32.mrf.mxu1 }
 0x301   : > { %4715 = vst.msk [vmem:[%s8016_s16 + $0x8] sm:$0xff] %vm268_vm1, %v4683_v23  ;;  %v4682_v12 = vmul.f32 %v5898_v51, %v7957_v21  ;;  %5911 = vrcp.f32 %v4474_v34  ;;  %v4492_v2 = vrot.slane %v4491_v16, 2  ;;  %v4504_v14 = vrot.slane %v4503_v63, 4 }
 0x302   : > { %v5900_v18 = vpop.eup %5899  ;;  %v4484_v32 = vadd.f32 %v4483_v0, %v4482_v5  ;;  %v4388_v38 = vmul.f32 1.442695, %v4343_v31  ;;  %v4193_v59 = vrot.slane %v4192_v35, 2  ;;  %v4212_v13 = vrot.slane %v4211_v30, 4 }
 0x303   : > { %4714 = vst.msk [vmem:[%s8016_s16] sm:$0xff] %vm268_vm1, %v4682_v12  ;;  %v4685_v9 = vmul.f32 %v5900_v18, %v7965_v24  ;;  %v4493_v39 = vadd.f32 %v4492_v2, %v4491_v16  ;;  %v4505_v47 = vadd.f32 %v4504_v14, %v4503_v63  ;;  %v3740_v20 = vadd.f32 %v3739_v43, %v7817_v57  ;;  %v5790_v2 = vpop.f32.mrf.mxu0 }
 0x304   : > { %v5902_v15 = vpop.eup %5901  ;;  %v4485_v21 = vrot.slane %v4484_v32, 2  ;;  %5913 = vpow2.f32 %v4388_v38  ;;  %v4194_v8 = vmax.f32 %v4192_v35, %v4193_v59  ;;  %v4213_v56 = vmax.f32 %v4211_v30, %v4212_v13 }
 0x305   : > { %4717 = vst.msk [vmem:[%s8016_s16 + $0x18] sm:$0xff] %vm268_vm1, %v4685_v9  ;;  %v4684_v7 = vmul.f32 %v5902_v15, %v7970_v54  ;;  %v4494_v4 = vrot.slane %v4493_v39, 1  ;;  %v4506_v55 = vrot.slane %v4505_v47, 2  ;;  %v8038_v58 = vadd.f32 %v4000_v1, %v3740_v20 }
 0x306   : > { %v4486_v24 = vadd.f32 %v4485_v21, %v4484_v32  ;;  %v4195_v5 = vrot.slane %v4194_v8, 1  ;;  %v4214_v52 = vrot.slane %v4213_v56, 2  ;;  %v3758_v57 = vadd.f32 %v5787_v28, %v7820_v50  ;;  %v4012_v28 = vpop.f32.mrf.mxu1 }
 0x307   : > { %v8041_v43 = vpop.eup %5903  ;;  %4716 = vst.msk [vmem:[%s8016_s16 + $0x10] sm:$0xff] %vm268_vm1, %v4684_v7  ;;  %v4495_v30 = vadd.f32 %v4494_v4, %v4493_v39  ;;  %v4507_v23 = vadd.f32 %v4506_v55, %v4505_v47  ;;  %v4204_v34 = vsel %vm268_vm1, %v8038_v58, -inf  ;;  %v3752_v54 = vadd.f32 %v3751_v61, %v7823_v25 }
 0x308   : > { %v4487_v16 = vrot.slane %v4486_v24, 1  ;;  %v4496_v51 = vsel %vm268_vm1, %v8041_v43, 0.0  ;;  %v4196_v0 = vmax.f32 %v4194_v8, %v4195_v5  ;;  %v4215_v63 = vmax.f32 %v4213_v56, %v4214_v52  ;;  %v5846_v21 = vpop.f32.mrf.mxu1  ;;  %v3763_v56 = vpop.f32.mrf.mxu0 }
 0x309   : > { %v5906_v31 = vpop.eup %5905  ;;  %5915 = vrcp.f32 %v4495_v30  ;;  %v4508_v50 = vrot.slane %v4507_v23, 1  ;;  %v4497_v35 = vrot.slane %v4496_v51, 4  ;;  %v4205_v12 = vrot.slane %v4204_v34, 4 }
 0x30a   : > { %v4687_v14 = vmul.f32 %v5906_v31, %v7975_v6  ;;  %v4488_v1 = vadd.f32 %v4487_v16, %v4486_v24  ;;  %v4342_v18 = vsub.f32 %v7998_v40, %v4196_v0  ;;  %v4216_v25 = vrot.slane %v4215_v63, 1 }
 0x30b   : > { %v5908_v32 = vpop.eup %5907  ;;  %v4509_v38 = vadd.f32 %v4508_v50, %v4507_v23  ;;  %v4498_v59 = vadd.f32 %v4497_v35, %v4496_v51  ;;  %v4206_v13 = vmax.f32 %v4204_v34, %v4205_v12  ;;  %v8052_v9 = vadd.f32 %v5843_v17, %v3758_v57  ;;  %v5793_v51 = vpop.f32.mrf.mxu0 }
 0x30c   : > { %v5910_v39 = vpop.eup %5909  ;;  %4719 = vst.msk [vmem:[%s8016_s16 + $0x28] sm:$0xff] %vm268_vm1, %v4687_v14  ;;  %v4686_v47 = vmul.f32 %v5908_v32, %v7978_v49  ;;  %5917 = vrcp.f32 %v4488_v1  ;;  %v4386_v20 = vmul.f32 1.442695, %v4342_v18  ;;  %v4217_v6 = vmax.f32 %v4215_v63, %v4216_v25 }
 0x30d   : > { %v4689_v15 = vmul.f32 %v5910_v39, %v7983_v10  ;;  %5919 = vrcp.f32 %v4509_v38  ;;  %v4499_v40 = vrot.slane %v4498_v59, 2  ;;  %v4207_v8 = vrot.slane %v4206_v13, 2 }
 0x30e   : > { %v5912_v61 = vpop.eup %5911  ;;  %4718 = vst.msk [vmem:[%s8016_s16 + $0x20] sm:$0xff] %vm268_vm1, %v4686_v47  ;;  %5921 = vpow2.f32 %v4386_v20  ;;  %v4345_v7 = vsub.f32 %v8005_v36, %v4217_v6  ;;  %v4225_v49 = vsel %vm268_vm1, %v8052_v9, -inf  ;;  %v8063_v4 = vadd.f32 %v4012_v28, %v3752_v54  ;;  %v4024_v54 = vpop.f32.mrf.mxu1 }
 0x30f   : > { %4721 = vst.msk [vmem:[%s8016_s16 + $0x38] sm:$0xff] %vm268_vm1, %v4689_v15  ;;  %v4688_v10 = vmul.f32 %v5912_v61, %v7987_v27  ;;  %v4500_v55 = vadd.f32 %v4499_v40, %v4498_v59  ;;  %v4208_v17 = vmax.f32 %v4206_v13, %v4207_v8  ;;  %v4226_v24 = vrot.slane %v4225_v49, 4 }
 0x310   : > { %v4392_v5 = vmul.f32 1.442695, %v4345_v7  ;;  %v4218_v52 = vsel %vm268_vm1, %v8063_v4, -inf  ;;  %v3770_v57 = vadd.f32 %v5790_v2, %v7826_v42  ;;  %v3764_v36 = vadd.f32 %v3763_v56, %v7829_v60  ;;  %v5849_v32 = vpop.f32.mrf.mxu1  ;;  %v3775_v56 = vpop.f32.mrf.mxu0 }
 0x311   : > { %v8072_v30 = vpop.eup %5913  ;;  %4720 = vst.msk [vmem:[%s8016_s16 + $0x30] sm:$0xff] %vm268_vm1, %v4688_v10  ;;  %v4501_v23 = vrot.slane %v4500_v55, 1  ;;  %v4209_v34 = vrot.slane %v4208_v17, 1  ;;  %v4227_v16 = vmax.f32 %v4225_v49, %v4226_v24  ;;  %v4219_v27 = vrot.slane %v4218_v52, 4 }
 0x312   : > { %v4517_v0 = vsel %vm268_vm1, %v8072_v30, 0.0  ;;  %5923 = vpow2.f32 %v4392_v5  ;;  %v8078_v63 = vadd.f32 %v5846_v21, %v3770_v57  ;;  %v8080_v31 = vadd.f32 %v4024_v54, %v3764_v36 }
 0x313   : > { %v4502_v42 = vadd.f32 %v4501_v23, %v4500_v55  ;;  %v4518_v60 = vrot.slane %v4517_v0, 4  ;;  %v4210_v50 = vmax.f32 %v4208_v17, %v4209_v34  ;;  %v4228_v35 = vrot.slane %v4227_v16, 2 }
 0x314   : > { %v4220_v28 = vmax.f32 %v4218_v52, %v4219_v27  ;;  %v4239_v12 = vsel %vm268_vm1, %v8078_v63, -inf  ;;  %v4232_v2 = vsel %vm268_vm1, %v8080_v31, -inf  ;;  %v3782_v14 = vadd.f32 %v5793_v51, %v7832_v46  ;;  %v4036_v27 = vpop.f32.mrf.mxu1 }
 0x315   : > { %5925 = vrcp.f32 %v4502_v42  ;;  %v4519_v1 = vadd.f32 %v4518_v60, %v4517_v0  ;;  %v4344_v18 = vsub.f32 %v8038_v58, %v4210_v50  ;;  %v4229_v25 = vmax.f32 %v4227_v16, %v4228_v35  ;;  %v5796_v0 = vpop.f32.mrf.mxu0 }
 0x316   : > { %v5916_v38 = vpop.eup %5915  ;;  %v4221_v59 = vrot.slane %v4220_v28, 2  ;;  %v4240_v13 = vrot.slane %v4239_v12, 4  ;;  %v4233_v39 = vrot.slane %v4232_v2, 4  ;;  %v8088_v47 = vadd.f32 %v5849_v32, %v3782_v14 }
 0x317   : > { %v4691_v20 = vmul.f32 %v5916_v38, %v8001_v44  ;;  %v4520_v6 = vrot.slane %v4519_v1, 2  ;;  %v4390_v15 = vmul.f32 1.442695, %v4344_v18  ;;  %v4230_v40 = vrot.slane %v4229_v25, 1 }
 0x318   : > { %v4222_v21 = vmax.f32 %v4220_v28, %v4221_v59  ;;  %v4241_v46 = vmax.f32 %v4239_v12, %v4240_v13  ;;  %v4234_v8 = vmax.f32 %v4232_v2, %v4233_v39  ;;  %v4253_v58 = vsel %vm268_vm1, %v8088_v47, -inf  ;;  %v5852_v59 = vpop.f32.mrf.mxu1  ;;  %v3787_v13 = vpop.f32.mrf.mxu0 }
 0x319   : > { %v5918_v61 = vpop.eup %5917  ;;  %4723 = vst.msk [vmem:[%s8016_s16 + $0x48] sm:$0xff] %vm268_vm1, %v4691_v20  ;;  %v4521_v7 = vadd.f32 %v4520_v6, %v4519_v1  ;;  %5927 = vpow2.f32 %v4390_v15  ;;  %v4231_v49 = vmax.f32 %v4229_v25, %v4230_v40  ;;  %v4254_v10 = vrot.slane %v4253_v58, 4 }
 0x31a   : > { %v5920_v55 = vpop.eup %5919  ;;  %v4690_v44 = vmul.f32 %v5918_v61, %v8009_v53  ;;  %v4223_v17 = vrot.slane %v4222_v21, 1  ;;  %v4242_v24 = vrot.slane %v4241_v46, 2  ;;  %v4235_v5 = vrot.slane %v4234_v8, 2  ;;  %v4048_v61 = vpop.f32.mrf.mxu1 }
 0x31b   : > { %v8096_v52 = vpop.eup %5921  ;;  %v4693_v57 = vmul.f32 %v5920_v55, %v8022_v45  ;;  %v4522_v36 = vrot.slane %v4521_v7, 1  ;;  %v4347_v23 = vsub.f32 %v8052_v9, %v4231_v49  ;;  %v4255_v34 = vmax.f32 %v4253_v58, %v4254_v10 }
 0x31c   : > { %4722 = vst.msk [vmem:[%s8016_s16 + $0x40] sm:$0xff] %vm268_vm1, %v4690_v44  ;;  %v4510_v54 = vsel %vm268_vm1, %v8096_v52, 0.0  ;;  %v4224_v16 = vmax.f32 %v4222_v21, %v4223_v17  ;;  %v4243_v53 = vmax.f32 %v4241_v46, %v4242_v24  ;;  %v4236_v51 = vmax.f32 %v4234_v8, %v4235_v5 }
 0x31d   : > { %4725 = vst.msk [vmem:[%s8016_s16 + $0x58] sm:$0xff] %vm268_vm1, %v4693_v57  ;;  %v4523_v42 = vadd.f32 %v4522_v36, %v4521_v7  ;;  %v4511_v60 = vrot.slane %v4510_v54, 4  ;;  %v4396_v50 = vmul.f32 1.442695, %v4347_v23  ;;  %v4256_v45 = vrot.slane %v4255_v34, 2 }
 0x31e   : > { %v4346_v35 = vsub.f32 %v8063_v4, %v4224_v16  ;;  %v4244_v9 = vrot.slane %v4243_v53, 1  ;;  %v4237_v28 = vrot.slane %v4236_v51, 1  ;;  %v3776_v12 = vadd.f32 %v3775_v56, %v7835_v3 }
 0x31f   : > { %v8108_v2 = vpop.eup %5923  ;;  %5929 = vrcp.f32 %v4523_v42  ;;  %v4512_v14 = vadd.f32 %v4511_v60, %v4510_v54  ;;  %v4257_v1 = vmax.f32 %v4255_v34, %v4256_v45  ;;  %v3794_v18 = vadd.f32 %v5796_v0, %v7838_v11 }
 0x320   : > { %v4531_v25 = vsel %vm268_vm1, %v8108_v2, 0.0  ;;  %5931 = vpow2.f32 %v4396_v50  ;;  %v4394_v32 = vmul.f32 1.442695, %v4346_v35  ;;  %v4245_v38 = vmax.f32 %v4243_v53, %v4244_v9 }
 0x321   : > { %v4513_v4 = vrot.slane %v4512_v14, 2  ;;  %v4532_v39 = vrot.slane %v4531_v25, 4  ;;  %v4238_v20 = vmax.f32 %v4236_v51, %v4237_v28  ;;  %v4258_v6 = vrot.slane %v4257_v1, 1 }
 0x322   : > { %v5926_v3 = vpop.eup %5925  ;;  %5933 = vpow2.f32 %v4394_v32  ;;  %v4349_v15 = vsub.f32 %v8078_v63, %v4245_v38  ;;  %v8114_v40 = vadd.f32 %v4036_v27, %v3776_v12  ;;  %v8116_v11 = vadd.f32 %v5852_v59, %v3794_v18  ;;  %v5799_v63 = vpop.f32.mrf.mxu0 }
 0x323   : > { %v4692_v21 = vmul.f32 %v5926_v3, %v8041_v43  ;;  %v4514_v46 = vadd.f32 %v4513_v4, %v4512_v14  ;;  %v4533_v8 = vadd.f32 %v4532_v39, %v4531_v25  ;;  %v4348_v58 = vsub.f32 %v8080_v31, %v4238_v20  ;;  %v5855_v27 = vpop.f32.mrf.mxu1 }
 0x324   : > { %v4400_v56 = vmul.f32 1.442695, %v4349_v15  ;;  %v4259_v7 = vmax.f32 %v4257_v1, %v4258_v6  ;;  %v4246_v49 = vsel %vm268_vm1, %v8114_v40, -inf  ;;  %v4267_v10 = vsel %vm268_vm1, %v8116_v11, -inf  ;;  %v3799_v0 = vpop.f32.mrf.mxu0 }
 0x325   : > { %4724 = vst.msk [vmem:[%s8016_s16 + $0x50] sm:$0xff] %vm268_vm1, %v4692_v21  ;;  %v4515_v55 = vrot.slane %v4514_v46, 1  ;;  %v4534_v44 = vrot.slane %v4533_v8, 2  ;;  %v4398_v17 = vmul.f32 1.442695, %v4348_v58  ;;  %v4247_v43 = vrot.slane %v4246_v49, 4  ;;  %v4060_v25 = vpop.f32.mrf.mxu1 }
 0x326   : > { %v8126_v24 = vpop.eup %5927  ;;  %5935 = vpow2.f32 %v4400_v56  ;;  %v4351_v31 = vsub.f32 %v8088_v47, %v4259_v7  ;;  %v4268_v5 = vrot.slane %v4267_v10, 4  ;;  %v3788_v57 = vadd.f32 %v3787_v13, %v7841_v26 }
 0x327   : > { %v4516_v36 = vadd.f32 %v4515_v55, %v4514_v46  ;;  %v4535_v23 = vadd.f32 %v4534_v44, %v4533_v8  ;;  %v4524_v34 = vsel %vm268_vm1, %v8126_v24, 0.0  ;;  %5937 = vpow2.f32 %v4398_v17 }
 0x328   : > { %v4525_v54 = vrot.slane %v4524_v34, 4  ;;  %v4404_v16 = vmul.f32 1.442695, %v4351_v31  ;;  %v4248_v53 = vmax.f32 %v4246_v49, %v4247_v43  ;;  %v4269_v51 = vmax.f32 %v4267_v10, %v4268_v5 }
 0x329   : > { %5939 = vrcp.f32 %v4516_v36  ;;  %v4536_v42 = vrot.slane %v4535_v23, 1  ;;  %v8132_v60 = vadd.f32 %v4048_v61, %v3788_v57  ;;  %v3806_v47 = vadd.f32 %v5799_v63, %v7844_v48 }
 0x32a   : > { %v4526_v50 = vadd.f32 %v4525_v54, %v4524_v34  ;;  %5941 = vpow2.f32 %v4404_v16  ;;  %v4249_v26 = vrot.slane %v4248_v53, 2  ;;  %v4270_v45 = vrot.slane %v4269_v51, 2 }
 0x32b   : > { %v4537_v35 = vadd.f32 %v4536_v42, %v4535_v23  ;;  %v4260_v9 = vsel %vm268_vm1, %v8132_v60, -inf  ;;  %v8137_v28 = vadd.f32 %v5855_v27, %v3806_v47  ;;  %v3800_v12 = vadd.f32 %v3799_v0, %v7847_v37  ;;  %v5802_v0 = vpop.f32.mrf.mxu0 }
 0x32c   : > { %v5930_v14 = vpop.eup %5929  ;;  %v4527_v1 = vrot.slane %v4526_v50, 2  ;;  %v4250_v18 = vmax.f32 %v4248_v53, %v4249_v26  ;;  %v4271_v32 = vmax.f32 %v4269_v51, %v4270_v45  ;;  %v4261_v38 = vrot.slane %v4260_v9, 4 }
 0x32d   : > { %v8140_v48 = vpop.eup %5931  ;;  %v4695_v59 = vmul.f32 %v5930_v14, %v8072_v30  ;;  %5943 = vrcp.f32 %v4537_v35  ;;  %v4281_v13 = vsel %vm268_vm1, %v8137_v28, -inf  ;;  %v8145_v4 = vadd.f32 %v4060_v25, %v3800_v12 }
 0x32e   : > { %v4528_v39 = vadd.f32 %v4527_v1, %v4526_v50  ;;  %v4545_v37 = vsel %vm268_vm1, %v8140_v48, 0.0  ;;  %v4251_v20 = vrot.slane %v4250_v18, 1  ;;  %v4272_v6 = vrot.slane %v4271_v32, 1 }
 0x32f   : > { %v8149_v3 = vpop.eup %5933  ;;  %4727 = vst.msk [vmem:[%s8016_s16 + $0x68] sm:$0xff] %vm268_vm1, %v4695_v59  ;;  %v4546_v15 = vrot.slane %v4545_v37, 4  ;;  %v4262_v21 = vmax.f32 %v4260_v9, %v4261_v38  ;;  %v4282_v46 = vrot.slane %v4281_v13, 4  ;;  %v4274_v30 = vsel %vm268_vm1, %v8145_v4, -inf }
 0x330   : > { %v4529_v8 = vrot.slane %v4528_v39, 1  ;;  %v4538_v58 = vsel %vm268_vm1, %v8149_v3, 0.0  ;;  %v4252_v56 = vmax.f32 %v4250_v18, %v4251_v20  ;;  %v4273_v61 = vmax.f32 %v4271_v32, %v4272_v6 }
 0x331   : > { %v4547_v7 = vadd.f32 %v4546_v15, %v4545_v37  ;;  %v4539_v49 = vrot.slane %v4538_v58, 4  ;;  %v4263_v10 = vrot.slane %v4262_v21, 2  ;;  %v4283_v63 = vmax.f32 %v4281_v13, %v4282_v46 }
 0x332   : > { %v4530_v55 = vadd.f32 %v4529_v8, %v4528_v39  ;;  %v4350_v44 = vsub.f32 %v8114_v40, %v4252_v56  ;;  %v4353_v17 = vsub.f32 %v8116_v11, %v4273_v61  ;;  %v4275_v43 = vrot.slane %v4274_v30, 4  ;;  %v3811_v39 = vpop.f32.mrf.mxu0 }
 0x333   : > { %v8159_v31 = vpop.eup %5935  ;;  %v4548_v5 = vrot.slane %v4547_v7, 2  ;;  %v4540_v57 = vadd.f32 %v4539_v49, %v4538_v58  ;;  %v4264_v36 = vmax.f32 %v4262_v21, %v4263_v10  ;;  %v4284_v23 = vrot.slane %v4283_v63, 2 }
 0x334   : > { %v8161_v34 = vpop.eup %5937  ;;  %5945 = vrcp.f32 %v4530_v55  ;;  %v4559_v54 = vsel %vm268_vm1, %v8159_v31, 0.0  ;;  %v4402_v16 = vmul.f32 1.442695, %v4350_v44  ;;  %v4408_v27 = vmul.f32 1.442695, %v4353_v17  ;;  %v5805_v44 = vpop.f32.mrf.mxu0 }
 0x335   : > { %v4549_v53 = vadd.f32 %v4548_v5, %v4547_v7  ;;  %v4541_v51 = vrot.slane %v4540_v57, 2  ;;  %v4560_v40 = vrot.slane %v4559_v54, 4  ;;  %v4552_v11 = vsel %vm268_vm1, %v8161_v34, 0.0 }
 0x336   : > { %v5940_v42 = vpop.eup %5939  ;;  %v4553_v47 = vrot.slane %v4552_v11, 4  ;;  %5947 = vpow2.f32 %v4402_v16  ;;  %v4265_v50 = vrot.slane %v4264_v36, 1  ;;  %v4285_v26 = vmax.f32 %v4283_v63, %v4284_v23 }
 0x337   : > { %v8167_v45 = vpop.eup %5941  ;;  %v4694_v35 = vmul.f32 %v5940_v42, %v8096_v52  ;;  %v4550_v9 = vrot.slane %v4549_v53, 1  ;;  %v4542_v12 = vadd.f32 %v4541_v51, %v4540_v57  ;;  %v4561_v14 = vadd.f32 %v4560_v40, %v4559_v54  ;;  %v5858_v52 = vpop.f32.mrf.mxu1 }
 0x338   : > { %v4554_v1 = vadd.f32 %v4553_v47, %v4552_v11  ;;  %v4573_v18 = vsel %vm268_vm1, %v8167_v45, 0.0  ;;  %5949 = vpow2.f32 %v4408_v27  ;;  %v4266_v25 = vmax.f32 %v4264_v36, %v4265_v50 }
 0x339   : > { %4726 = vst.msk [vmem:[%s8016_s16 + $0x60] sm:$0xff] %vm268_vm1, %v4694_v35  ;;  %v4551_v32 = vadd.f32 %v4550_v9, %v4549_v53  ;;  %v4543_v38 = vrot.slane %v4542_v12, 1  ;;  %v4562_v59 = vrot.slane %v4561_v14, 2  ;;  %v4574_v13 = vrot.slane %v4573_v18, 4 }
 0x33a   : > { %v5944_v37 = vpop.eup %5943  ;;  %v4555_v20 = vrot.slane %v4554_v1, 2  ;;  %v4352_v6 = vsub.f32 %v8132_v60, %v4266_v25  ;;  %v4286_v15 = vrot.slane %v4285_v26, 1  ;;  %v4276_v21 = vmax.f32 %v4274_v30, %v4275_v43  ;;  %v4072_v30 = vpop.f32.mrf.mxu1 }
 0x33b   : > { %v4697_v46 = vmul.f32 %v5944_v37, %v8108_v2  ;;  %5951 = vrcp.f32 %v4551_v32  ;;  %v4544_v8 = vadd.f32 %v4543_v38, %v4542_v12  ;;  %v4563_v58 = vadd.f32 %v4562_v59, %v4561_v14 }
 0x33c   : > { %v4556_v56 = vadd.f32 %v4555_v20, %v4554_v1  ;;  %v4575_v61 = vadd.f32 %v4574_v13, %v4573_v18  ;;  %v4406_v7 = vmul.f32 1.442695, %v4352_v6  ;;  %v4287_v49 = vmax.f32 %v4285_v26, %v4286_v15 }
 0x33d   : > { %4729 = vst.msk [vmem:[%s8016_s16 + $0x78] sm:$0xff] %vm268_vm1, %v4697_v46  ;;  %5953 = vrcp.f32 %v4544_v8  ;;  %v4564_v10 = vrot.slane %v4563_v58, 1  ;;  %v4277_v63 = vrot.slane %v4276_v21, 2  ;;  %v3818_v55 = vadd.f32 %v5802_v0, %v7850_v41 }
 0x33e   : > { %v4557_v60 = vrot.slane %v4556_v56, 1  ;;  %v4576_v17 = vrot.slane %v4575_v61, 2  ;;  %5955 = vpow2.f32 %v4406_v7  ;;  %v4355_v2 = vsub.f32 %v8137_v28, %v4287_v49  ;;  %v3823_v28 = vpop.f32.mrf.mxu0 }
 0x33f   : > { %v4565_v43 = vadd.f32 %v4564_v10, %v4563_v58  ;;  %v4278_v5 = vmax.f32 %v4276_v21, %v4277_v63  ;;  %v8180_v57 = vadd.f32 %v5858_v52, %v3818_v55  ;;  %v3812_v36 = vadd.f32 %v3811_v39, %v7853_v29  ;;  %v5861_v29 = vpop.f32.mrf.mxu1 }
 0x340   : > { %v4558_v23 = vadd.f32 %v4557_v60, %v4556_v56  ;;  %v4577_v54 = vadd.f32 %v4576_v17, %v4575_v61  ;;  %v4412_v16 = vmul.f32 1.442695, %v4355_v2  ;;  %v3830_v27 = vadd.f32 %v5805_v44, %v7858_v62  ;;  %v5808_v38 = vpop.f32.mrf.mxu0 }
 0x341   : > { %v5946_v53 = vpop.eup %5945  ;;  %5957 = vrcp.f32 %v4565_v43  ;;  %v4279_v41 = vrot.slane %v4278_v5, 1  ;;  %v4295_v51 = vsel %vm268_vm1, %v8180_v57, -inf  ;;  %v8186_v40 = vadd.f32 %v4072_v30, %v3812_v36  ;;  %v4084_v6 = vpop.f32.mrf.mxu1 }
 0x342   : > { %v4696_v11 = vmul.f32 %v5946_v53, %v8126_v24  ;;  %5959 = vrcp.f32 %v4558_v23  ;;  %v4578_v0 = vrot.slane %v4577_v54, 1  ;;  %v4296_v42 = vrot.slane %v4295_v51, 4 }
 0x343   : > { %v8189_v47 = vpop.eup %5947  ;;  %5961 = vpow2.f32 %v4412_v16  ;;  %v4280_v62 = vmax.f32 %v4278_v5, %v4279_v41  ;;  %v4288_v50 = vsel %vm268_vm1, %v8186_v40, -inf  ;;  %v8193_v26 = vadd.f32 %v5861_v29, %v3830_v27  ;;  %v5864_v16 = vpop.f32.mrf.mxu1 }
 0x344   : > { %4728 = vst.msk [vmem:[%s8016_s16 + $0x70] sm:$0xff] %vm268_vm1, %v4696_v11  ;;  %v4579_v35 = vadd.f32 %v4578_v0, %v4577_v54  ;;  %v4566_v9 = vsel %vm268_vm1, %v8189_v47, 0.0  ;;  %v4297_v24 = vmax.f32 %v4295_v51, %v4296_v42  ;;  %v4289_v12 = vrot.slane %v4288_v50, 4 }
 0x345   : > { %v8199_v14 = vpop.eup %5949  ;;  %v4567_v1 = vrot.slane %v4566_v9, 4  ;;  %v4354_v18 = vsub.f32 %v8145_v4, %v4280_v62  ;;  %v4309_v25 = vsel %vm268_vm1, %v8193_v26, -inf  ;;  %v3824_v32 = vadd.f32 %v3823_v28, %v7863_v22 }
 0x346   : > { %5963 = vrcp.f32 %v4579_v35  ;;  %v4587_v59 = vsel %vm268_vm1, %v8199_v14, 0.0  ;;  %v4298_v13 = vrot.slane %v4297_v24, 2  ;;  %v4290_v39 = vmax.f32 %v4288_v50, %v4289_v12 }
 0x347   : > { %v4568_v37 = vadd.f32 %v4567_v1, %v4566_v9  ;;  %v4588_v20 = vrot.slane %v4587_v59, 4  ;;  %v4410_v52 = vmul.f32 1.442695, %v4354_v18  ;;  %v4310_v15 = vrot.slane %v4309_v25, 4 }
 0x348   : > { %v5952_v21 = vpop.eup %5951  ;;  %v4299_v4 = vmax.f32 %v4297_v24, %v4298_v13  ;;  %v4291_v46 = vrot.slane %v4290_v39, 2  ;;  %v8207_v8 = vadd.f32 %v4084_v6, %v3824_v32  ;;  %v3842_v22 = vadd.f32 %v5808_v38, %v7869_v19 }
 0x349   : > { %v4699_v58 = vmul.f32 %v5952_v21, %v8140_v48  ;;  %v4569_v56 = vrot.slane %v4568_v37, 2  ;;  %v4589_v61 = vadd.f32 %v4588_v20, %v4587_v59  ;;  %5965 = vpow2.f32 %v4410_v52 }
 0x34a   : > { %v5954_v7 = vpop.eup %5953  ;;  %v4300_v49 = vrot.slane %v4299_v4, 1  ;;  %v4292_v10 = vmax.f32 %v4290_v39, %v4291_v46  ;;  %v4311_v63 = vmax.f32 %v4309_v25, %v4310_v15  ;;  %v4302_v55 = vsel %vm268_vm1, %v8207_v8, -inf }
 0x34b   : > { %v8213_v44 = vpop.eup %5955  ;;  %4731 = vst.msk [vmem:[%s8016_s16 + $0x88] sm:$0xff] %vm268_vm1, %v4699_v58  ;;  %v4698_v60 = vmul.f32 %v5954_v7, %v8149_v3  ;;  %v4570_v19 = vadd.f32 %v4569_v56, %v4568_v37  ;;  %v4590_v17 = vrot.slane %v4589_v61, 2  ;;  %v4303_v48 = vrot.slane %v4302_v55, 4 }
 0x34c   : > { %v4580_v30 = vsel %vm268_vm1, %v8213_v44, 0.0  ;;  %v4301_v2 = vmax.f32 %v4299_v4, %v4300_v49  ;;  %v4293_v43 = vrot.slane %v4292_v10, 1  ;;  %v4312_v5 = vrot.slane %v4311_v63, 2 }
 0x34d   : > { %4730 = vst.msk [vmem:[%s8016_s16 + $0x80] sm:$0xff] %vm268_vm1, %v4698_v60  ;;  %v4571_v36 = vrot.slane %v4570_v19, 1  ;;  %v4591_v23 = vadd.f32 %v4590_v17, %v4589_v61  ;;  %v4581_v54 = vrot.slane %v4580_v30, 4  ;;  %v4304_v27 = vmax.f32 %v4302_v55, %v4303_v48 }
 0x34e   : > { %v5958_v53 = vpop.eup %5957  ;;  %v4357_v3 = vsub.f32 %v8180_v57, %v4301_v2  ;;  %v4294_v41 = vmax.f32 %v4292_v10, %v4293_v43  ;;  %v4313_v51 = vmax.f32 %v4311_v63, %v4312_v5  ;;  %v8223_v28 = vadd.f32 %v5864_v16, %v3842_v22 }
 0x34f   : > { %v5960_v11 = vpop.eup %5959  ;;  %v4701_v0 = vmul.f32 %v5958_v53, %v8159_v31  ;;  %v4572_v29 = vadd.f32 %v4571_v36, %v4570_v19  ;;  %v4592_v42 = vrot.slane %v4591_v23, 1  ;;  %v4582_v62 = vadd.f32 %v4581_v54, %v4580_v30 }
 0x350   : > { %v8226_v50 = vpop.eup %5961  ;;  %v4700_v35 = vmul.f32 %v5960_v11, %v8161_v34  ;;  %v4416_v9 = vmul.f32 1.442695, %v4357_v3  ;;  %v4356_v24 = vsub.f32 %v8186_v40, %v4294_v41  ;;  %v4314_v12 = vrot.slane %v4313_v51, 1  ;;  %v3835_v34 = vpop.f32.mrf.mxu0 }
 0x351   : > { %4733 = vst.msk [vmem:[%s8016_s16 + $0x98] sm:$0xff] %vm268_vm1, %v4701_v0  ;;  %5967 = vrcp.f32 %v4572_v29  ;;  %v4593_v57 = vadd.f32 %v4592_v42, %v4591_v23  ;;  %v4583_v1 = vrot.slane %v4582_v62, 2  ;;  %v4601_v18 = vsel %vm268_vm1, %v8226_v50, 0.0 }
 0x352   : > { %4732 = vst.msk [vmem:[%s8016_s16 + $0x90] sm:$0xff] %vm268_vm1, %v4700_v35  ;;  %v4602_v31 = vrot.slane %v4601_v18, 4  ;;  %5969 = vpow2.f32 %v4416_v9  ;;  %v4414_v25 = vmul.f32 1.442695, %v4356_v24  ;;  %v4315_v32 = vmax.f32 %v4313_v51, %v4314_v12 }
 0x353   : > { %v5964_v38 = vpop.eup %5963  ;;  %5971 = vrcp.f32 %v4593_v57  ;;  %v4584_v40 = vadd.f32 %v4583_v1, %v4582_v62  ;;  %v4305_v59 = vrot.slane %v4304_v27, 2  ;;  %v4323_v13 = vsel %vm268_vm1, %v8223_v28, -inf }
 0x354   : > { %v4703_v39 = vmul.f32 %v5964_v38, %v8167_v45  ;;  %v4603_v37 = vadd.f32 %v4602_v31, %v4601_v18  ;;  %5973 = vpow2.f32 %v4414_v25  ;;  %v4359_v20 = vsub.f32 %v8193_v26, %v4315_v32  ;;  %v4096_v45 = vpop.f32.mrf.mxu1 }
 0x355   : > { %v4585_v52 = vrot.slane %v4584_v40, 1  ;;  %v4306_v6 = vmax.f32 %v4304_v27, %v4305_v59  ;;  %v4324_v15 = vrot.slane %v4323_v13, 4  ;;  %v3836_v21 = vadd.f32 %v3835_v34, %v7874_v33 }
 0x356   : > { %v8241_v4 = vpop.eup %5965  ;;  %4735 = vst.msk [vmem:[%s8016_s16 + $0xa8] sm:$0xff] %vm268_vm1, %v4703_v39  ;;  %v4604_v46 = vrot.slane %v4603_v37, 2  ;;  %v4420_v22 = vmul.f32 1.442695, %v4359_v20 }
 0x357   : > { %v4586_v58 = vadd.f32 %v4585_v52, %v4584_v40  ;;  %v4594_v56 = vsel %vm268_vm1, %v8241_v4, 0.0  ;;  %v4307_v61 = vrot.slane %v4306_v6, 1  ;;  %v4325_v7 = vmax.f32 %v4323_v13, %v4324_v15 }
 0x358   : > { %v4605_v49 = vadd.f32 %v4604_v46, %v4603_v37  ;;  %v4595_v26 = vrot.slane %v4594_v56, 4  ;;  %5975 = vpow2.f32 %v4420_v22  ;;  %v4097_v10 = vadd.f32 %v4096_v45, %v3836_v21 }
 0x359   : > { %5977 = vrcp.f32 %v4586_v58  ;;  %v4308_v63 = vmax.f32 %v4306_v6, %v4307_v61  ;;  %v4326_v33 = vrot.slane %v4325_v7, 2 }
 0x35a   : > { %v4606_v55 = vrot.slane %v4605_v49, 1  ;;  %v4596_v60 = vadd.f32 %v4595_v26, %v4594_v56  ;;  %v4316_v19 = vsel %vm268_vm1, %v4097_v10, -inf }
 0x35b   : > { %v4358_v17 = vsub.f32 %v8207_v8, %v4308_v63  ;;  %v4327_v48 = vmax.f32 %v4325_v7, %v4326_v33  ;;  %v4317_v30 = vrot.slane %v4316_v19, 4 }
 0x35c   : > { %v4607_v2 = vadd.f32 %v4606_v55, %v4605_v49  ;;  %v4597_v43 = vrot.slane %v4596_v60, 2 }
 0x35d   : > { %v4418_v5 = vmul.f32 1.442695, %v4358_v17  ;;  %v4328_v36 = vrot.slane %v4327_v48, 1  ;;  %v4318_v23 = vmax.f32 %v4316_v19, %v4317_v30 }
 0x35e   : > { %v5968_v54 = vpop.eup %5967  ;;  %5979 = vrcp.f32 %v4607_v2  ;;  %v4598_v16 = vadd.f32 %v4597_v43, %v4596_v60 }
 0x35f   : > { %v8249_v27 = vpop.eup %5969  ;;  %v4702_v53 = vmul.f32 %v5968_v54, %v8189_v47  ;;  %5981 = vpow2.f32 %v4418_v5  ;;  %v4329_v3 = vmax.f32 %v4327_v48, %v4328_v36  ;;  %v4319_v41 = vrot.slane %v4318_v23, 2 }
 0x360   : > { %v5972_v8 = vpop.eup %5971  ;;  %v4599_v51 = vrot.slane %v4598_v16, 1  ;;  %v4615_v11 = vsel %vm268_vm1, %v8249_v27, 0.0 }
 0x361   : > { %v8254_v0 = vpop.eup %5973  ;;  %4734 = vst.msk [vmem:[%s8016_s16 + $0xa0] sm:$0xff] %vm268_vm1, %v4702_v53  ;;  %v4705_v29 = vmul.f32 %v5972_v8, %v8199_v14  ;;  %v4616_v42 = vrot.slane %v4615_v11, 4  ;;  %v4361_v62 = vsub.f32 %v8223_v28, %v4329_v3  ;;  %v4320_v35 = vmax.f32 %v4318_v23, %v4319_v41 }
 0x362   : > { %v4600_v9 = vadd.f32 %v4599_v51, %v4598_v16  ;;  %v4608_v47 = vsel %vm268_vm1, %v8254_v0, 0.0 }
 0x363   : > { %4737 = vst.msk [vmem:[%s8016_s16 + $0xb8] sm:$0xff] %vm268_vm1, %v4705_v29  ;;  %v4617_v24 = vadd.f32 %v4616_v42, %v4615_v11  ;;  %v4609_v12 = vrot.slane %v4608_v47, 4  ;;  %v4424_v57 = vmul.f32 1.442695, %v4361_v62  ;;  %v4321_v1 = vrot.slane %v4320_v35, 1 }
 0x364   : > { %5983 = vrcp.f32 %v4600_v9 }
 0x365   : > { %v8264_v18 = vpop.eup %5975  ;;  %v4618_v31 = vrot.slane %v4617_v24, 2  ;;  %v4610_v14 = vadd.f32 %v4609_v12, %v4608_v47  ;;  %5985 = vpow2.f32 %v4424_v57  ;;  %v4322_v25 = vmax.f32 %v4320_v35, %v4321_v1 }
 0x366   : > { %v5978_v28 = vpop.eup %5977  ;;  %v4629_v32 = vsel %vm268_vm1, %v8264_v18, 0.0 }
 0x367   : > { %v4704_v34 = vmul.f32 %v5978_v28, %v8213_v44  ;;  %v4619_v38 = vadd.f32 %v4618_v31, %v4617_v24  ;;  %v4611_v40 = vrot.slane %v4610_v14, 2  ;;  %v4630_v59 = vrot.slane %v4629_v32, 4 }
 0x368   : > { %v4360_v13 = vsub.f32 %v4097_v10, %v4322_v25 }
 0x369   : > { %4736 = vst.msk [vmem:[%s8016_s16 + $0xb0] sm:$0xff] %vm268_vm1, %v4704_v34  ;;  %v4620_v39 = vrot.slane %v4619_v38, 1  ;;  %v4612_v37 = vadd.f32 %v4611_v40, %v4610_v14  ;;  %v4631_v20 = vadd.f32 %v4630_v59, %v4629_v32 }
 0x36a   : > { %v4422_v52 = vmul.f32 1.442695, %v4360_v13 }
 0x36b   : > { %v5980_v6 = vpop.eup %5979  ;;  %v4621_v15 = vadd.f32 %v4620_v39, %v4619_v38  ;;  %v4613_v21 = vrot.slane %v4612_v37, 1  ;;  %v4632_v46 = vrot.slane %v4631_v20, 2 }
 0x36c   : > { %v5982_v22 = vpop.eup %5981  ;;  %v4707_v58 = vmul.f32 %v5980_v6, %v8226_v50  ;;  %5987 = vpow2.f32 %v4422_v52 }
 0x36d   : > { %5989 = vrcp.f32 %v4621_v15  ;;  %v4614_v44 = vadd.f32 %v4613_v21, %v4612_v37  ;;  %v4633_v56 = vadd.f32 %v4632_v46, %v4631_v20  ;;  %v4622_v45 = vsel %vm268_vm1, %v5982_v22, 0.0 }
 0x36e   : > { %4739 = vst.msk [vmem:[%s8016_s16 + $0xc8] sm:$0xff] %vm268_vm1, %v4707_v58  ;;  %v4623_v61 = vrot.slane %v4622_v45, 4 }
 0x36f   : > { %5991 = vrcp.f32 %v4614_v44  ;;  %v4634_v7 = vrot.slane %v4633_v56, 1 }
 0x370   : > { %v4624_v49 = vadd.f32 %v4623_v61, %v4622_v45 }
 0x371   : > { %v5984_v26 = vpop.eup %5983  ;;  %v4635_v10 = vadd.f32 %v4634_v7, %v4633_v56 }
 0x372   : > { %v5986_v63 = vpop.eup %5985  ;;  %v4706_v33 = vmul.f32 %v5984_v26, %v8241_v4  ;;  %v4625_v55 = vrot.slane %v4624_v49, 2 }
 0x373   : > { %5993 = vrcp.f32 %v4635_v10  ;;  %v4643_v50 = vsel %vm268_vm1, %v5986_v63, 0.0 }
 0x374   : > { %4738 = vst.msk [vmem:[%s8016_s16 + $0xc0] sm:$0xff] %vm268_vm1, %v4706_v33  ;;  %v4626_v60 = vadd.f32 %v4625_v55, %v4624_v49  ;;  %v4644_v19 = vrot.slane %v4643_v50, 4 }
 0x376   : > { %v4627_v17 = vrot.slane %v4626_v60, 1  ;;  %v4645_v48 = vadd.f32 %v4644_v19, %v4643_v50 }
 0x378   : > { %v4628_v30 = vadd.f32 %v4627_v17, %v4626_v60  ;;  %v4646_v2 = vrot.slane %v4645_v48, 2 }
 0x379   : > { %v5988_v43 = vpop.eup %5987 }
 0x37a   : > { %v5990_v5 = vpop.eup %5989  ;;  %5995 = vrcp.f32 %v4628_v30  ;;  %v4647_v36 = vadd.f32 %v4646_v2, %v4645_v48  ;;  %v4636_v4 = vsel %vm268_vm1, %v5988_v43, 0.0 }
 0x37b   : > { %v4709_v23 = vmul.f32 %v5990_v5, %v8249_v27  ;;  %v4637_v54 = vrot.slane %v4636_v4, 4 }
 0x37c   : > { %v5992_v16 = vpop.eup %5991  ;;  %v4648_v53 = vrot.slane %v4647_v36, 1 }
 0x37d   : > { %4741 = vst.msk [vmem:[%s8016_s16 + $0xd8] sm:$0xff] %vm268_vm1, %v4709_v23  ;;  %v4708_v3 = vmul.f32 %v5992_v16, %v8254_v0  ;;  %v4638_v41 = vadd.f32 %v4637_v54, %v4636_v4 }
 0x37e   : > { %v4649_v8 = vadd.f32 %v4648_v53, %v4647_v36 }
 0x37f   : > { %4740 = vst.msk [vmem:[%s8016_s16 + $0xd0] sm:$0xff] %vm268_vm1, %v4708_v3  ;;  %v4639_v51 = vrot.slane %v4638_v41, 2 }
 0x380   : > { %v5994_v11 = vpop.eup %5993  ;;  %5997 = vrcp.f32 %v4649_v8 }
 0x381   : > { %v4711_v29 = vmul.f32 %v5994_v11, %v8264_v18  ;;  %v4640_v27 = vadd.f32 %v4639_v51, %v4638_v41 }
 0x383   : > { %4743 = vst.msk [vmem:[%s8016_s16 + $0xe8] sm:$0xff] %vm268_vm1, %v4711_v29  ;;  %v4641_v42 = vrot.slane %v4640_v27, 1 }
 0x385   : > { %v4642_v62 = vadd.f32 %v4641_v42, %v4640_v27 }
 0x387   : > { %v5996_v35 = vpop.eup %5995  ;;  %5999 = vrcp.f32 %v4642_v62 }
 0x388   : > { %v4710_v9 = vmul.f32 %v5996_v35, %v5982_v22 }
 0x38a   : > { %4742 = vst.msk [vmem:[%s8016_s16 + $0xe0] sm:$0xff] %vm268_vm1, %v4710_v9 }
 0x38d   : > { %v5998_v0 = vpop.eup %5997 }
 0x38e   : > { %v4713_v47 = vmul.f32 %v5998_v0, %v5986_v63 }
 0x390   : > { %4745 = vst.msk [vmem:[%s8016_s16 + $0xf8] sm:$0xff] %vm268_vm1, %v4713_v47 }
 0x394   : > { %v6000_v24 = vpop.eup %5999 }
 0x395   : > { %v4712_v12 = vmul.f32 %v6000_v24, %v5988_v43 }
 0x397   : > { %4744 = vst.msk [vmem:[%s8016_s16 + $0xf0] sm:$0xff] %vm268_vm1, %v4712_v12 }
 0x398 PF: > { %s15_s18 = sadd.s32 1, %s6007_s18  }
 0x399   : > { %p12_p4 = scmp.ge.s32.totalorder %s15_s18, 4  }
 0x39b   :  { %14 = sbr.rel (!%p12_p4) target bundleno = 1 (0x1), region = 70 }

</bundles_post_ra>
